<compile_context>
chip_gen: v5e
topology: v5e:2x2
jax: 0.10.0
libtpu: 0.0.40
codegen_flags: <defaults>
</compile_context>

<pallas_src>
import functools

import jax
import jax.numpy as jnp
import numpy as np
from jax import lax
from jax.experimental import pallas as pl
from jax.experimental.pallas import tpu as pltpu

C_LOW = 128   # low-res branch channels (fixed by the module)
C_HIGH = 64   # high-res branch channels
C_OUT = 128   # fused output channels

_VMEM_LIMIT_BYTES = 48 * 1024 * 1024   # > v5e/v6e scoped defaults, < v7x's 64 MiB physical
_VMEM_TILE_BUDGET = 24 * 1024 * 1024   # per-tile working-set budget for the tile picker


# ----------------------------------------------------------------------------
# Pallas kernel: one (batch, row-tile) per grid step.
# ----------------------------------------------------------------------------
def _ffm_kernel(low_ref, mh_ref, high_ref, w_dw_ref, bn_shift_ref,
                w_low_ref, w_high_ref, b_ref, out_ref, *, TH, W, dil):
    # low_ref  : (1, BAND, W+2d, 128) bf16  -- W-upsampled + W-halo'd low band
    # mh_ref   : (1, TH+2d, BAND)     bf16  -- per-tile H-interp matrix (zero rows = H halo)
    # high_ref : (1, TH, W, 64)       bf16
    # w_dw_ref : (9, 128)             bf16/f32 (BN scale folded in)
    # bn_shift_ref, b_ref : (1, 128)  f32
    # w_low_ref: (128, 128) bf16 ; w_high_ref: (64, 128) bf16
    band = low_ref.shape[1]
    wp = low_ref.shape[2]
    thp = TH + 2 * dil

    # 1) bilinear H-upsample + top/bottom zero halo as ONE MXU matmul over the
    #    low-res band (K = BAND, not the full low height).
    low2d = low_ref[0].reshape(band, wp * C_LOW)
    up = jnp.dot(mh_ref[0], low2d, preferred_element_type=jnp.float32)
    up = up.reshape(thp, wp, C_LOW).astype(w_dw_ref.dtype)

    # 2) 3x3 dilated depthwise conv (BN scale pre-folded into the weights).
    #    The sublane-unaligned W shift is hoisted: 3 shifts (one per kw), not 9.
    # TODO(synk): routing the kw shifts through pltpu.roll (XLU) is a further
    #             v6e/v7x micro-optimization.
    w_dw = w_dw_ref[...]                                      # (9, 128)
    acc = None
    for kw in range(3):
        col = up[:, kw * dil:kw * dil + W, :]                 # (thp, W, 128)
        for kh in range(3):
            tap = col[kh * dil:kh * dil + TH] * w_dw[kh * 3 + kw, :]
            acc = tap.astype(jnp.float32) if acc is None else acc + tap

    # 3) BN shift + ReLU (f32).
    act = jnp.maximum(acc + bn_shift_ref[0, :], 0.0)

    # 4) the two 1x1 convs as two bf16 MXU dots into one f32 accumulator
    #    (no 192-wide concat buffer); biases pre-summed, final ReLU.
    act2d = act.astype(jnp.bfloat16).reshape(TH * W, C_LOW)
    high2d = high_ref[0].reshape(TH * W, C_HIGH)
    fused = jnp.dot(act2d, w_low_ref[...], preferred_element_type=jnp.float32)
    fused = fused + jnp.dot(high2d, w_high_ref[...], preferred_element_type=jnp.float32)
    fused = jnp.maximum(fused + b_ref[0, :], 0.0)
    out_ref[0] = fused.reshape(TH, W, C_OUT).astype(out_ref.dtype)


# ----------------------------------------------------------------------------
# Host-side helpers (all small / low-resolution work, numpy at trace time).
# ----------------------------------------------------------------------------
def _interp_weights(n_in, n_out):
    """align_corners=True bilinear: source index + fraction per output row."""
    if n_in == 1:
        return np.zeros(n_out, np.int64), np.zeros(n_out, np.float64)
    coords = np.arange(n_out, dtype=np.float64) * (n_in - 1) / (n_out - 1)
    lo = np.clip(np.floor(coords).astype(np.int64), 0, n_in - 2)
    return lo, coords - lo


def _interp_matrix(n_in, n_out):
    """Dense (n_out, n_in) bilinear interpolation matrix, align_corners=True."""
    lo, frac = _interp_weights(n_in, n_out)
    m = np.zeros((n_out, n_in), np.float32)
    rows = np.arange(n_out)
    m[rows, lo] += (1.0 - frac).astype(np.float32)
    if n_in > 1:
        m[rows, lo + 1] += frac.astype(np.float32)
    return m


def _h_band_plan(hl, hh, th, d):
    """Per-row-tile low-res row band + (n_th, TH+2d, BAND) interp matrices.

    Zero rows in the matrices encode the top/bottom zero halo of the dilated
    depthwise conv, so the kernel's single matmul yields the padded tile."""
    n_th = hh // th
    thp = th + 2 * d
    lo, frac = _interp_weights(hl, hh)
    starts, stops = [], []
    for t in range(n_th):
        o0 = max(0, t * th - d)
        o1 = min(hh, t * th + th + d)                      # exclusive
        s = int(lo[o0])
        e = min(int(lo[o1 - 1]) + (2 if hl > 1 else 1), hl)
        starts.append(s)
        stops.append(e)
    band = max(e - s for s, e in zip(starts, stops))
    starts = [min(s, hl - band) for s in starts]
    mh = np.zeros((n_th, thp, band), np.float32)
    for t in range(n_th):
        s = starts[t]
        for r in range(thp):
            o = t * th + r - d                              # un-padded output row
            if 0 <= o < hh:
                l = int(lo[o])
                f = float(frac[o])
                mh[t, r, l - s] += 1.0 - f
                if hl > 1:
                    mh[t, r, l + 1 - s] += f
    band_idx = np.stack([np.arange(s, s + band, dtype=np.int32) for s in starts])
    return band, band_idx, mh


def _pick_row_tile(n_batch, hh, wh, scale, budget_bytes=_VMEM_TILE_BUDGET):
    """Largest row tile (preferring multiples of 8) whose per-step working set
    (double-buffered bf16 blocks + scratch) fits the budget, keeping >= 2 grid
    steps so megacore / v7x's 2 TensorCores stay busy."""
    d = scale
    wp = wh + 2 * d
    hl = max(hh // scale, 1)

    def est(th):
        thp = th + 2 * d
        band = min(hl, -(-thp // scale) + 2)
        low = band * wp * C_LOW * 2
        mh = thp * band * 2
        high = th * wh * C_HIGH * 2
        out = th * wh * C_OUT * 2
        up = thp * wp * C_LOW * 2              # bf16 up-sampled scratch
        inner = th * wh * C_LOW * 4 * 2        # f32 acc + act intermediates
        return 2 * (low + mh + high + out) + up + inner

    divisors = [t for t in range(1, hh + 1) if hh % t == 0]
    cands = [t for t in divisors if t % 8 == 0] or divisors
    fitting = [t for t in cands if t <= 256 and est(t) <= budget_bytes] or cands[:1]
    if n_batch == 1:
        multi = [t for t in fitting if hh // t >= 2]
        fitting = multi or fitting
    return fitting[-1]


# ----------------------------------------------------------------------------
# Wrapper around pallas_call.
# ----------------------------------------------------------------------------
def feature_fusion_forward(high_nhwc, low_nhwc, params, scale_factor,
                           row_tile=None, out_dtype=jnp.bfloat16, dw_bf16=True):
    n, hh, wh, _ = high_nhwc.shape
    _, hl, wl, _ = low_nhwc.shape
    d = scale_factor
    assert hl * d == hh and wl * d == wh

    th = _pick_row_tile(n, hh, wh, d) if row_tile is None else row_tile
    assert hh % th == 0
    n_th = hh // th
    thp, wp = th + 2 * d, wh + 2 * d

    # W-direction bilinear upsample + W halo padding at LOW H resolution (bf16).
    # TODO(synk): this still writes a scale_factor-x inflated low slab to HBM;
    #             the W interp could also move into the kernel as a small
    #             per-band einsum to remove that traffic.
    mw_pad = np.zeros((wp, wl), np.float32)
    mw_pad[d:wh + d] = _interp_matrix(wl, wh)
    low_wup = jnp.einsum('pw,nhwc->nhpc', jnp.asarray(mw_pad),
                         low_nhwc).astype(jnp.bfloat16)

    # Per-tile low-res H bands (only the rows each tile's interp touches) and
    # the matching per-tile interp matrices (K = BAND, not Hl).
    band, band_idx, mh_np = _h_band_plan(hl, hh, th, d)
    low_bands = low_wup[:, jnp.asarray(band_idx)]            # (n, n_th, band, wp, 128)
    low_bands = low_bands.reshape(n * n_th, band, wp, C_LOW)
    mh_tiles = jnp.asarray(mh_np, dtype=jnp.bfloat16)        # (n_th, thp, band)

    # Fold BN scale into the depthwise weights; bf16 1x1 weights; biases pre-summed.
    dw_dtype = jnp.bfloat16 if dw_bf16 else jnp.float32
    w_dw = (params["w_dw"] * params["bn_scale"]).astype(dw_dtype)        # (9, 128)
    bn_shift = params["bn_shift"].astype(jnp.float32)                    # (1, 128)
    w_low = params["w_low"].astype(jnp.bfloat16)                         # (128, 128)
    w_high = params["w_high"].astype(jnp.bfloat16)                       # (64, 128)
    b_fused = (params["b_low"] + params["b_high"]).astype(jnp.float32)   # (1, 128)
    high_bf16 = high_nhwc.astype(jnp.bfloat16)

    kernel = functools.partial(_ffm_kernel, TH=th, W=wh, dil=d)
    grid_spec = pltpu.PrefetchScalarGridSpec(
        num_scalar_prefetch=0,
        grid=(n, n_th),
        in_specs=[
            pl.BlockSpec((1, band, wp, C_LOW), lambda b, t: (b * n_th + t, 0, 0, 0)),
            pl.BlockSpec((1, thp, band), lambda b, t: (t, 0, 0)),
            pl.BlockSpec((1, th, wh, C_HIGH), lambda b, t: (b, t, 0, 0)),
            pl.BlockSpec((9, C_LOW), lambda b, t: (0, 0)),
            pl.BlockSpec((1, C_LOW), lambda b, t: (0, 0)),
            pl.BlockSpec((C_LOW, C_OUT), lambda b, t: (0, 0)),
            pl.BlockSpec((C_HIGH, C_OUT), lambda b, t: (0, 0)),
            pl.BlockSpec((1, C_OUT), lambda b, t: (0, 0)),
        ],
        out_specs=pl.BlockSpec((1, th, wh, C_OUT), lambda b, t: (b, t, 0, 0)),
    )
    return pl.pallas_call(
        kernel,
        out_shape=jax.ShapeDtypeStruct((n, hh, wh, C_OUT), out_dtype),
        grid_spec=grid_spec,
        compiler_params=pltpu.CompilerParams(
            dimension_semantics=("parallel", "parallel"),
            vmem_limit_bytes=_VMEM_LIMIT_BYTES),
    )(low_bands, mh_tiles, high_bf16, w_dw, bn_shift, w_low, w_high, b_fused)


# ----------------------------------------------------------------------------
# Pure-JAX f32 reference for correctness checking.
# ----------------------------------------------------------------------------
def _upsample_bilinear_ac(x_nhwc, scale):
    n, h, w, c = x_nhwc.shape
    mh = jnp.asarray(_interp_matrix(h, h * scale))
    mw = jnp.asarray(_interp_matrix(w, w * scale))
    y = jnp.einsum('oh,nhwc->nowc', mh, x_nhwc)
    y = jnp.einsum('pw,nowc->nopc', mw, y)
    return y


def reference_forward(high_nhwc, low_nhwc, params, scale_factor):
    low_up = _upsample_bilinear_ac(low_nhwc, scale_factor)
    dw_w = params["w_dw"].reshape(3, 3, 1, C_LOW)          # HWIO, depthwise
    dw = lax.conv_general_dilated(
        low_up, dw_w, window_strides=(1, 1),
        padding=[(scale_factor, scale_factor), (scale_factor, scale_factor)],
        rhs_dilation=(scale_factor, scale_factor),
        dimension_numbers=('NHWC', 'HWIO', 'NHWC'),
        feature_group_count=C_LOW)
    dw = dw * params["bn_scale"][0] + params["bn_shift"][0]
    dw = jnp.maximum(dw, 0.0)
    low_o = jnp.einsum('nhwc,cd->nhwd', dw, params["w_low"]) + params["b_low"][0]
    high_o = jnp.einsum('nhwc,cd->nhwd', high_nhwc, params["w_high"]) + params["b_high"][0]
    return jnp.maximum(low_o + high_o, 0.0)


# ----------------------------------------------------------------------------
# Deterministic parameter initialization (synthetic; shapes from __init__).
# ----------------------------------------------------------------------------
def init_params(key):
    ks = jax.random.split(key, 9)
    w_dw = jax.random.normal(ks[0], (9, C_LOW), jnp.float32) * 0.1          # (3*3, 128)
    gamma = 1.0 + 0.1 * jax.random.normal(ks[1], (C_LOW,), jnp.float32)
    beta = 0.1 * jax.random.normal(ks[2], (C_LOW,), jnp.float32)
    mean = 0.1 * jax.random.normal(ks[3], (C_LOW,), jnp.float32)
    var = jnp.abs(jax.random.normal(ks[4], (C_LOW,), jnp.float32)) + 0.5
    eps = 1e-5
    bn_scale = (gamma / jnp.sqrt(var + eps)).reshape(1, C_LOW)
    bn_shift = (beta - mean * gamma / jnp.sqrt(var + eps)).reshape(1, C_LOW)
    w_low = jax.random.normal(ks[5], (C_LOW, C_OUT), jnp.float32) * 0.05     # (Cin, Cout)
    b_low = (0.1 * jax.random.normal(ks[6], (C_OUT,), jnp.float32)).reshape(1, C_OUT)
    w_high = jax.random.normal(ks[7], (C_HIGH, C_OUT), jnp.float32) * 0.05
    b_high = (0.1 * jax.random.normal(ks[8], (C_OUT,), jnp.float32)).reshape(1, C_OUT)
    return dict(w_dw=w_dw, bn_scale=bn_scale, bn_shift=bn_shift,
                w_low=w_low, b_low=b_low, w_high=w_high, b_high=b_high)


if __name__ == "__main__":
    key = jax.random.PRNGKey(0)
    k_hi, k_lo, k_par = jax.random.split(key, 3)

    scale_factor = 4
    N, H, W = 2, 16, 16                       # high-res spatial
    Hl, Wl = H // scale_factor, W // scale_factor

    # PyTorch-convention NCHW inputs ...
    high_nchw = jax.random.normal(k_hi, (N, C_HIGH, H, W), jnp.float32)
    low_nchw = jax.random.normal(k_lo, (N, C_LOW, Hl, Wl), jnp.float32)
    # ... transposed to the kernel's NHWC layout.
    high_nhwc = jnp.transpose(high_nchw, (0, 2, 3, 1))
    low_nhwc = jnp.transpose(low_nchw, (0, 2, 3, 1))

    params = init_params(k_par)
    ref = jax.block_until_ready(reference_forward(high_nhwc, low_nhwc, params, scale_factor))

    # (a) explicit row_tile=8 -> grid=(2, 2): exercises the halo'd H-band tiling.
    out_a = jax.block_until_ready(
        feature_fusion_forward(high_nhwc, low_nhwc, params, scale_factor, row_tile=8))
    # (b) VMEM-aware auto tile pick.
    out_b = jax.block_until_ready(
        feature_fusion_forward(high_nhwc, low_nhwc, params, scale_factor))

    assert out_a.shape == (N, H, W, C_OUT) and out_a.dtype == jnp.bfloat16
    assert out_b.shape == (N, H, W, C_OUT)
    # bf16 storage of inputs/weights/activations/output compounds -> tolerance
    # is looser than pure f32 but still tight for inference.
    err_a = float(jnp.max(jnp.abs(out_a.astype(jnp.float32) - ref)))
    err_b = float(jnp.max(jnp.abs(out_b.astype(jnp.float32) - ref)))
    assert err_a < 7.5e-2, err_a
    assert err_b < 7.5e-2, err_b

    print("KERNEL_OK")
</pallas_src>

<mosaic_0001>
module attributes {stable_mosaic.version = 11 : i64} {
  func.func @_ffm_kernel(%arg0: i32, %arg1: i32, %arg2: memref<1x4x24x128xbf16, #tpu.memory_space<vmem>>, %arg3: memref<1x16x4xbf16, #tpu.memory_space<vmem>>, %arg4: memref<1x8x16x64xbf16, #tpu.memory_space<vmem>>, %arg5: memref<9x128xbf16, #tpu.memory_space<vmem>>, %arg6: memref<1x128xf32, #tpu.memory_space<vmem>>, %arg7: memref<128x128xbf16, #tpu.memory_space<vmem>>, %arg8: memref<64x128xbf16, #tpu.memory_space<vmem>>, %arg9: memref<1x128xf32, #tpu.memory_space<vmem>>, %arg10: memref<1x8x16x128xbf16, #tpu.memory_space<vmem>>) attributes {dimension_semantics = [#tpu.dimension_semantics<parallel>, #tpu.dimension_semantics<parallel>], iteration_bounds = array<i64: 2, 2>, scalar_prefetch = 0 : i64, scratch_operands = 0 : i64, tpu.core_type = #tpu.core_type<tc>, window_params = [{transform_indices = @transform_0, window_bounds = array<i64: 1, 4, 24, 128>}, {transform_indices = @transform_1, window_bounds = array<i64: 1, 16, 4>}, {transform_indices = @transform_2, window_bounds = array<i64: 1, 8, 16, 64>}, {pipeline_mode = #tpu.pipeline_mode<synchronous>, transform_indices = @transform_3, window_bounds = array<i64: 9, 128>}, {pipeline_mode = #tpu.pipeline_mode<synchronous>, transform_indices = @transform_4, window_bounds = array<i64: 1, 128>}, {pipeline_mode = #tpu.pipeline_mode<synchronous>, transform_indices = @transform_5, window_bounds = array<i64: 128, 128>}, {pipeline_mode = #tpu.pipeline_mode<synchronous>, transform_indices = @transform_6, window_bounds = array<i64: 64, 128>}, {pipeline_mode = #tpu.pipeline_mode<synchronous>, transform_indices = @transform_7, window_bounds = array<i64: 1, 128>}, {transform_indices = @transform_8, window_bounds = array<i64: 1, 8, 16, 128>}]} {
    %c0 = arith.constant 0 : index
    %c0_0 = arith.constant 0 : index
    %c0_1 = arith.constant 0 : index
    %c0_2 = arith.constant 0 : index
    %0 = vector.load %arg2[%c0, %c0_0, %c0_1, %c0_2] : memref<1x4x24x128xbf16, #tpu.memory_space<vmem>>, vector<1x4x24x128xbf16>
    %1 = vector.shape_cast %0 : vector<1x4x24x128xbf16> to vector<4x24x128xbf16>
    %2 = vector.shape_cast %1 : vector<4x24x128xbf16> to vector<4x3072xbf16>
    %c0_3 = arith.constant 0 : index
    %c0_4 = arith.constant 0 : index
    %c0_5 = arith.constant 0 : index
    %3 = vector.load %arg3[%c0_3, %c0_4, %c0_5] : memref<1x16x4xbf16, #tpu.memory_space<vmem>>, vector<1x16x4xbf16>
    %4 = vector.shape_cast %3 : vector<1x16x4xbf16> to vector<16x4xbf16>
    %cst = arith.constant dense<0.000000e+00> : vector<16x3072xf32>
    %5 = tpu.matmul %4, %2, %cst {dimension_numbers = #tpu.dot_dimension_numbers<[1], [0], [0], [1], [0, 0, 1, 1], [], []>} : vector<16x4xbf16>, vector<4x3072xbf16>, vector<16x3072xf32> -> vector<16x3072xf32>
    %6 = vector.shape_cast %5 : vector<16x3072xf32> to vector<16x24x128xf32>
    %7 = arith.truncf %6 : vector<16x24x128xf32> to vector<16x24x128xbf16>
    %c0_6 = arith.constant 0 : index
    %c0_7 = arith.constant 0 : index
    %8 = vector.load %arg5[%c0_6, %c0_7] : memref<9x128xbf16, #tpu.memory_space<vmem>>, vector<9x128xbf16>
    %9 = vector.extract_strided_slice %7 {offsets = [0, 0, 0], sizes = [16, 16, 128], strides = [1, 1, 1]} : vector<16x24x128xbf16> to vector<16x16x128xbf16>
    %10 = vector.extract_strided_slice %9 {offsets = [0, 0, 0], sizes = [8, 16, 128], strides = [1, 1, 1]} : vector<16x16x128xbf16> to vector<8x16x128xbf16>
    %11 = vector.extract_strided_slice %8 {offsets = [0, 0], sizes = [1, 128], strides = [1, 1]} : vector<9x128xbf16> to vector<1x128xbf16>
    %12 = vector.shape_cast %11 : vector<1x128xbf16> to vector<128xbf16>
    %13 = vector.shape_cast %12 : vector<128xbf16> to vector<1x1x128xbf16>
    %14 = vector.broadcast %13 : vector<1x1x128xbf16> to vector<8x16x128xbf16>
    %15 = arith.mulf %10, %14 : vector<8x16x128xbf16>
    %16 = arith.extf %15 : vector<8x16x128xbf16> to vector<8x16x128xf32>
    %17 = vector.extract_strided_slice %9 {offsets = [4, 0, 0], sizes = [8, 16, 128], strides = [1, 1, 1]} : vector<16x16x128xbf16> to vector<8x16x128xbf16>
    %18 = vector.extract_strided_slice %8 {offsets = [3, 0], sizes = [1, 128], strides = [1, 1]} : vector<9x128xbf16> to vector<1x128xbf16>
    %19 = vector.shape_cast %18 : vector<1x128xbf16> to vector<128xbf16>
    %20 = vector.shape_cast %19 : vector<128xbf16> to vector<1x1x128xbf16>
    %21 = vector.broadcast %20 : vector<1x1x128xbf16> to vector<8x16x128xbf16>
    %22 = arith.mulf %17, %21 : vector<8x16x128xbf16>
    %23 = arith.extf %22 : vector<8x16x128xbf16> to vector<8x16x128xf32>
    %24 = arith.addf %16, %23 : vector<8x16x128xf32>
    %25 = vector.extract_strided_slice %9 {offsets = [8, 0, 0], sizes = [8, 16, 128], strides = [1, 1, 1]} : vector<16x16x128xbf16> to vector<8x16x128xbf16>
    %26 = vector.extract_strided_slice %8 {offsets = [6, 0], sizes = [1, 128], strides = [1, 1]} : vector<9x128xbf16> to vector<1x128xbf16>
    %27 = vector.shape_cast %26 : vector<1x128xbf16> to vector<128xbf16>
    %28 = vector.shape_cast %27 : vector<128xbf16> to vector<1x1x128xbf16>
    %29 = vector.broadcast %28 : vector<1x1x128xbf16> to vector<8x16x128xbf16>
    %30 = arith.mulf %25, %29 : vector<8x16x128xbf16>
    %31 = arith.extf %30 : vector<8x16x128xbf16> to vector<8x16x128xf32>
    %32 = arith.addf %24, %31 : vector<8x16x128xf32>
    %33 = vector.extract_strided_slice %7 {offsets = [0, 4, 0], sizes = [16, 16, 128], strides = [1, 1, 1]} : vector<16x24x128xbf16> to vector<16x16x128xbf16>
    %34 = vector.extract_strided_slice %33 {offsets = [0, 0, 0], sizes = [8, 16, 128], strides = [1, 1, 1]} : vector<16x16x128xbf16> to vector<8x16x128xbf16>
    %35 = vector.extract_strided_slice %8 {offsets = [1, 0], sizes = [1, 128], strides = [1, 1]} : vector<9x128xbf16> to vector<1x128xbf16>
    %36 = vector.shape_cast %35 : vector<1x128xbf16> to vector<128xbf16>
    %37 = vector.shape_cast %36 : vector<128xbf16> to vector<1x1x128xbf16>
    %38 = vector.broadcast %37 : vector<1x1x128xbf16> to vector<8x16x128xbf16>
    %39 = arith.mulf %34, %38 : vector<8x16x128xbf16>
    %40 = arith.extf %39 : vector<8x16x128xbf16> to vector<8x16x128xf32>
    %41 = arith.addf %32, %40 : vector<8x16x128xf32>
    %42 = vector.extract_strided_slice %33 {offsets = [4, 0, 0], sizes = [8, 16, 128], strides = [1, 1, 1]} : vector<16x16x128xbf16> to vector<8x16x128xbf16>
    %43 = vector.extract_strided_slice %8 {offsets = [4, 0], sizes = [1, 128], strides = [1, 1]} : vector<9x128xbf16> to vector<1x128xbf16>
    %44 = vector.shape_cast %43 : vector<1x128xbf16> to vector<128xbf16>
    %45 = vector.shape_cast %44 : vector<128xbf16> to vector<1x1x128xbf16>
    %46 = vector.broadcast %45 : vector<1x1x128xbf16> to vector<8x16x128xbf16>
    %47 = arith.mulf %42, %46 : vector<8x16x128xbf16>
    %48 = arith.extf %47 : vector<8x16x128xbf16> to vector<8x16x128xf32>
    %49 = arith.addf %41, %48 : vector<8x16x128xf32>
    %50 = vector.extract_strided_slice %33 {offsets = [8, 0, 0], sizes = [8, 16, 128], strides = [1, 1, 1]} : vector<16x16x128xbf16> to vector<8x16x128xbf16>
    %51 = vector.extract_strided_slice %8 {offsets = [7, 0], sizes = [1, 128], strides = [1, 1]} : vector<9x128xbf16> to vector<1x128xbf16>
    %52 = vector.shape_cast %51 : vector<1x128xbf16> to vector<128xbf16>
    %53 = vector.shape_cast %52 : vector<128xbf16> to vector<1x1x128xbf16>
    %54 = vector.broadcast %53 : vector<1x1x128xbf16> to vector<8x16x128xbf16>
    %55 = arith.mulf %50, %54 : vector<8x16x128xbf16>
    %56 = arith.extf %55 : vector<8x16x128xbf16> to vector<8x16x128xf32>
    %57 = arith.addf %49, %56 : vector<8x16x128xf32>
    %58 = vector.extract_strided_slice %7 {offsets = [0, 8, 0], sizes = [16, 16, 128], strides = [1, 1, 1]} : vector<16x24x128xbf16> to vector<16x16x128xbf16>
    %59 = vector.extract_strided_slice %58 {offsets = [0, 0, 0], sizes = [8, 16, 128], strides = [1, 1, 1]} : vector<16x16x128xbf16> to vector<8x16x128xbf16>
    %60 = vector.extract_strided_slice %8 {offsets = [2, 0], sizes = [1, 128], strides = [1, 1]} : vector<9x128xbf16> to vector<1x128xbf16>
    %61 = vector.shape_cast %60 : vector<1x128xbf16> to vector<128xbf16>
    %62 = vector.shape_cast %61 : vector<128xbf16> to vector<1x1x128xbf16>
    %63 = vector.broadcast %62 : vector<1x1x128xbf16> to vector<8x16x128xbf16>
    %64 = arith.mulf %59, %63 : vector<8x16x128xbf16>
    %65 = arith.extf %64 : vector<8x16x128xbf16> to vector<8x16x128xf32>
    %66 = arith.addf %57, %65 : vector<8x16x128xf32>
    %67 = vector.extract_strided_slice %58 {offsets = [4, 0, 0], sizes = [8, 16, 128], strides = [1, 1, 1]} : vector<16x16x128xbf16> to vector<8x16x128xbf16>
    %68 = vector.extract_strided_slice %8 {offsets = [5, 0], sizes = [1, 128], strides = [1, 1]} : vector<9x128xbf16> to vector<1x128xbf16>
    %69 = vector.shape_cast %68 : vector<1x128xbf16> to vector<128xbf16>
    %70 = vector.shape_cast %69 : vector<128xbf16> to vector<1x1x128xbf16>
    %71 = vector.broadcast %70 : vector<1x1x128xbf16> to vector<8x16x128xbf16>
    %72 = arith.mulf %67, %71 : vector<8x16x128xbf16>
    %73 = arith.extf %72 : vector<8x16x128xbf16> to vector<8x16x128xf32>
    %74 = arith.addf %66, %73 : vector<8x16x128xf32>
    %75 = vector.extract_strided_slice %58 {offsets = [8, 0, 0], sizes = [8, 16, 128], strides = [1, 1, 1]} : vector<16x16x128xbf16> to vector<8x16x128xbf16>
    %76 = vector.extract_strided_slice %8 {offsets = [8, 0], sizes = [1, 128], strides = [1, 1]} : vector<9x128xbf16> to vector<1x128xbf16>
    %77 = vector.shape_cast %76 : vector<1x128xbf16> to vector<128xbf16>
    %78 = vector.shape_cast %77 : vector<128xbf16> to vector<1x1x128xbf16>
    %79 = vector.broadcast %78 : vector<1x1x128xbf16> to vector<8x16x128xbf16>
    %80 = arith.mulf %75, %79 : vector<8x16x128xbf16>
    %81 = arith.extf %80 : vector<8x16x128xbf16> to vector<8x16x128xf32>
    %82 = arith.addf %74, %81 : vector<8x16x128xf32>
    %c0_8 = arith.constant 0 : index
    %c0_9 = arith.constant 0 : index
    %83 = vector.load %arg6[%c0_8, %c0_9] : memref<1x128xf32, #tpu.memory_space<vmem>>, vector<1x128xf32>
    %84 = vector.shape_cast %83 : vector<1x128xf32> to vector<128xf32>
    %85 = vector.shape_cast %84 : vector<128xf32> to vector<1x1x128xf32>
    %86 = vector.broadcast %85 : vector<1x1x128xf32> to vector<8x16x128xf32>
    %87 = arith.addf %82, %86 : vector<8x16x128xf32>
    %cst_10 = arith.constant 0.000000e+00 : f32
    %88 = vector.broadcast %cst_10 : f32 to vector<8x16x128xf32>
    %89 = arith.maximumf %87, %88 : vector<8x16x128xf32>
    %90 = arith.truncf %89 : vector<8x16x128xf32> to vector<8x16x128xbf16>
    %91 = vector.shape_cast %90 : vector<8x16x128xbf16> to vector<128x128xbf16>
    %c0_11 = arith.constant 0 : index
    %c0_12 = arith.constant 0 : index
    %c0_13 = arith.constant 0 : index
    %c0_14 = arith.constant 0 : index
    %92 = vector.load %arg4[%c0_11, %c0_12, %c0_13, %c0_14] : memref<1x8x16x64xbf16, #tpu.memory_space<vmem>>, vector<1x8x16x64xbf16>
    %93 = vector.shape_cast %92 : vector<1x8x16x64xbf16> to vector<8x16x64xbf16>
    %94 = vector.shape_cast %93 : vector<8x16x64xbf16> to vector<128x64xbf16>
    %c0_15 = arith.constant 0 : index
    %c0_16 = arith.constant 0 : index
    %95 = vector.load %arg7[%c0_15, %c0_16] : memref<128x128xbf16, #tpu.memory_space<vmem>>, vector<128x128xbf16>
    %cst_17 = arith.constant dense<0.000000e+00> : vector<128x128xf32>
    %96 = tpu.matmul %91, %95, %cst_17 {dimension_numbers = #tpu.dot_dimension_numbers<[1], [0], [0], [1], [0, 0, 1, 1], [], []>} : vector<128x128xbf16>, vector<128x128xbf16>, vector<128x128xf32> -> vector<128x128xf32>
    %c0_18 = arith.constant 0 : index
    %c0_19 = arith.constant 0 : index
    %97 = vector.load %arg8[%c0_18, %c0_19] : memref<64x128xbf16, #tpu.memory_space<vmem>>, vector<64x128xbf16>
    %cst_20 = arith.constant dense<0.000000e+00> : vector<128x128xf32>
    %98 = tpu.matmul %94, %97, %cst_20 {dimension_numbers = #tpu.dot_dimension_numbers<[1], [0], [0], [1], [0, 0, 1, 1], [], []>} : vector<128x64xbf16>, vector<64x128xbf16>, vector<128x128xf32> -> vector<128x128xf32>
    %99 = arith.addf %96, %98 : vector<128x128xf32>
    %c0_21 = arith.constant 0 : index
    %c0_22 = arith.constant 0 : index
    %100 = vector.load %arg9[%c0_21, %c0_22] : memref<1x128xf32, #tpu.memory_space<vmem>>, vector<1x128xf32>
    %101 = vector.shape_cast %100 : vector<1x128xf32> to vector<128xf32>
    %102 = vector.shape_cast %101 : vector<128xf32> to vector<1x128xf32>
    %103 = vector.broadcast %102 : vector<1x128xf32> to vector<128x128xf32>
    %104 = arith.addf %99, %103 : vector<128x128xf32>
    %cst_23 = arith.constant 0.000000e+00 : f32
    %105 = vector.broadcast %cst_23 : f32 to vector<128x128xf32>
    %106 = arith.maximumf %104, %105 : vector<128x128xf32>
    %107 = vector.shape_cast %106 : vector<128x128xf32> to vector<8x16x128xf32>
    %108 = arith.truncf %107 : vector<8x16x128xf32> to vector<8x16x128xbf16>
    %c0_24 = arith.constant 0 : index
    %c0_25 = arith.constant 0 : index
    %c0_26 = arith.constant 0 : index
    %c0_27 = arith.constant 0 : index
    %109 = vector.load %arg10[%c0_24, %c0_25, %c0_26, %c0_27] : memref<1x8x16x128xbf16, #tpu.memory_space<vmem>>, vector<1x8x16x128xbf16>
    %110 = vector.shape_cast %109 : vector<1x8x16x128xbf16> to vector<8x16x128xbf16>
    %111 = vector.shape_cast %108 : vector<8x16x128xbf16> to vector<1x8x16x128xbf16>
    tpu.vector_store %arg10[%c0_24, %c0_25, %c0_26, %c0_27], %111 {strides = array<i32>} : memref<1x8x16x128xbf16, #tpu.memory_space<vmem>>, vector<1x8x16x128xbf16>,
    return
  }
  func.func @transform_0(%arg0: i32, %arg1: i32) -> (i32, i32, i32, i32) {
    %c2_i32 = arith.constant 2 : i32
    %0 = arith.muli %arg0, %c2_i32 : i32
    %1 = arith.addi %0, %arg1 : i32
    %c0_i32 = arith.constant 0 : i32
    %c0_i32_0 = arith.constant 0 : i32
    %c0_i32_1 = arith.constant 0 : i32
    %c0_i32_2 = arith.constant 0 : i32
    return %1, %c0_i32, %c0_i32_0, %c0_i32_1 : i32, i32, i32, i32
  }
  func.func @transform_1(%arg0: i32, %arg1: i32) -> (i32, i32, i32) {
    %c0_i32 = arith.constant 0 : i32
    %c0_i32_0 = arith.constant 0 : i32
    %c0_i32_1 = arith.constant 0 : i32
    return %arg1, %c0_i32, %c0_i32_0 : i32, i32, i32
  }
  func.func @transform_2(%arg0: i32, %arg1: i32) -> (i32, i32, i32, i32) {
    %c0_i32 = arith.constant 0 : i32
    %c0_i32_0 = arith.constant 0 : i32
    %c0_i32_1 = arith.constant 0 : i32
    return %arg0, %arg1, %c0_i32, %c0_i32_0 : i32, i32, i32, i32
  }
  func.func @transform_3(%arg0: i32, %arg1: i32) -> (i32, i32) {
    %c0_i32 = arith.constant 0 : i32
    %c0_i32_0 = arith.constant 0 : i32
    %c0_i32_1 = arith.constant 0 : i32
    return %c0_i32, %c0_i32_0 : i32, i32
  }
  func.func @transform_4(%arg0: i32, %arg1: i32) -> (i32, i32) {
    %c0_i32 = arith.constant 0 : i32
    %c0_i32_0 = arith.constant 0 : i32
    %c0_i32_1 = arith.constant 0 : i32
    return %c0_i32, %c0_i32_0 : i32, i32
  }
  func.func @transform_5(%arg0: i32, %arg1: i32) -> (i32, i32) {
    %c0_i32 = arith.constant 0 : i32
    %c0_i32_0 = arith.constant 0 : i32
    %c0_i32_1 = arith.constant 0 : i32
    return %c0_i32, %c0_i32_0 : i32, i32
  }
  func.func @transform_6(%arg0: i32, %arg1: i32) -> (i32, i32) {
    %c0_i32 = arith.constant 0 : i32
    %c0_i32_0 = arith.constant 0 : i32
    %c0_i32_1 = arith.constant 0 : i32
    return %c0_i32, %c0_i32_0 : i32, i32
  }
  func.func @transform_7(%arg0: i32, %arg1: i32) -> (i32, i32) {
    %c0_i32 = arith.constant 0 : i32
    %c0_i32_0 = arith.constant 0 : i32
    %c0_i32_1 = arith.constant 0 : i32
    return %c0_i32, %c0_i32_0 : i32, i32
  }
  func.func @transform_8(%arg0: i32, %arg1: i32) -> (i32, i32, i32, i32) {
    %c0_i32 = arith.constant 0 : i32
    %c0_i32_0 = arith.constant 0 : i32
    %c0_i32_1 = arith.constant 0 : i32
    return %arg0, %arg1, %c0_i32, %c0_i32_0 : i32, i32, i32, i32
  }
}

</mosaic_0001>

<bundles_post_ra>
// kernel: tpu_custom_call.1
= control target key start
LH: loop header
LB: loop body
LE: loop exit
PB: predicated region body
PF: predicated region fallthrough
CT: control target
= control target key end

     0   :  { %s5622_s0 = inlined_call_operand.hbm [shape: bf16[4,4,24,128], index: 0, kind: input, shape index: {}]   ;;  %s5623_s1 = inlined_call_operand.vmem [shape: bf16[2,16,4], index: 1, kind: input, shape index: {}]   ;;  %s5624_s2 = inlined_call_operand.hbm [shape: bf16[2,16,16,64], index: 2, kind: input, shape index: {}]   ;;  %s5625_s3 = inlined_call_operand.vmem [shape: bf16[9,128], index: 3, kind: input, shape index: {}]   ;;  %s5626_s4 = inlined_call_operand.vmem [shape: f32[1,128], index: 4, kind: input, shape index: {}]   ;;  %s5627_s5 = inlined_call_operand.hbm [shape: bf16[128,128], index: 5, kind: input, shape index: {}]   ;;  %s5628_s6 = inlined_call_operand.hbm [shape: bf16[64,128], index: 6, kind: input, shape index: {}]   ;;  %s5629_s7 = inlined_call_operand.vmem [shape: f32[1,128], index: 7, kind: input, shape index: {}]   ;;  %s5630_s8 = inlined_call_operand.hbm [shape: bf16[2,16,16,128], index: 8, kind: output, shape index: {}]  }
   0x1   :  { %5688 = sst [smem:[#allocation75_spill]] %s5622_s0 }
   0x2   :  { %5689 = sst [smem:[#allocation76_spill]] %s5625_s3 }
   0x3   :  { %5690 = sst [smem:[#allocation77_spill]] %s5626_s4 }
   0x4   :  { %5691 = sst [smem:[#allocation78_spill]] %s5627_s5 }
   0x5   :  { %5692 = sst [smem:[#allocation79_spill]] %s5628_s6 }
   0x6   :  { %5693 = sst [smem:[#allocation80_spill]] %s5629_s7 }
   0x7   :  { %5694 = sst [smem:[#allocation81_spill]] %s5630_s8 }
   0x8   :  { %13 = vsyncpa [#allocation3], 0 }
   0x9   :  { %15 = vsyncpa [#allocation3 + $0x1], 0 }
   0xa   :  { %16 = vsyncpa [#allocation6], 0 }
   0xb   :  { %18 = vsyncpa [#allocation6 + $0x1], 0 }
   0xc   :  { %19 = vsyncpa [#allocation9], 0 }
   0xd   :  { %20 = vsyncpa [#allocation4], 0 }
   0xe   :  { %22 = vsyncpa [#allocation4 + $0x1], 0  ;;  %s4005_s27 = smov 0   ;;  %s4007_s28 = smov 0  }
   0xf   :  { %s4009_s29 = smov 0   ;;  %s4011_s30 = smov 0  }
  0x10   :  { %s4013_s9 = smov 0   ;;  %s4015_s10 = smov 0  }
  0x11   :  { %s4017_s11 = smov 0   ;;  %s4019_s12 = smov 0  }
  0x12   :  { %s4021_s13 = smov 0   ;;  %s4023_s14 = smov 0  }
  0x13   :  { %s4025_s15 = smov 0  }
  0x14 LB: > { %5695 = sst [smem:[#allocation16_spill]] %s3910_s27  ;;  %s4061_s16 = sadd.s32 4294967295, %s3950_s15   ;;  %s3950_s15 = sphi %s4025_s15, %s28_s15   ;;  %s3946_s14 = sphi %s4023_s14, %s5879_s14   ;;  %s3942_s13 = sphi %s4021_s13, %s5878_s13   ;;  %s3938_s12 = sphi %s4019_s12, %s5877_s12   ;;  %s3934_s11 = sphi %s4017_s11, %s5876_s11   ;;  %s3930_s10 = sphi %s4015_s10, %s5868_s10   ;;  %s3926_s9 = sphi %s4013_s9, %s5875_s9   ;;  %s3922_s30 = sphi %s4011_s30, %s5874_s30   ;;  %s3918_s29 = sphi %s4009_s29, %s5873_s29   ;;  %s3914_s28 = sphi %s4007_s28, %s5872_s28   ;;  %s3910_s27 = sphi %s4005_s27, %s5871_s27  }
  0x15   : > { %5696 = sst [smem:[#allocation17_spill]] %s3930_s10  ;;  %s3270_s17 = sadd.s32 4294967294, %s3950_s15  }
  0x16   : > { %5697 = sst [smem:[#allocation18_spill]] %s3938_s12  ;;  %p65_p0 = scmp.eq.s32.totalorder %s4061_s16, 0 }
  0x17   : > { %p118_p1 = scmp.ne.s32.totalorder %s3914_s28, %s3910_s27  ;;  %p249_p2 = scmp.eq.s32.totalorder %s4061_s16, 3 }
  0x18   : > { %p255_p3 = scmp.eq.s32.totalorder %s3270_s17, 3  ;;  %p3273_p5 = scmp.ge.s32.totalorder %s3950_s15, 1 }
  0x19   : > { %p4070_p4 = por %p118_p1, %p65_p0  ;;  %p262_p7 = scmp.lt.s32.totalorder %s3950_s15, 5 }
  0x1a   : > { %p4075_p6 = por %p255_p3, %p118_p1  ;;  %s5701_s5 = sld [smem:[#allocation78_spill]] }
  0x1b   : > { %p4083_p8 = pnand %p3273_p5, %p262_p7  ;;  %s3952_s24 = smov [#allocation7]  }
  0x1c   : > { %s5699_s19 = scalar_select %p4075_p6, 1, 0 }
  0x1d   : > { %p3573_p9 = pneg %p4083_p8  ;;  %s281_s25 = sshll.u32 %s3952_s24, 4  ;;  %s282_s25 = int_to_ptr.vmem [resolvable:$true] %s281_s25 }
  0x1e   : > { %5700 = sst [smem:[#allocation19_spill]] %s5699_s19  ;;  %s5633_s21 = smov 64  }
  0x1f   : > { %p3574_p10 = pnand %p3573_p9, %p65_p0  ;;  %s5703_s6 = sld [smem:[#allocation79_spill]] }
  0x20   : > { %s279_s22 = sshll.u32 %s5701_s5, 4  ;;  %s5635_s5 = smov 4   ;;  %s280_s22 = int_to_ptr.hbm [resolvable:$true] %s279_s22 }
  0x21   : > { %3576 = dma.hbm_to_vmem [thread:$0]  (!%p3574_p10), %s280_s22, 1024, %s282_s25, [#allocation6], %s5633_s21, %s5633_s21, %s5635_s5  }
  0x22   : > { %s3955_s24 = smov [#allocation8]   ;;  %s37_s26 = sadd.s32 1, %s3942_s13 }
  0x23   : > { %s295_s19 = sshll.u32 %s3955_s24, 4  ;;  %s40_s17 = sadd.s32 1, %s3946_s14  ;;  %s296_s19 = int_to_ptr.vmem [resolvable:$true] %s295_s19 }
  0x24   : > { %p38_p11 = scmp.ge.s32.totalorder %s37_s26, 2  ;;  %s51_s22 = sadd.s32 1, %s3930_s10 }
  0x25   : > { %s293_s20 = sshll.u32 %s5703_s6, 4  ;;  %s3271_s6 = sshll.u32 %s3946_s14, 1  ;;  %s294_s20 = int_to_ptr.hbm [resolvable:$true] %s293_s20 }
  0x26   : > { %3579 = dma.hbm_to_vmem [thread:$0]  (!%p3574_p10), %s294_s20, 512, %s296_s19, [#allocation9], %s5633_s21, %s5633_s21, %s5635_s5  }
  0x27   : > { %s45_s27 = sadd.s32 %s3942_s13, %s3271_s6  ;;  %s5881_s26 = smov (%p38_p11, %s37_s26), 0 }
  0x28   : > { %5704 = sst [smem:[#allocation20_spill]] %s5881_s26  ;;  %s5883_s17 = smov (!%p38_p11, %s40_s17), %s3946_s14 }
  0x29   : > { %p58_p12 = scmp.ne.s32.totalorder %s3930_s10, %s3926_s9  ;;  %p59_p13 = scmp.eq.s32.totalorder %s3950_s15, 0 }
  0x2a   : > { %p42_p1 = scmp.ge.s32.totalorder %s5883_s17, 2  ;;  %p64_p3 = scmp.ne.s32.totalorder %s3926_s9, %s3922_s30 }
  0x2b   : > { %p4115_p5 = por %p59_p13, %p58_p12  ;;  %s101_s25 = ssub.s32 %s3942_s13, %s5881_s26 }
  0x2c   : > { %s5885_s17 = smov (%p42_p1, %s5883_s17), 0  ;;  %p4125_p7 = por %p65_p0, %p64_p3 }
  0x2d   : > { %5706 = sst [smem:[#allocation21_spill]] %s5885_s17  ;;  %p3593_p9 = scmp.lt.s32.totalorder %s3950_s15, 4 }
  0x2e   : > { %s3272_s20 = sshll.u32 %s5885_s17, 1  ;;  %s100_s30 = ssub.s32 %s3946_s14, %s5885_s17 }
  0x2f   : > { %s47_s24 = sadd.s32 %s3272_s20, %s5881_s26  ;;  %s102_s21 = sor.u32 %s101_s25, %s100_s30 }
  0x30   : > { %s48_s5 = ssub.s32 %s45_s27, %s47_s24  ;;  %p103_p10 = scmp.eq.s32.totalorder %s102_s21, 0 }
  0x31   : > { %p49_p11 = scmp.eq.s32.totalorder %s48_s5, 0  ;;  %s312_s8 = sand.u32 1, %s3930_s10  }
  0x32   : > { %s3556_s12 = smul.u32 48, %s312_s8  ;;  %p3581_p12 = pnand %p3593_p9, %p4115_p5 }
  0x33   : > { %s4136_s7 = scalar_select %p49_p11, %s3930_s10, %s51_s22  }
  0x34   : > { %s3557_s4 = smul.u32 48, %s45_s27  ;;  %s316_s3 = scalar_lea.vmem [#allocation2], %s3556_s12 }
  0x35   : > { %5708 = sst [smem:[#allocation22_spill]] %s4136_s7  ;;  %s326_s17 = sshll.u32 %s316_s3, 4  ;;  %s327_s17 = int_to_ptr.vmem [resolvable:$true] %s326_s17 }
  0x36   : > { %s5709_s0 = sld [smem:[#allocation75_spill]]  ;;  %s313_s24 = scalar_lea.sflag [#allocation3], %s312_s8 }
  0x37   : > { %s5710_s22 = smov 4   ;;  %s5711_s26 = smov 64  }
  0x38   : > { %s344_s27 = sand.u32 1, %s3950_s15   ;;  %s105_s3 = sadd.s32 1, %s3918_s29 }
  0x39   : > { %p112_p1 = scmp.ne.s32.totalorder %s3918_s29, %s3914_s28  ;;  %s346_s19 = sand.u32 1, %s3918_s29  }
  0x3a   : > { %s4154_s12 = scalar_select %p103_p10, %s3918_s29, %s105_s3  }
  0x3b   : > { %p114_p3 = por %p112_p1, %p59_p13  ;;  %p4160_p5 = por %p249_p2, %p112_p1 }
  0x3c   : > { %s323_s5 = scalar_lea.hbm %s5709_s0, %s3557_s4  ;;  %s3279_s8 = sshll.u32 %s346_s19, 6 }
  0x3d   : > { %s324_s30 = sshll.u32 %s323_s5, 4  ;;  %s3473_s25 = sshll.u32 %s3942_s13, 4  ;;  %s325_s30 = int_to_ptr.hbm [resolvable:$true] %s324_s30 }
  0x3e   : > { %3583 = dma.hbm_to_vmem [thread:$0]  (!%p3581_p12), %s325_s30, 768, %s327_s17, %s313_s24, %s5711_s26, %s5711_s26, %s5710_s22  }
  0x3f   : > { %s3282_s20 = sshll.u32 %s3946_s14, 5  ;;  %s348_s17 = scalar_lea.vmem [#allocation5], %s3279_s8 }
  0x40   : > { %s354_s5 = sadd.s32 %s3473_s25, %s3282_s20  ;;  %s359_s30 = sshll.u32 %s348_s17, 4  ;;  %s360_s30 = int_to_ptr.vmem [resolvable:$true] %s359_s30 }
  0x41   : > { %s3283_s24 = sshll.u32 %s354_s5, 2  ;;  %p3584_p13 = pnand %p3593_p9, %p114_p3 }
  0x42   : > { %s356_s3 = scalar_lea.hbm %s5624_s2, %s3283_s24  ;;  %s345_s10 = scalar_lea.sflag [#allocation6], %s344_s27 }
  0x43   : > { %s357_s7 = sshll.u32 %s356_s3, 4  ;;  %371 = sbr.rel (%p4083_p8) target bundleno = 738 (0x2e2), region = 52  ;;  %s358_s7 = int_to_ptr.hbm [resolvable:$true] %s357_s7 }
  0x44   : > { %3586 = dma.hbm_to_vmem [thread:$0]  (!%p3584_p13), %s358_s7, 1024, %s360_s30, %s345_s10, %s5711_s26, %s5711_s26, %s5710_s22  }
  0x48   : > { %s373_s19 = sand.u32 1, %s3926_s9  }
  0x49   : > { %s3558_s8 = smul.u32 48, %s373_s19  ;;  %s374_s25 = scalar_lea.sflag [#allocation3], %s373_s19 }
  0x4b   : > { %s4178_s20 = scalar_lea.vmem [#allocation2], %s3558_s8 }
  0x4c   : > { %3889 = dma.done.wait (%p4125_p7), %s374_s25, 768  }
  0x4d   : > { %3891 = vsyncadd (%p4125_p7), %s374_s25, 4294966528  ;;  %s383_s0 = sand.u32 1, %s4061_s16   ;;  %s385_s7 = sand.u32 1, %s3914_s28  }
  0x4e   : > { %s4188_s10 = sshll.u32 %s385_s7, 6  ;;  %s384_s23 = scalar_lea.sflag [#allocation6], %s383_s0 }
  0x4f   : > { %s4191_s26 = scalar_lea.vmem [#allocation5], %s4188_s10 }
  0x50   : > { %3893 = dma.done.wait (%p4070_p4), %s384_s23, 1024  }
  0x51   : > { %3895 = vsyncadd (%p4070_p4), %s384_s23, 4294966272 }
  0x52   : > { %3897 = dma.done.wait (%p65_p0), [#allocation6], 1024  }
  0x53   : > { %3899 = vsyncadd (%p65_p0), [#allocation6], 4294966272 }
  0x54   : > { %3901 = dma.done.wait (%p65_p0), [#allocation9], 512  }
  0x55   : > { %3903 = vsyncadd (%p65_p0), [#allocation9], 4294966784  ;;  %p443_p2 = scmp.lt.s32.totalorder %s3934_s11, 1  ;;  %vm581_vm0 = vcmask 1041408   ;;  %vm577_vm1 = vcmask 31744   ;;  %vm991_vm2 = vcmask 1047556  }
  0x56   : > { %v451_v0 = vld [vmem:[%s4178_s20] ss:$12 sm:$0xf]  ;;  %v3291_v1 = vld [vmem:[%s4178_s20 + $0x1] ss:$12 sm:$0xf] }
  0x57   : > { %s444_s18 = scalar_select %p443_p2, %s3934_s11, 1  ;;  %v3330_v2 = vpack.c.b16 %v451_v0, %v451_v0  ;;  %v3332_v3 = vpack.c.b16 %v3291_v1, %v3291_v1  ;;  %v455_v4 = vshrl.u32 %v3291_v1, 16  ;;  %v452_v5 = vshrl.u32 %v451_v0, 16  ;;  %v3293_v6 = vld [vmem:[%s4178_s20 + $0x3] ss:$12 sm:$0xf] }
  0x58   : > { %v461_v7 = vshrl.u32 %v3293_v6, 16  ;;  %v3336_v8 = vpack.c.b16 %v3293_v6, %v3293_v6  ;;  %v3292_v9 = vld [vmem:[%s4178_s20 + $0x2] ss:$12 sm:$0xf]  ;;  %s5713_s30 = sld [smem:[#allocation76_spill]]  ;;  %vm2817_vm3 = vcmask 523264  }
  0x59   : > { %s3474_s6 = sshll.u32 %s444_s18, 3  ;;  %v583_v10 = vsel %vm581_vm0, %v3330_v2, 0  ;;  %v589_v11 = vsel %vm581_vm0, %v3332_v3, 0  ;;  %v3333_v13 = vpack.c.b16 %v455_v4, %v455_v4  ;;  %v3331_v14 = vpack.c.b16 %v452_v5, %v452_v5  ;;  %v3295_v24 = vld [vmem:[%s4178_s20 + $0x5] ss:$12 sm:$0xf] }
  0x5a   : > { %s447_s5 = scalar_lea.vmem %s5623_s1, %s3474_s6  ;;  %661 = vmatpush.bf16.msra.mxu3 %v583_v10  ;;  %689 = vmatpush.bf16.msra.mxu2 %v589_v11  ;;  %v3337_v15 = vpack.c.b16 %v461_v7, %v461_v7  ;;  %v601_v16 = vsel %vm581_vm0, %v3336_v8, 0  ;;  %v458_v17 = vshrl.u32 %v3292_v9, 16  ;;  %v3334_v18 = vpack.c.b16 %v3292_v9, %v3292_v9  ;;  %v3294_v25 = vld [vmem:[%s4178_s20 + $0x4] ss:$12 sm:$0xf]  ;;  %s5786_s25 = sld [smem:[#allocation77_spill]] }
  0x5b   : > { %v4216_v12 = vld [vmem:[%s447_s5] sm:$0xff]  ;;  %v592_v19 = vsel %vm581_vm0, %v3333_v13, 0  ;;  %v586_v20 = vsel %vm581_vm0, %v3331_v14, 0  ;;  %v3340_v27 = vpack.c.b16 %v3295_v24, %v3295_v24  ;;  %v464_v28 = vshrl.u32 %v3294_v25, 16  ;;  %s5862_s18 = sld [smem:[#allocation80_spill]]  ;;  %s5543_s6 = scalar_lea.vmem [#allocation10], %s4188_s10 }
  0x5c   : > { %675 = vmatpush.bf16.msra.mxu1 %v586_v20  ;;  %v604_v21 = vsel %vm581_vm0, %v3337_v15, 0  ;;  %v3335_v22 = vpack.c.b16 %v458_v17, %v458_v17  ;;  %v595_v23 = vsel %vm581_vm0, %v3334_v18, 0  ;;  %v3338_v29 = vpack.c.b16 %v3294_v25, %v3294_v25  ;;  %v3297_v37 = vld [vmem:[%s4178_s20 + $0x7] ss:$12 sm:$0xf]  ;;  %s5863_s10 = sld [smem:[#allocation18_spill]] }
  0x5d   : > { %3354 = vmatmul.msk.bf16.vlgmr.msra.gmra.mxu3 %vm577_vm1, %v4216_v12  ;;  %3356 = vmatmul.msk.bf16.vlgmr.msra.gmra.mxu2 %vm577_vm1, %v4216_v12  ;;  %v613_v30 = vsel %vm581_vm0, %v3340_v27, 0  ;;  %v3339_v31 = vpack.c.b16 %v464_v28, %v464_v28  ;;  %v467_v34 = vshrl.u32 %v3295_v24, 16  ;;  %v3296_v38 = vld [vmem:[%s4178_s20 + $0x6] ss:$12 sm:$0xf]  ;;  %v3344_v39 = vpack.c.b16 %v3297_v37, %v3297_v37  ;;  %s3496_s22 = sshll.u32 %s3934_s11, 4 }
  0x5e   : > { %745 = vmatpush.bf16.msrb.mxu2 %v601_v16  ;;  %703 = vmatpush.bf16.msrb.mxu3 %v592_v19  ;;  %v598_v26 = vsel %vm581_vm0, %v3335_v22, 0  ;;  %v607_v32 = vsel %vm581_vm0, %v3338_v29, 0  ;;  %v470_v40 = vshrl.u32 %v3296_v38, 16  ;;  %v3342_v41 = vpack.c.b16 %v3296_v38, %v3296_v38  ;;  %v3299_v49 = vld [vmem:[%s4178_s20 + $0x9] ss:$12 sm:$0xf]  ;;  %s5714_s24 = smov %s5713_s30 }
  0x5f   : > { %717 = vmatpush.bf16.msra.mxu0 %v595_v23  ;;  %3355 = vmatmul.msk.bf16.vlgmr.msra.gmra.mxu1 %vm577_vm1, %v4216_v12  ;;  %v610_v33 = vsel %vm581_vm0, %v3339_v31, 0  ;;  %v3341_v35 = vpack.c.b16 %v467_v34, %v467_v34  ;;  %v625_v42 = vsel %vm581_vm0, %v3344_v39, 0  ;;  %v473_v46 = vshrl.u32 %v3297_v37, 16  ;;  %v3298_v50 = vld [vmem:[%s4178_s20 + $0x8] ss:$12 sm:$0xf] }
  0x60   : > { %731 = vmatpush.bf16.msrb.mxu1 %v598_v26  ;;  %v3343_v43 = vpack.c.b16 %v470_v40, %v470_v40  ;;  %v619_v44 = vsel %vm581_vm0, %v3342_v41, 0  ;;  %v3348_v51 = vpack.c.b16 %v3299_v49, %v3299_v49  ;;  %v476_v52 = vshrl.u32 %v3298_v50, 16  ;;  %v3301_v61 = vld [vmem:[%s4178_s20 + $0xb] ss:$12 sm:$0xf]  ;;  %s5864_s21 = sld [smem:[#allocation81_spill]] }
  0x61   : > { %v616_v36 = vsel %vm581_vm0, %v3341_v35, 0  ;;  %v3345_v47 = vpack.c.b16 %v473_v46, %v473_v46  ;;  %v3346_v53 = vpack.c.b16 %v3298_v50, %v3298_v50  ;;  %v479_v58 = vshrl.u32 %v3299_v49, 16  ;;  %v3300_v62 = vld [vmem:[%s4178_s20 + $0xa] ss:$12 sm:$0xf]  ;;  %s3120_s19 = sshll.u32 %s5543_s6, 4  ;;  %s3121_s19 = int_to_ptr.vmem [resolvable:$true] %s3120_s19 }
  0x62   : > { %759 = vmatpush.bf16.msra.mxu3 %v604_v21  ;;  %3358 = vmatmul.msk.bf16.vlgmr.msra.gmra.mxu0 %vm577_vm1, %v4216_v12  ;;  %v622_v45 = vsel %vm581_vm0, %v3343_v43, 0  ;;  %v637_v54 = vsel %vm581_vm0, %v3348_v51, 0  ;;  %v3347_v55 = vpack.c.b16 %v476_v52, %v476_v52  ;;  %v3352_v63 = vpack.c.b16 %v3301_v61, %v3301_v61  ;;  %s3469_s27 = sshll.u32 %s5863_s10, 5  ;;  %s3105_s8 = scalar_lea.sflag [#allocation4], %s385_s7 }
  0x63   : > { %801 = vmatpush.bf16.msra.mxu2 %v613_v30  ;;  %773 = vmatpush.bf16.msrb.mxu0 %v607_v32  ;;  %v628_v48 = vsel %vm581_vm0, %v3345_v47, 0  ;;  %v631_v56 = vsel %vm581_vm0, %v3346_v53, 0  ;;  %v3349_v59 = vpack.c.b16 %v479_v58, %v479_v58  ;;  %v482_v0 = vshrl.u32 %v3300_v62, 16  ;;  %s3117_s5 = sadd.s32 %s3496_s22, %s3469_s27 }
  0x64   : > { %787 = vmatpush.bf16.msra.mxu1 %v610_v33  ;;  %v634_v57 = vsel %vm581_vm0, %v3347_v55, 0  ;;  %v3350_v1 = vpack.c.b16 %v3300_v62, %v3300_v62  ;;  %v649_v2 = vsel %vm581_vm0, %v3352_v63, 0  ;;  %v485_v6 = vshrl.u32 %v3301_v61, 16  ;;  %s3470_s16 = sshll.u32 %s3117_s5, 2 }
  0x65   : > { %v640_v60 = vsel %vm581_vm0, %v3349_v59, 0  ;;  %v3351_v3 = vpack.c.b16 %v482_v0, %v482_v0  ;;  %v3956_v18 = vmov 1983009808   ;;  %v3957_v37 = vmov 1934713408  }
  0x66   : > { %v643_v4 = vsel %vm581_vm0, %v3350_v1, 0  ;;  %v3353_v7 = vpack.c.b16 %v485_v6, %v485_v6  ;;  %v996_v19 = vunpack.c.l.s4 %v3956_v18  ;;  %v1044_v38 = vunpack.c.l.s4 %v3957_v37  ;;  %s3119_s3 = scalar_lea.hbm %s5864_s21, %s3470_s16 }
  0x67   : > { %829 = vmatpush.bf16.msra.mxu0 %v619_v44  ;;  %v646_v5 = vsel %vm581_vm0, %v3351_v3, 0  ;;  %vm2039_vm4 = vcmask 1043456   ;;  %s3122_s11 = sshll.u32 %s3119_s3, 4  ;;  %s3123_s11 = int_to_ptr.hbm [resolvable:$true] %s3122_s11 }
  0x68   : > { %v652_v8 = vsel %vm581_vm0, %v3353_v7, 0  ;;  %v4303_v25 = vunpack.c.0.s8 %v996_v19  ;;  %s3830_s20 = sshra.s32 %s3123_s11, 4  ;;  %s3831_s20 = int_to_ptr.hbm [resolvable:$true] %s3830_s20 }
  0x69   : > { %s3832_s0 = scalar_lea.hbm %s3831_s20, 64  ;;  %p3837_p7 = scmp.lt.s32.totalorder %s3831_s20, %s5864_s21 }
  0x6a   : > { %p3833_p0 = scmp.ne.s32.totalorder %s3831_s20, %s3832_s0 }
  0x6c   : > { %p3834_p4 = pnand %p3833_p0, %p4160_p5 }
  0x6d   : > { %3357 = vmatmul.msk.bf16.vlgmr.msrb.gmra.mxu3 %vm577_vm1, %v4216_v12  ;;  %3360 = vmatmul.msk.bf16.vlgmr.msrb.gmra.mxu2 %vm577_vm1, %v4216_v12 }
  0x6e   : > { %815 = vmatpush.bf16.msrb.mxu3 %v616_v36  ;;  %857 = vmatpush.bf16.msrb.mxu2 %v625_v42  ;;  %p3835_p8 = pneg %p3834_p4 }
  0x6f   : > { %3359 = vmatmul.msk.bf16.vlgmr.msrb.gmra.mxu1 %vm577_vm1, %v4216_v12 }
  0x70   : > { %843 = vmatpush.bf16.msrb.mxu1 %v622_v45 }
  0x72   : > { %3362 = vmatmul.msk.bf16.vlgmr.msrb.gmra.mxu0 %vm577_vm1, %v4216_v12 }
  0x73   : > { %885 = vmatpush.bf16.msrb.mxu0 %v631_v56 }
  0x7d   : > { %3361 = vmatmul.msk.bf16.vlgmr.msra.gmra.mxu3 %vm577_vm1, %v4216_v12  ;;  %3364 = vmatmul.msk.bf16.vlgmr.msra.gmra.mxu2 %vm577_vm1, %v4216_v12 }
  0x7e   : > { %871 = vmatpush.bf16.msra.mxu3 %v628_v48  ;;  %913 = vmatpush.bf16.msra.mxu2 %v637_v54 }
  0x7f   : > { %3363 = vmatmul.msk.bf16.vlgmr.msra.gmra.mxu1 %vm577_vm1, %v4216_v12 }
  0x80   : > { %899 = vmatpush.bf16.msra.mxu1 %v634_v57  ;;  %v4326_v57 = vunpack.c.0.s8 %v1044_v38 }
  0x82   : > { %3366 = vmatmul.msk.bf16.vlgmr.msra.gmra.mxu0 %vm577_vm1, %v4216_v12 }
  0x83   : > { %941 = vmatpush.bf16.msra.mxu0 %v643_v4 }
  0x8d   : > { %3365 = vmatmul.msk.bf16.vlgmr.msrb.gmra.mxu3 %vm577_vm1, %v4216_v12  ;;  %3368 = vmatmul.msk.bf16.vlgmr.msrb.gmra.mxu2 %vm577_vm1, %v4216_v12 }
  0x8e   : > { %927 = vmatpush.bf16.msrb.mxu3 %v640_v60  ;;  %969 = vmatpush.bf16.msrb.mxu2 %v649_v2 }
  0x8f   : > { %3367 = vmatmul.msk.bf16.vlgmr.msrb.gmra.mxu1 %vm577_vm1, %v4216_v12 }
  0x90   : > { %955 = vmatpush.bf16.msrb.mxu1 %v646_v5 }
  0x92   : > { %3370 = vmatmul.msk.bf16.vlgmr.msrb.gmra.mxu0 %vm577_vm1, %v4216_v12 }
  0x9d   : > { %3369 = vmatmul.msk.bf16.vlgmr.msra.gmra.mxu3 %vm577_vm1, %v4216_v12  ;;  %3372 = vmatmul.msk.bf16.vlgmr.msra.gmra.mxu2 %vm577_vm1, %v4216_v12 }
  0x9e   : > { %983 = vmatpush.bf16.msra.mxu3 %v652_v8 }
  0x9f   : > { %3371 = vmatmul.msk.bf16.vlgmr.msra.gmra.mxu1 %vm577_vm1, %v4216_v12 }
  0xa2   : > { %3374 = vmatmul.msk.bf16.vlgmr.msra.gmra.mxu0 %vm577_vm1, %v4216_v12 }
  0xad   : > { %3373 = vmatmul.msk.bf16.vlgmr.msrb.gmra.mxu3 %vm577_vm1, %v4216_v12  ;;  %3376 = vmatmul.msk.bf16.vlgmr.msrb.gmra.mxu2 %vm577_vm1, %v4216_v12 }
  0xaf   : > { %3375 = vmatmul.msk.bf16.vlgmr.msrb.gmra.mxu1 %vm577_vm1, %v4216_v12 }
  0xbd   : > { %3377 = vmatmul.msk.bf16.vlgmr.msra.gmra.mxu3 %vm577_vm1, %v4216_v12  ;;  %v1711_v12 = vld [vmem:[%s5713_s30] sm:$0xf] }
  0xbe   : > { %v1782_v28 = vshrl.u32 %v1711_v12, 16  ;;  %v4311_v34 = vpack.i.b16 %v1711_v12, %v1711_v12 }
  0xc0   : > { %v4313_v35 = vpack.i.b16 %v1782_v28, %v1782_v28  ;;  %v1716_v50 = vperm.slane %v4311_v34, 0  ;;  %v2112_v2 = vperm.slane %v4311_v34, 2 }
  0xc2   : > { %v1785_v51 = vperm.slane %v4313_v35, 1  ;;  %v1933_v58 = vperm.slane %v4313_v35, 0  ;;  %v4338_v6 = vunpack.c.l.bf16 %v1716_v50 }
  0xc4   : > { %v4340_v7 = vunpack.c.l.bf16 %v1785_v51 }
  0xdc   : > { %v677_v9 = vpop.f32.mrf.mxu1 }
  0xdd   : > { %v1005_v29 = vrot.slane %v677_v9, 4 }
  0xdf   : > { %v719_v24 = vpop.f32.mrf.mxu0 }
  0xe0   : > { %v663_v10 = vpop.f32.mrf.mxu3  ;;  %v691_v11 = vpop.f32.mrf.mxu2  ;;  %v1017_v30 = vrot.slane %v719_v24, 4 }
  0xe1   : > { %v993_v13 = vrot.slane %v663_v10, 4  ;;  %v990_v14 = vrot.slane %v691_v11, 4 }
  0xe3   : > { %v992_v15 = vsel %vm991_vm2, %v990_v14, %v663_v10  ;;  %v994_v16 = vsel %vm991_vm2, %v691_v11, %v993_v13  ;;  %v4345_v13 = vunpack.c.l.bf16 %v1933_v58 }
  0xe4   : > { %v4298_v17 = vpop.f32.mrf.mxu1  ;;  %v998_v31 = vperm.slane %v992_v15, %v4303_v25  ;;  %v1002_v32 = vperm.slane %v994_v16, %v4303_v25 }
  0xe5   : > { %v1341_v63 = vrot.slane %v4298_v17, 4 }
  0xe6   : > { %v1041_v44 = vrot.slane %v998_v31, 4  ;;  %v1053_v45 = vrot.slane %v1002_v32, 4 }
  0xe7   : > { %v721_v49 = vpop.f32.mrf.mxu0 }
  0xe8   : > { %v665_v20 = vpop.f32.mrf.mxu3  ;;  %v693_v21 = vpop.f32.mrf.mxu2  ;;  %v1353_v62 = vrot.slane %v721_v49, 4 }
  0xe9   : > { %v1329_v22 = vrot.slane %v665_v20, 4  ;;  %v1327_v23 = vrot.slane %v693_v21, 4 }
  0xeb   : > { %v1328_v26 = vsel %vm991_vm2, %v1327_v23, %v665_v20  ;;  %v1330_v27 = vsel %vm991_vm2, %v693_v21, %v1329_v22  ;;  %v4358_v22 = vunpack.c.l.bf16 %v2112_v2 }
  0xec   : > { %v4309_v33 = vpop.f32.mrf.mxu1  ;;  %v1334_v52 = vperm.slane %v1328_v26, %v4303_v25  ;;  %v1338_v56 = vperm.slane %v1330_v27, %v4303_v25 }
  0xed   : > { %v1029_v0 = vrot.slane %v4309_v33, 4 }
  0xee   : > { %v1377_v3 = vrot.slane %v1334_v52, 4 }
  0xf0   : > { %v705_v36 = vpop.f32.mrf.mxu3  ;;  %v747_v39 = vpop.f32.mrf.mxu2 }
  0xf1   : > { %v1003_v40 = vrot.slane %v705_v36, 4  ;;  %v1006_v41 = vsel %vm991_vm2, %v705_v36, %v1005_v29  ;;  %v1015_v42 = vrot.slane %v747_v39, 4  ;;  %v1018_v43 = vsel %vm991_vm2, %v747_v39, %v1017_v30 }
  0xf2   : > { %v1014_v46 = vperm.slane %v1006_v41, %v4303_v25  ;;  %v4334_v1 = vperm.slane %v1018_v43, %v4303_v25 }
  0xf3   : > { %v1004_v47 = vsel %vm991_vm2, %v1003_v40, %v677_v9  ;;  %v1016_v48 = vsel %vm991_vm2, %v1015_v42, %v719_v24  ;;  %v1389_v9 = vrot.slane %v1338_v56, 4  ;;  %v2286_v40 = vperm.slane %v4313_v35, 3 }
  0xf4   : > { %v1010_v53 = vperm.slane %v1004_v47, %v4303_v25  ;;  %v1051_v54 = vrot.slane %v1014_v46, 4  ;;  %v1054_v55 = vsel %vm991_vm2, %v1014_v46, %v1053_v45  ;;  %v4343_v11 = vperm.slane %v1016_v48, %v4303_v25  ;;  %v4347_v14 = vpop.f32.mrf.mxu1 }
  0xf5   : > { %v4350_v15 = vperm.slane %v1054_v55, %v4326_v57  ;;  %v1077_v12 = vrot.slane %v4334_v1, 4  ;;  %v1365_v26 = vrot.slane %v4347_v14, 4  ;;  %v4406_v58 = vunpack.c.l.bf16 %v2286_v40 }
  0xf6   : > { %v1039_v59 = vrot.slane %v1010_v53, 4  ;;  %v1042_v60 = vsel %vm991_vm2, %v1010_v53, %v1041_v44  ;;  %v1052_v61 = vsel %vm991_vm2, %v1051_v54, %v1002_v32  ;;  %v1065_v30 = vrot.slane %v4343_v11, 4 }
  0xf7   : > { %v4361_v23 = vperm.slane %v1042_v60, %v4326_v57  ;;  %v4367_v28 = vperm.slane %v1052_v61, %v4326_v57  ;;  %v1101_v43 = vrot.slane %v4350_v15, 4 }
  0xf8   : > { %v1040_v4 = vsel %vm991_vm2, %v1039_v59, %v998_v31  ;;  %v707_v5 = vpop.f32.mrf.mxu3  ;;  %v749_v8 = vpop.f32.mrf.mxu2 }
  0xf9   : > { %v1339_v10 = vrot.slane %v707_v5, 4  ;;  %v1342_v16 = vsel %vm991_vm2, %v707_v5, %v1341_v63  ;;  %v1351_v18 = vrot.slane %v749_v8, 4  ;;  %v1354_v19 = vsel %vm991_vm2, %v749_v8, %v1353_v62 }
  0xfa   : > { %v1350_v21 = vperm.slane %v1342_v16, %v4303_v25  ;;  %v4372_v31 = vperm.slane %v1040_v4, %v4326_v57  ;;  %v4376_v37 = vperm.slane %v1354_v19, %v4303_v25  ;;  %v1093_v42 = vrot.slane %v4361_v23, 4 }
  0xfb   : > { %v1340_v20 = vsel %vm991_vm2, %v1339_v10, %v4298_v17  ;;  %v1352_v27 = vsel %vm991_vm2, %v1351_v18, %v721_v49  ;;  %v1097_v53 = vrot.slane %v4367_v28, 4  ;;  %v1859_v63 = vperm.slane %v4311_v34, 3 }
  0xfc   : > { %v1346_v24 = vperm.slane %v1340_v20, %v4303_v25  ;;  %v1387_v29 = vrot.slane %v1350_v21, 4  ;;  %v1390_v17 = vsel %vm991_vm2, %v1350_v21, %v1389_v9  ;;  %v4384_v41 = vperm.slane %v1352_v27, %v4303_v25  ;;  %v4425_v21 = vpop.f32.mrf.mxu1 }
  0xfd   : > { %v4380_v39 = vperm.slane %v1390_v17, %v4326_v57  ;;  %v1089_v51 = vrot.slane %v4372_v31, 4  ;;  %v4429_v27 = vunpack.c.l.bf16 %v1859_v63 }
  0xfe   : > { %v1375_v32 = vrot.slane %v1346_v24, 4  ;;  %v1378_v36 = vsel %vm991_vm2, %v1346_v24, %v1377_v3  ;;  %v1388_v38 = vsel %vm991_vm2, %v1387_v29, %v1338_v56  ;;  %v1401_v59 = vrot.slane %v4384_v41, 4 }
  0xff   : > { %v4390_v45 = vperm.slane %v1378_v36, %v4326_v57  ;;  %v4396_v48 = vperm.slane %v1388_v38, %v4326_v57  ;;  %v1437_v55 = vrot.slane %v4380_v39, 4 }
 0x100   : > { %v1376_v44 = vsel %vm991_vm2, %v1375_v32, %v1334_v52  ;;  %v761_v46 = vpop.f32.mrf.mxu3  ;;  %v1413_v52 = vrot.slane %v4376_v37, 4 }
 0x101   : > { %v4393_v47 = vperm.slane %v1376_v44, %v4326_v57  ;;  %v1027_v49 = vrot.slane %v761_v46, 4  ;;  %v1030_v50 = vsel %vm991_vm2, %v761_v46, %v1029_v0  ;;  %v1429_v2 = vrot.slane %v4390_v45, 4 }
 0x102   : > { %v1038_v54 = vperm.slane %v1030_v50, %v4303_v25  ;;  %v1433_v3 = vrot.slane %v4396_v48, 4 }
 0x103   : > { %v1028_v56 = vsel %vm991_vm2, %v1027_v49, %v4309_v33  ;;  %v1425_v0 = vrot.slane %v4393_v47, 4  ;;  %v4416_v33 = vpop.f32.mrf.mxu0 }
 0x104   : > { %v1034_v60 = vperm.slane %v1028_v56, %v4303_v25  ;;  %v1075_v61 = vrot.slane %v1038_v54, 4  ;;  %v1078_v62 = vsel %vm991_vm2, %v1038_v54, %v1077_v12  ;;  %v1105_v10 = vrot.slane %v4416_v33, 4 }
 0x105   : > { %v1086_v4 = vperm.slane %v1078_v62, %v4326_v57 }
 0x106   : > { %v1063_v5 = vrot.slane %v1034_v60, 4  ;;  %v1066_v8 = vsel %vm991_vm2, %v1034_v60, %v1065_v30  ;;  %v1076_v9 = vsel %vm991_vm2, %v1075_v61, %v4334_v1 }
 0x107   : > { %v1074_v16 = vperm.slane %v1066_v8, %v4326_v57  ;;  %v1082_v18 = vperm.slane %v1076_v9, %v4326_v57  ;;  %v1099_v19 = vrot.slane %v1086_v4, 4  ;;  %v1102_v20 = vsel %vm991_vm2, %v1086_v4, %v1101_v43 }
 0x108   : > { %v1064_v12 = vsel %vm991_vm2, %v1063_v5, %v4343_v11  ;;  %v1684_v24 = vpack.c.bf16 %v1102_v20, %v1102_v20 }
 0x109   : > { %v1070_v1 = vperm.slane %v1064_v12, %v4326_v57  ;;  %v1091_v17 = vrot.slane %v1074_v16, 4  ;;  %v1094_v30 = vsel %vm991_vm2, %v1074_v16, %v1093_v42  ;;  %v1095_v32 = vrot.slane %v1082_v18, 4 }
 0x10a   : > { %v1098_v36 = vsel %vm991_vm2, %v1082_v18, %v1097_v53  ;;  %v1100_v38 = vsel %vm991_vm2, %v1099_v19, %v4350_v15  ;;  %v1672_v40 = vpack.c.bf16 %v1094_v30, %v1094_v30  ;;  %v1731_v43 = vunpack.c.l.bf16 %v1684_v24 }
 0x10b   : > { %v1087_v44 = vrot.slane %v1070_v1, 4  ;;  %v1090_v11 = vsel %vm991_vm2, %v1070_v1, %v1089_v51  ;;  %v1092_v46 = vsel %vm991_vm2, %v1091_v17, %v4361_v23  ;;  %v1096_v49 = vsel %vm991_vm2, %v1095_v32, %v4367_v28 }
 0x10c   : > { %v1666_v50 = vpack.c.bf16 %v1090_v11, %v1090_v11  ;;  %v1669_v54 = vpack.c.bf16 %v1092_v46, %v1092_v46  ;;  %v1675_v42 = vpack.c.bf16 %v1096_v49, %v1096_v49  ;;  %v1678_v56 = vpack.c.bf16 %v1098_v36, %v1098_v36 }
 0x10d   : > { %v1088_v53 = vsel %vm991_vm2, %v1087_v44, %v4372_v31  ;;  %v1681_v60 = vpack.c.bf16 %v1100_v38, %v1100_v38  ;;  %v1723_v15 = vunpack.c.l.bf16 %v1672_v40  ;;  %v4445_v61 = vmul.f32 %v4338_v6, %v1731_v43 }
 0x10e   : > { %v1663_v62 = vpack.c.bf16 %v1088_v53, %v1088_v53  ;;  %v1719_v51 = vunpack.c.l.bf16 %v1666_v50  ;;  %v1721_v63 = vunpack.c.l.bf16 %v1669_v54  ;;  %v1725_v4 = vunpack.c.l.bf16 %v1675_v42 }
 0x10f   : > { %v4447_v23 = vunpack.c.l.bf16 %v1678_v56  ;;  %v4449_v5 = vunpack.c.l.bf16 %v1681_v60  ;;  %v1740_v28 = vmul.f32 %v4338_v6, %v1723_v15  ;;  %v1764_v8 = vpack.c.bf16 %v4445_v61, %v4445_v61 }
 0x110   : > { %v1717_v9 = vunpack.c.l.bf16 %v1663_v62  ;;  %v4455_v31 = vmul.f32 %v4338_v6, %v1719_v51  ;;  %v4458_v16 = vmul.f32 %v4338_v6, %v1721_v63  ;;  %v1742_v18 = vmul.f32 %v4338_v6, %v1725_v4 }
 0x111   : > { %5715 = vst [vmem:[#allocation23_spill] sm:$0xff] %v4447_v23  ;;  %v4463_v19 = vmul.f32 %v4338_v6, %v4447_v23  ;;  %v4467_v20 = vmul.f32 %v4338_v6, %v4449_v5  ;;  %v1756_v12 = vpack.c.bf16 %v1740_v28, %v1740_v28  ;;  %v1795_v24 = vmul.f32 %v4340_v7, %v1725_v4  ;;  %v763_v28 = vpop.f32.mrf.mxu3 }
 0x112   : > { %5716 = vst [vmem:[#allocation24_spill] sm:$0xff] %v4449_v5  ;;  %v1734_v1 = vmul.f32 %v4338_v6, %v1717_v9  ;;  %v1758_v32 = vpack.c.bf16 %v1742_v18, %v1742_v18  ;;  %v4479_v38 = vmul.f32 %v4340_v7, %v4447_v23  ;;  %v4483_v40 = vmul.f32 %v4340_v7, %v4449_v5 }
 0x113   : > { %5717 = vst [vmem:[#allocation25_spill] sm:$0xff] %v4458_v16  ;;  %v4475_v36 = vunpack.c.l.bf16 %v1756_v12  ;;  %v1801_v44 = vmul.f32 %v4340_v7, %v1731_v43  ;;  %v1811_v46 = vpack.c.bf16 %v1795_v24, %v1795_v24  ;;  %v1943_v49 = vmul.f32 %v4345_v13, %v1717_v9 }
 0x114   : > { %5718 = vst [vmem:[#allocation26_spill] sm:$0xff] %v4463_v19  ;;  %v1750_v11 = vpack.c.bf16 %v1734_v1, %v1734_v1  ;;  %v4488_v50 = vmul.f32 %v4345_v13, %v1719_v51  ;;  %v4491_v42 = vmul.f32 %v4345_v13, %v1721_v63  ;;  %v1952_v56 = vmul.f32 %v4345_v13, %v1723_v15 }
 0x115   : > { %5719 = vst [vmem:[#allocation27_spill] sm:$0xff] %v4467_v20  ;;  %v1817_v54 = vpack.c.bf16 %v1801_v44, %v1801_v44  ;;  %v1955_v53 = vmul.f32 %v4345_v13, %v1725_v4  ;;  %v4497_v61 = vunpack.c.l.bf16 %v1811_v46  ;;  %v4501_v62 = vmul.f32 %v4345_v13, %v4447_v23 }
 0x116   : > { %5720 = vst [vmem:[#allocation28_spill] sm:$0xff] %v4475_v36  ;;  %v4495_v60 = vunpack.c.l.bf16 %v1750_v11  ;;  %v4505_v51 = vmul.f32 %v4345_v13, %v4449_v5  ;;  %v1964_v63 = vmul.f32 %v4345_v13, %v1731_v43  ;;  %v1967_v15 = vpack.c.bf16 %v1943_v49, %v1943_v49 }
 0x117   : > { %5721 = vst [vmem:[#allocation29_spill] sm:$0xff] %v4483_v40  ;;  %v4507_v9 = vunpack.c.l.bf16 %v1817_v54  ;;  %v1976_v24 = vpack.c.bf16 %v1952_v56, %v1952_v56  ;;  %v1979_v1 = vpack.c.bf16 %v1955_v53, %v1955_v53  ;;  %v2118_v44 = vmul.f32 %v4358_v22, %v1725_v4 }
 0x118   : > { %5722 = vst [vmem:[#allocation30_spill] sm:$0xff] %v4488_v50  ;;  %v1988_v11 = vpack.c.bf16 %v1964_v63, %v1964_v63  ;;  %v4515_v46 = vunpack.c.l.bf16 %v1967_v15  ;;  %v4518_v30 = vmul.f32 %v4358_v22, %v1731_v43  ;;  %v1363_v54 = vrot.slane %v763_v28, 4 }
 0x119   : > { %5723 = vst [vmem:[#allocation31_spill] sm:$0xff] %v4491_v42  ;;  %v4520_v17 = vunpack.c.l.bf16 %v1976_v24  ;;  %v4522_v49 = vunpack.c.l.bf16 %v1979_v1  ;;  %v2142_v29 = vpack.c.bf16 %v2118_v44, %v2118_v44  ;;  %v1366_v12 = vsel %vm991_vm2, %v763_v28, %v1365_v26  ;;  %v4538_v44 = vpop.f32.mrf.mxu0  ;;  %v4574_v15 = vpop.f32.mrf.mxu3 }
 0x11a   : > { %5724 = vst [vmem:[#allocation32_spill] sm:$0xff] %v4501_v62  ;;  %v4527_v56 = vunpack.c.l.bf16 %v1988_v11  ;;  %v1364_v53 = vsel %vm991_vm2, %v1363_v54, %v4347_v14  ;;  %v1374_v43 = vperm.slane %v1366_v12, %v4303_v25  ;;  %v4543_v11 = vunpack.c.l.bf16 %v1758_v32  ;;  %v4547_v12 = vpop.f32.mrf.mxu2 }
 0x11b   : > { %5725 = vst [vmem:[#allocation33_spill] sm:$0xff] %v4505_v51  ;;  %v4535_v24 = vunpack.c.l.bf16 %v2142_v29  ;;  %v1370_v1 = vperm.slane %v1364_v53, %v4303_v25  ;;  %v4545_v14 = vunpack.c.l.bf16 %v1764_v8  ;;  %v4561_v8 = vsel %vm991_vm2, %v4547_v12, %v1105_v10 }
 0x11c   : > { %5726 = vst [vmem:[#allocation34_spill] sm:$0xff] %v4507_v9  ;;  %v1411_v26 = vrot.slane %v1374_v43, 4  ;;  %v1414_v28 = vsel %vm991_vm2, %v1374_v43, %v1413_v52 }
 0x11d   : > { %5727 = vst [vmem:[#allocation35_spill] sm:$0xff] %v4518_v30  ;;  %v1399_v54 = vrot.slane %v1370_v1, 4  ;;  %v1402_v29 = vsel %vm991_vm2, %v1370_v1, %v1401_v59  ;;  %v1422_v53 = vperm.slane %v1414_v28, %v4326_v57 }
 0x11e   : > { %5728 = vst [vmem:[#allocation36_spill] sm:$0xff] %v4520_v17  ;;  %v1410_v18 = vperm.slane %v1402_v29, %v4326_v57  ;;  %v1412_v52 = vsel %vm991_vm2, %v1411_v26, %v4376_v37 }
 0x11f   : > { %5729 = vst [vmem:[#allocation37_spill] sm:$0xff] %v4527_v56  ;;  %v1400_v59 = vsel %vm991_vm2, %v1399_v54, %v4384_v41  ;;  %v1418_v43 = vperm.slane %v1412_v52, %v4326_v57  ;;  %v1435_v1 = vrot.slane %v1422_v53, 4  ;;  %v1438_v28 = vsel %vm991_vm2, %v1422_v53, %v1437_v55 }
 0x120   : > { %v1406_v37 = vperm.slane %v1400_v59, %v4326_v57  ;;  %v1427_v26 = vrot.slane %v1410_v18, 4  ;;  %v1430_v10 = vsel %vm991_vm2, %v1410_v18, %v1429_v2  ;;  %v1708_v29 = vpack.c.bf16 %v1438_v28, %v1438_v28 }
 0x121   : > { %v1431_v4 = vrot.slane %v1418_v43, 4  ;;  %v1434_v41 = vsel %vm991_vm2, %v1418_v43, %v1433_v3  ;;  %v1436_v54 = vsel %vm991_vm2, %v1435_v1, %v4380_v39  ;;  %v1696_v52 = vpack.c.bf16 %v1430_v10, %v1430_v10 }
 0x122   : > { %v1423_v55 = vrot.slane %v1406_v37, 4  ;;  %v1426_v53 = vsel %vm991_vm2, %v1406_v37, %v1425_v0  ;;  %v1428_v2 = vsel %vm991_vm2, %v1427_v26, %v4390_v45  ;;  %v1702_v18 = vpack.c.bf16 %v1434_v41, %v1434_v41 }
 0x123   : > { %v1432_v59 = vsel %vm991_vm2, %v1431_v4, %v4396_v48  ;;  %v1690_v28 = vpack.c.bf16 %v1426_v53, %v1426_v53  ;;  %v1693_v32 = vpack.c.bf16 %v1428_v2, %v1428_v2  ;;  %v1705_v63 = vpack.c.bf16 %v1436_v54, %v1436_v54  ;;  %v791_v2 = vpop.f32.mrf.mxu1 }
 0x124   : > { %v1424_v3 = vsel %vm991_vm2, %v1423_v55, %v4393_v47  ;;  %v1699_v39 = vpack.c.bf16 %v1432_v59, %v1432_v59  ;;  %v4590_v43 = vunpack.c.l.bf16 %v1696_v52  ;;  %v1862_v1 = vunpack.c.l.bf16 %v1702_v18 }
 0x125   : > { %v1687_v10 = vpack.c.bf16 %v1424_v3, %v1424_v3  ;;  %v4592_v56 = vunpack.c.l.bf16 %v1690_v28  ;;  %v4594_v0 = vunpack.c.l.bf16 %v1693_v32  ;;  %v1864_v45 = vunpack.c.l.bf16 %v1705_v63  ;;  %v805_v3 = vpop.f32.mrf.mxu2 }
 0x126   : > { %5730 = vst [vmem:[#allocation38_spill] sm:$0xff] %v4590_v43  ;;  %v1809_v37 = vmul.f32 %v4340_v7, %v4590_v43  ;;  %v1860_v48 = vunpack.c.l.bf16 %v1699_v39  ;;  %v1866_v4 = vunpack.c.l.bf16 %v1708_v29  ;;  %v1879_v26 = vmul.f32 %v4429_v27, %v1862_v1 }
 0x127   : > { %5731 = vst [vmem:[#allocation39_spill] sm:$0xff] %v4594_v0  ;;  %v4599_v41 = vunpack.c.l.bf16 %v1687_v10  ;;  %v1881_v47 = vmul.f32 %v4429_v27, %v1864_v45  ;;  %v2307_v54 = vmul.f32 %v4406_v58, %v1862_v1  ;;  %v2310_v52 = vmul.f32 %v4406_v58, %v1864_v45 }
 0x128   : > { %v1825_v55 = vpack.c.bf16 %v1809_v37, %v1809_v37  ;;  %v1877_v32 = vmul.f32 %v4429_v27, %v1860_v48  ;;  %v1883_v63 = vmul.f32 %v4429_v27, %v1866_v4  ;;  %v1895_v53 = vpack.c.bf16 %v1879_v26, %v1879_v26  ;;  %v819_v37 = vpop.f32.mrf.mxu3 }
 0x129   : > { %v1803_v29 = vmul.f32 %v4340_v7, %v4599_v41  ;;  %v1897_v18 = vpack.c.bf16 %v1881_v47, %v1881_v47  ;;  %v2304_v59 = vmul.f32 %v4406_v58, %v1860_v48  ;;  %v2313_v28 = vmul.f32 %v4406_v58, %v1866_v4 }
 0x12a   : > { %v1841_v39 = vunpack.c.l.bf16 %v1825_v55  ;;  %v1893_v1 = vpack.c.bf16 %v1877_v32, %v1877_v32  ;;  %v1899_v10 = vpack.c.bf16 %v1883_v63, %v1883_v63  ;;  %v4610_v45 = vunpack.c.l.bf16 %v1895_v53 }
 0x12b   : > { %v1819_v30 = vpack.c.bf16 %v1803_v29, %v1803_v29  ;;  %v4612_v17 = vunpack.c.l.bf16 %v1897_v18  ;;  %v2328_v26 = vpack.c.bf16 %v2304_v59, %v2304_v59  ;;  %v2331_v43 = vpack.c.bf16 %v2307_v54, %v2307_v54  ;;  %v831_v59 = vpop.f32.mrf.mxu0 }
 0x12c   : > { %5732 = vst [vmem:[#allocation40_spill] sm:$0xff] %v4610_v45  ;;  %v1857_v9 = vadd.f32 %v1841_v39, %v4545_v14  ;;  %v1909_v36 = vunpack.c.l.bf16 %v1893_v1  ;;  %v1915_v47 = vunpack.c.l.bf16 %v1899_v10  ;;  %v2334_v51 = vpack.c.bf16 %v2310_v52, %v2310_v52 }
 0x12d   : > { %5733 = vst [vmem:[#allocation41_spill] sm:$0xff] %v4612_v17  ;;  %v1835_v48 = vunpack.c.l.bf16 %v1819_v30  ;;  %v2337_v20 = vpack.c.bf16 %v2313_v28, %v2313_v28  ;;  %v4615_v4 = vunpack.c.l.bf16 %v2328_v26  ;;  %v4617_v55 = vunpack.c.l.bf16 %v2331_v43 }
 0x12e   : > { %v4619_v32 = vadd.f32 %v1915_v47, %v1857_v9  ;;  %v4621_v63 = vunpack.c.l.bf16 %v2334_v51  ;;  %v5737_v53 = vrot.slane %v4547_v12, 4  ;;  %v1114_v14 = vperm.slane %v4561_v8, %v4303_v25 }
 0x12f   : > { %5734 = vst [vmem:[#allocation42_spill] sm:$0xff] %v4617_v55  ;;  %v1851_v52 = vadd.f32 %v1835_v48, %v4543_v11  ;;  %v4630_v30 = vunpack.c.l.bf16 %v2337_v20  ;;  %v1115_v51 = vrot.slane %v4574_v15, 4  ;;  %v5739_v18 = vrot.slane %v4425_v21, 4  ;;  %v845_v48 = vpop.f32.mrf.mxu1 }
 0x130   : > { %5735 = vst [vmem:[#allocation43_spill] sm:$0xff] %v4619_v32  ;;  %v1104_v54 = vsel %vm991_vm2, %v5737_v53, %v4416_v33  ;;  %v1165_v9 = vrot.slane %v1114_v14, 4  ;;  %v1453_v33 = vrot.slane %v791_v2, 4  ;;  %v1439_v1 = vrot.slane %v805_v3, 4 }
 0x131   : > { %5736 = vst [vmem:[#allocation44_spill] sm:$0xff] %v4621_v63  ;;  %v1110_v43 = vperm.slane %v1104_v54, %v4303_v25  ;;  %v1118_v12 = vsel %vm991_vm2, %v4574_v15, %v5739_v18  ;;  %v4639_v28 = vadd.f32 %v1909_v36, %v1851_v52  ;;  %v1116_v39 = vsel %vm991_vm2, %v1115_v51, %v4425_v21  ;;  %v859_v52 = vpop.f32.mrf.mxu2 }
 0x132   : > { %5738 = vst [vmem:[#allocation45_spill] sm:$0xff] %v4630_v30  ;;  %v1126_v8 = vperm.slane %v1118_v12, %v4303_v25  ;;  %v5740_v10 = vrot.slane %v4538_v44, 4  ;;  %v1451_v47 = vrot.slane %v819_v37, 4  ;;  %v1122_v15 = vperm.slane %v1116_v39, %v4303_v25  ;;  %v873_v12 = vpop.f32.mrf.mxu3 }
 0x133   : > { %v1153_v20 = vrot.slane %v1110_v43, 4  ;;  %v1440_v21 = vsel %vm991_vm2, %v1439_v1, %v4538_v44  ;;  %v3494_v44 = vld [vmem:[#allocation8 + $0x10] sm:$0xff] }
 0x134   : > { %v1442_v26 = vsel %vm991_vm2, %v805_v3, %v5740_v10  ;;  %v1163_v53 = vrot.slane %v1126_v8, 4  ;;  %v1166_v36 = vsel %vm991_vm2, %v1126_v8, %v1165_v9  ;;  %v1452_v51 = vsel %vm991_vm2, %v1451_v47, %v791_v2  ;;  %v3495_v10 = vld [vmem:[#allocation8 + $0x18] sm:$0xff] }
 0x135   : > { %v1450_v54 = vperm.slane %v1442_v26, %v4303_v25  ;;  %v4652_v18 = vperm.slane %v1166_v36, %v4326_v57  ;;  %v1454_v3 = vsel %vm991_vm2, %v819_v37, %v1453_v33  ;;  %v1151_v11 = vrot.slane %v1122_v15, 4  ;;  %2846 = vmatpush.bf16.msrb.mxu0 %v3495_v10  ;;  %3544 = vmatpush.bf16.msrb.mxu3 %v3495_v10 }
 0x136   : > { %v1154_v39 = vsel %vm991_vm2, %v1122_v15, %v1153_v20  ;;  %v1164_v9 = vsel %vm991_vm2, %v1163_v53, %v1114_v14  ;;  %v1446_v8 = vperm.slane %v1440_v21, %v4303_v25  ;;  %v1458_v20 = vperm.slane %v1452_v51, %v4303_v25 }
 0x137   : > { %v4662_v26 = vperm.slane %v1154_v39, %v4326_v57  ;;  %v4665_v36 = vperm.slane %v1164_v9, %v4326_v57  ;;  %v1501_v2 = vrot.slane %v1450_v54, 4  ;;  %v1152_v37 = vsel %vm991_vm2, %v1151_v11, %v1110_v43 }
 0x138   : > { %v1489_v33 = vrot.slane %v1446_v8, 4  ;;  %v1462_v14 = vperm.slane %v1454_v3, %v4303_v25  ;;  %v4672_v1 = vperm.slane %v1152_v37, %v4326_v57  ;;  %v1129_v53 = vrot.slane %v831_v59, 4  ;;  %v833_v37 = vpop.f32.mrf.mxu0 }
 0x139   : > { %5741 = vst [vmem:[#allocation46_spill] sm:$0xff] %v4662_v26  ;;  %v1487_v21 = vrot.slane %v1458_v20, 4  ;;  %v1141_v3 = vrot.slane %v845_v48, 4  ;;  %v1127_v47 = vrot.slane %v859_v52, 4  ;;  %2847 = vmatpush.bf16.msrb.mxu0 %v3494_v44  ;;  %3545 = vmatpush.bf16.msrb.mxu3 %v3494_v44 }
 0x13a   : > { %v1490_v39 = vsel %vm991_vm2, %v1458_v20, %v1489_v33  ;;  %v1499_v9 = vrot.slane %v1462_v14, 4  ;;  %v1502_v10 = vsel %vm991_vm2, %v1462_v14, %v1501_v2  ;;  %v1130_v33 = vsel %vm991_vm2, %v859_v52, %v1129_v53  ;;  %v875_v14 = vpop.f32.mrf.mxu3 }
 0x13b   : > { %v4680_v11 = vperm.slane %v1490_v39, %v4326_v57  ;;  %v4683_v51 = vperm.slane %v1502_v10, %v4326_v57  ;;  %v1488_v29 = vsel %vm991_vm2, %v1487_v21, %v1446_v8  ;;  %v4696_v10 = vpop.f32.mrf.mxu1  ;;  %v1128_v43 = vsel %vm991_vm2, %v1127_v47, %v831_v59 }
 0x13c   : > { %v1500_v15 = vsel %vm991_vm2, %v1499_v9, %v1450_v54  ;;  %v4689_v20 = vperm.slane %v1488_v29, %v4326_v57  ;;  %v1138_v8 = vperm.slane %v1130_v33, %v4303_v25  ;;  %v1465_v54 = vrot.slane %v833_v37, 4  ;;  %v861_v9 = vpop.f32.mrf.mxu2 }
 0x13d   : > { %v4692_v2 = vperm.slane %v1500_v15, %v4326_v57  ;;  %v1139_v21 = vrot.slane %v873_v12, 4  ;;  %v1134_v15 = vperm.slane %v1128_v43, %v4303_v25  ;;  %v1142_v53 = vsel %vm991_vm2, %v873_v12, %v1141_v3 }
 0x13e   : > { %v1189_v39 = vrot.slane %v1138_v8, 4  ;;  %v1150_v59 = vperm.slane %v1142_v53, %v4303_v25  ;;  %v1477_v47 = vrot.slane %v4696_v10, 4  ;;  %v1463_v63 = vrot.slane %v861_v9, 4 }
 0x13f   : > { %v1140_v30 = vsel %vm991_vm2, %v1139_v21, %v845_v48  ;;  %v1177_v33 = vrot.slane %v1134_v15, 4  ;;  %v1466_v52 = vsel %vm991_vm2, %v861_v9, %v1465_v54  ;;  %v1475_v29 = vrot.slane %v875_v14, 4 }
 0x140   : > { %v1146_v32 = vperm.slane %v1140_v30, %v4303_v25  ;;  %v1187_v43 = vrot.slane %v1150_v59, 4  ;;  %v1190_v12 = vsel %vm991_vm2, %v1150_v59, %v1189_v39  ;;  %v4711_v3 = vperm.slane %v1466_v52, %v4303_v25  ;;  %v3493_v30 = vld [vmem:[#allocation8 + $0x8] sm:$0xff] }
 0x141   : > { %v1198_v53 = vperm.slane %v1190_v12, %v4326_v57  ;;  %v1464_v17 = vsel %vm991_vm2, %v1463_v63, %v833_v37  ;;  %v4727_v63 = vpop.f32.mrf.mxu0  ;;  %2848 = vmatpush.bf16.msrb.mxu0 %v3493_v30  ;;  %3546 = vmatpush.bf16.msrb.mxu3 %v3493_v30 }
 0x142   : > { %v1175_v48 = vrot.slane %v1146_v32, 4  ;;  %v1178_v21 = vsel %vm991_vm2, %v1146_v32, %v1177_v33  ;;  %v1188_v44 = vsel %vm991_vm2, %v1187_v43, %v1138_v8  ;;  %v1470_v54 = vperm.slane %v1464_v17, %v4303_v25 }
 0x143   : > { %v4717_v5 = vperm.slane %v1178_v21, %v4326_v57  ;;  %v1525_v39 = vrot.slane %v4711_v3, 4  ;;  %v1194_v52 = vperm.slane %v1188_v44, %v4326_v57  ;;  %v1211_v59 = vrot.slane %v1198_v53, 4  ;;  %v3492_v44 = vld [vmem:[#allocation8] sm:$0xff] }
 0x144   : > { %v1176_v9 = vsel %vm991_vm2, %v1175_v48, %v1134_v15  ;;  %v5743_v32 = vrot.slane %v4652_v18, 4  ;;  %v5744_v8 = vrot.slane %v4662_v26, 4  ;;  %v5745_v48 = vrot.slane %v4665_v36, 4 }
 0x145   : > { %5742 = vst [vmem:[#allocation47_spill] sm:$0xff] %v4717_v5  ;;  %v4730_v37 = vperm.slane %v1176_v9, %v4326_v57  ;;  %v1207_v12 = vrot.slane %v1194_v52, 4  ;;  %v1513_v0 = vrot.slane %v1470_v54, 4  ;;  %2849 = vmatpush.bf16.msrb.mxu0 %v3492_v44  ;;  %3547 = vmatpush.bf16.msrb.mxu3 %v3492_v44  ;;  %v915_v44 = vpop.f32.mrf.mxu2 }
 0x146   : > { %v1214_v33 = vsel %vm991_vm2, %v1198_v53, %v5743_v32  ;;  %v1206_v15 = vsel %vm991_vm2, %v4717_v5, %v5744_v8  ;;  %v1210_v21 = vsel %vm991_vm2, %v1194_v52, %v5745_v48  ;;  %v1212_v53 = vsel %vm991_vm2, %v1211_v59, %v4652_v18 }
 0x147   : > { %v1685_v43 = vpack.c.bf16 %v1214_v33, %v1214_v33  ;;  %v1673_v30 = vpack.c.bf16 %v1206_v15, %v1206_v15  ;;  %v1199_v9 = vrot.slane %v4730_v37, 4  ;;  %v1679_v32 = vpack.c.bf16 %v1210_v21, %v1210_v21 }
 0x148   : > { %v1682_v17 = vpack.c.bf16 %v1212_v53, %v1212_v53  ;;  %v1208_v8 = vsel %vm991_vm2, %v1207_v12, %v4665_v36  ;;  %v1476_v52 = vsel %vm991_vm2, %v1475_v29, %v4696_v10  ;;  %v1478_v10 = vsel %vm991_vm2, %v875_v14, %v1477_v47  ;;  %v4766_v29 = vpop.f32.mrf.mxu1 }
 0x149   : > { %v4743_v42 = vunpack.c.l.bf16 %v1685_v43  ;;  %v4747_v33 = vunpack.c.l.bf16 %v1673_v30  ;;  %v1200_v18 = vsel %vm991_vm2, %v1199_v9, %v4672_v1  ;;  %v1676_v59 = vpack.c.bf16 %v1208_v8, %v1208_v8  ;;  %v4773_v9 = vpop.f32.mrf.mxu3 }
 0x14a   : > { %v4753_v15 = vunpack.c.l.bf16 %v1679_v32  ;;  %v4755_v48 = vunpack.c.l.bf16 %v1682_v17  ;;  %v1664_v43 = vpack.c.bf16 %v1200_v18, %v1200_v18  ;;  %v1482_v53 = vperm.slane %v1476_v52, %v4303_v25 }
 0x14b   : > { %5746 = vst [vmem:[#allocation48_spill] sm:$0xff] %v4743_v42  ;;  %v4759_v36 = vmul.f32 %v4338_v6, %v4747_v33  ;;  %v4763_v12 = vmul.f32 %v4345_v13, %v4747_v33  ;;  %v4768_v21 = vunpack.c.l.bf16 %v1676_v59  ;;  %v1486_v17 = vperm.slane %v1478_v10, %v4303_v25 }
 0x14c   : > { %5747 = vst [vmem:[#allocation49_spill] sm:$0xff] %v4747_v33  ;;  %v1217_v30 = vrot.slane %v4727_v63, 4  ;;  %v4775_v32 = vunpack.c.l.bf16 %v1664_v43  ;;  %v1229_v47 = vrot.slane %v4766_v29, 4  ;;  %v1511_v18 = vrot.slane %v1482_v53, 4 }
 0x14d   : > { %5748 = vst [vmem:[#allocation50_spill] sm:$0xff] %v4755_v48  ;;  %v1514_v52 = vsel %vm991_vm2, %v1482_v53, %v1513_v0  ;;  %v1523_v59 = vrot.slane %v1486_v17, 4  ;;  %v1526_v10 = vsel %vm991_vm2, %v1486_v17, %v1525_v39  ;;  %v1215_v53 = vrot.slane %v915_v44, 4 }
 0x14e   : > { %5749 = vst [vmem:[#allocation51_spill] sm:$0xff] %v4759_v36  ;;  %v1735_v33 = vmul.f32 %v4338_v6, %v4775_v32  ;;  %v1944_v43 = vmul.f32 %v4345_v13, %v4775_v32  ;;  %v1522_v42 = vperm.slane %v1514_v52, %v4326_v57  ;;  %v1534_v8 = vperm.slane %v1526_v10, %v4326_v57  ;;  %v4790_v36 = vpop.f32.mrf.mxu0 }
 0x14f   : > { %5750 = vst [vmem:[#allocation52_spill] sm:$0xff] %v4763_v12  ;;  %v1512_v14 = vsel %vm991_vm2, %v1511_v18, %v1470_v54  ;;  %v1524_v0 = vsel %vm991_vm2, %v1523_v59, %v4711_v3  ;;  %v1218_v39 = vsel %vm991_vm2, %v915_v44, %v1217_v30  ;;  %v5751_v52 = vrot.slane %v4680_v11, 4 }
 0x150   : > { %v1751_v17 = vpack.c.bf16 %v1735_v33, %v1735_v33  ;;  %v1968_v12 = vpack.c.bf16 %v1944_v43, %v1944_v43  ;;  %v1518_v40 = vperm.slane %v1512_v14, %v4326_v57  ;;  %v1530_v48 = vperm.slane %v1524_v0, %v4326_v57 }
 0x151   : > { %v1539_v16 = vrot.slane %v1522_v42, 4  ;;  %v1542_v10 = vsel %vm991_vm2, %v1522_v42, %v5751_v52  ;;  %v1547_v5 = vrot.slane %v1534_v8, 4  ;;  %v5752_v54 = vrot.slane %v4683_v51, 4  ;;  %v4829_v26 = vpop.f32.mrf.mxu3 }
 0x152   : > { %v4804_v3 = vunpack.c.l.bf16 %v1751_v17  ;;  %v4806_v59 = vunpack.c.l.bf16 %v1968_v12  ;;  %v1535_v33 = vrot.slane %v1518_v40, 4  ;;  %v5753_v30 = vrot.slane %v4689_v20, 4 }
 0x153   : > { %v1550_v18 = vsel %vm991_vm2, %v1534_v8, %v5752_v54  ;;  %v1540_v14 = vsel %vm991_vm2, %v1539_v16, %v4680_v11  ;;  %v1543_v43 = vrot.slane %v1530_v48, 4  ;;  %v5754_v42 = vrot.slane %v4692_v2, 4  ;;  %v4825_v54 = vpop.f32.mrf.mxu1 }
 0x154   : > { %v1538_v44 = vsel %vm991_vm2, %v1518_v40, %v5753_v30  ;;  %v4820_v8 = vsel %vm991_vm2, %v1547_v5, %v4683_v51  ;;  %v1536_v17 = vsel %vm991_vm2, %v1535_v33, %v4689_v20  ;;  %v1694_v40 = vpack.c.bf16 %v1540_v14, %v1540_v14 }
 0x155   : > { %v4816_v0 = vsel %vm991_vm2, %v1530_v48, %v5754_v42  ;;  %5756 = vst [vmem:[#allocation54_spill] sm:$0xff] %v4820_v8  ;;  %v1691_v52 = vpack.c.bf16 %v1538_v44, %v1538_v44  ;;  %v1544_v16 = vsel %vm991_vm2, %v1543_v43, %v4692_v2  ;;  %v1688_v11 = vpack.c.bf16 %v1536_v17, %v1536_v17  ;;  %v917_v42 = vpop.f32.mrf.mxu2 }
 0x156   : > { %5755 = vst [vmem:[#allocation53_spill] sm:$0xff] %v4816_v0  ;;  %v1697_v30 = vpack.c.bf16 %v1542_v10, %v1542_v10  ;;  %v1709_v48 = vpack.c.bf16 %v1550_v18, %v1550_v18  ;;  %v1700_v5 = vpack.c.bf16 %v1544_v16, %v1544_v16  ;;  %v4833_v12 = vunpack.c.l.bf16 %v1694_v40 }
 0x157   : > { %v4831_v51 = vunpack.c.l.bf16 %v1691_v52  ;;  %v1216_v20 = vsel %vm991_vm2, %v1215_v53, %v4727_v63  ;;  %v4837_v33 = vunpack.c.l.bf16 %v1688_v11  ;;  %v1226_v18 = vperm.slane %v1218_v39, %v4303_v25  ;;  %v4849_v52 = vpop.f32.mrf.mxu0 }
 0x158   : > { %5758 = vst [vmem:[#allocation56_spill] sm:$0xff] %v4833_v12  ;;  %v4839_v44 = vunpack.c.l.bf16 %v1697_v30  ;;  %v4841_v14 = vunpack.c.l.bf16 %v1709_v48  ;;  %v1222_v2 = vperm.slane %v1216_v20, %v4303_v25  ;;  %v4844_v10 = vunpack.c.l.bf16 %v1700_v5 }
 0x159   : > { %5757 = vst [vmem:[#allocation55_spill] sm:$0xff] %v4831_v51  ;;  %v1553_v43 = vrot.slane %v4790_v36, 4  ;;  %v1227_v17 = vrot.slane %v4773_v9, 4  ;;  %v1230_v16 = vsel %vm991_vm2, %v4773_v9, %v1229_v47  ;;  %v1277_v30 = vrot.slane %v1226_v18, 4 }
 0x15a   : > { %5759 = vst [vmem:[#allocation57_spill] sm:$0xff] %v4839_v44  ;;  %v1884_v63 = vmul.f32 %v4429_v27, %v4841_v14  ;;  %v4855_v53 = vmul.f32 %v4406_v58, %v4841_v14  ;;  %v1265_v40 = vrot.slane %v1222_v2, 4  ;;  %v1878_v39 = vmul.f32 %v4429_v27, %v4844_v10 }
 0x15b   : > { %5760 = vst [vmem:[#allocation58_spill] sm:$0xff] %v4841_v14  ;;  %v2305_v11 = vmul.f32 %v4406_v58, %v4844_v10  ;;  %v1228_v48 = vsel %vm991_vm2, %v1227_v17, %v4766_v29  ;;  %v1238_v44 = vperm.slane %v1230_v16, %v4303_v25  ;;  %v1565_v47 = vrot.slane %v4825_v54, 4 }
 0x15c   : > { %5761 = vst [vmem:[#allocation59_spill] sm:$0xff] %v4855_v53  ;;  %v1900_v5 = vpack.c.bf16 %v1884_v63, %v1884_v63  ;;  %v1234_v14 = vperm.slane %v1228_v48, %v4303_v25  ;;  %v1894_v8 = vpack.c.bf16 %v1878_v39, %v1878_v39  ;;  %v1551_v12 = vrot.slane %v917_v42, 4  ;;  %v4881_v39 = vpop.f32.mrf.mxu1 }
 0x15d   : > { %v2329_v9 = vpack.c.bf16 %v2305_v11, %v2305_v11  ;;  %v1275_v19 = vrot.slane %v1238_v44, 4  ;;  %v1278_v16 = vsel %vm991_vm2, %v1238_v44, %v1277_v30  ;;  %v1253_v30 = vrot.slane %v4881_v39, 4 }
 0x15e   : > { %v4870_v55 = vunpack.c.l.bf16 %v1900_v5  ;;  %v1263_v45 = vrot.slane %v1234_v14, 4  ;;  %v1266_v62 = vsel %vm991_vm2, %v1234_v14, %v1265_v40  ;;  %v4873_v29 = vunpack.c.l.bf16 %v1894_v8  ;;  %v971_v14 = vpop.f32.mrf.mxu2  ;;  %v985_v40 = vpop.f32.mrf.mxu3 }
 0x15f   : > { %v4875_v17 = vunpack.c.l.bf16 %v2329_v9  ;;  %v4878_v63 = vperm.slane %v1266_v62, %v4326_v57  ;;  %v1276_v48 = vsel %vm991_vm2, %v1275_v19, %v1226_v18  ;;  %v4886_v5 = vperm.slane %v1278_v16, %v4326_v57  ;;  %v945_v20 = vpop.f32.mrf.mxu0 }
 0x160   : > { %5762 = vst [vmem:[#allocation60_spill] sm:$0xff] %v4870_v55  ;;  %v1264_v11 = vsel %vm991_vm2, %v1263_v45, %v1222_v2  ;;  %v1552_v8 = vsel %vm991_vm2, %v1551_v12, %v4790_v36  ;;  %v4895_v44 = vperm.slane %v1276_v48, %v4326_v57  ;;  %v1554_v2 = vsel %vm991_vm2, %v917_v42, %v1553_v43  ;;  %v3476_v48 = vld [vmem:[%s4191_s26] sm:$0xff]  ;;  %v3491_v45 = vld [vmem:[#allocation7 + $0x38] sm:$0xff] }
 0x161   : > { %5763 = vst [vmem:[#allocation61_spill] sm:$0xff] %v4878_v63  ;;  %v4892_v9 = vperm.slane %v1264_v11, %v4326_v57  ;;  %v1558_v18 = vperm.slane %v1552_v8, %v4303_v25  ;;  %v1563_v36 = vrot.slane %v4829_v26, 4  ;;  %v1562_v16 = vperm.slane %v1554_v2, %v4303_v25  ;;  %2987 = vmatpush.bf16.msra.mxu1 %v3491_v45 }
 0x162   : > { %v1566_v11 = vsel %vm991_vm2, %v4829_v26, %v1565_v47  ;;  %v1241_v8 = vrot.slane %v4849_v52, 4  ;;  %v1239_v2 = vrot.slane %v971_v14, 4  ;;  %3548 = vmatpush.bf16.msra.mxu2 %v3491_v45  ;;  %v1577_v53 = vrot.slane %v945_v20, 4  ;;  %3426 = vmatmul.msk.bf16.vlgmr.msrb.gmra.mxu0 %vm2817_vm3, %v3476_v48 }
 0x163   : > { %v1601_v62 = vrot.slane %v1558_v18, 4  ;;  %v1564_v42 = vsel %vm991_vm2, %v1563_v36, %v4825_v54  ;;  %v1574_v43 = vperm.slane %v1566_v11, %v4303_v25  ;;  %v1613_v19 = vrot.slane %v1562_v16, 4 }
 0x164   : > { %v1570_v12 = vperm.slane %v1564_v42, %v4303_v25  ;;  %v1242_v47 = vsel %vm991_vm2, %v971_v14, %v1241_v8  ;;  %v1240_v11 = vsel %vm991_vm2, %v1239_v2, %v4849_v52  ;;  %v3490_v42 = vld [vmem:[#allocation7 + $0x30] sm:$0xff]  ;;  %v959_v48 = vpop.f32.mrf.mxu1  ;;  %v4948_v50 = vmul.f32 %v4340_v7, %v4768_v21 }
 0x165   : > { %v1611_v26 = vrot.slane %v1574_v43, 4  ;;  %v1614_v36 = vsel %vm991_vm2, %v1574_v43, %v1613_v19  ;;  %v1246_v8 = vperm.slane %v1240_v11, %v4303_v25  ;;  %v1250_v52 = vperm.slane %v1242_v47, %v4303_v25  ;;  %2988 = vmatpush.bf16.msra.mxu1 %v3490_v42 }
 0x166   : > { %v1599_v55 = vrot.slane %v1570_v12, 4  ;;  %v1602_v54 = vsel %vm991_vm2, %v1570_v12, %v1601_v62  ;;  %v4925_v14 = vperm.slane %v1614_v36, %v4326_v57  ;;  %v1251_v12 = vrot.slane %v985_v40, 4  ;;  %3549 = vmatpush.bf16.msra.mxu2 %v3490_v42  ;;  %v987_v36 = vpop.f32.mrf.mxu3 }
 0x167   : > { %v4921_v63 = vperm.slane %v1602_v54, %v4326_v57  ;;  %v1612_v45 = vsel %vm991_vm2, %v1611_v26, %v1562_v16  ;;  %v1289_v26 = vrot.slane %v1246_v8, 4  ;;  %v973_v54 = vpop.f32.mrf.mxu2  ;;  %v1301_v11 = vrot.slane %v1250_v52, 4 }
 0x168   : > { %5765 = vst [vmem:[#allocation63_spill] sm:$0xff] %v4925_v14  ;;  %v1600_v62 = vsel %vm991_vm2, %v1599_v55, %v1558_v18  ;;  %v4930_v19 = vperm.slane %v1612_v45, %v4326_v57  ;;  %v3489_v55 = vld [vmem:[#allocation7 + $0x28] sm:$0xff]  ;;  %v1252_v47 = vsel %vm991_vm2, %v1251_v12, %v4881_v39  ;;  %v1254_v45 = vsel %vm991_vm2, %v985_v40, %v1253_v30  ;;  %v3488_v18 = vld [vmem:[#allocation7 + $0x20] sm:$0xff] }
 0x169   : > { %5764 = vst [vmem:[#allocation62_spill] sm:$0xff] %v4921_v63  ;;  %v4934_v43 = vperm.slane %v1600_v62, %v4326_v57  ;;  %v1258_v62 = vperm.slane %v1252_v47, %v4303_v25  ;;  %v1262_v16 = vperm.slane %v1254_v45, %v4303_v25  ;;  %v1589_v0 = vrot.slane %v959_v48, 4  ;;  %2989 = vmatpush.bf16.msra.mxu1 %v3489_v55 }
 0x16a   : > { %v1575_v2 = vrot.slane %v973_v54, 4  ;;  %v1578_v14 = vsel %vm991_vm2, %v973_v54, %v1577_v53  ;;  %v1587_v23 = vrot.slane %v987_v36, 4  ;;  %3550 = vmatpush.bf16.msra.mxu2 %v3489_v55 }
 0x16b   : > { %v1287_v39 = vrot.slane %v1258_v62, 4  ;;  %v1290_v40 = vsel %vm991_vm2, %v1258_v62, %v1289_v26  ;;  %v1299_v30 = vrot.slane %v1262_v16, 4  ;;  %v1302_v12 = vsel %vm991_vm2, %v1262_v16, %v1301_v11 }
 0x16c   : > { %v4953_v47 = vperm.slane %v1290_v40, %v4326_v57  ;;  %v1310_v45 = vperm.slane %v1302_v12, %v4326_v57  ;;  %v1576_v53 = vsel %vm991_vm2, %v1575_v2, %v945_v20  ;;  %v1586_v54 = vperm.slane %v1578_v14, %v4303_v25  ;;  %v3487_v20 = vld [vmem:[#allocation7 + $0x18] sm:$0xff] }
 0x16d   : > { %v1288_v55 = vsel %vm991_vm2, %v1287_v39, %v1246_v8  ;;  %v1300_v42 = vsel %vm991_vm2, %v1299_v30, %v1250_v52  ;;  %v1582_v51 = vperm.slane %v1576_v53, %v4303_v25  ;;  %v1588_v26 = vsel %vm991_vm2, %v1587_v23, %v959_v48  ;;  %2990 = vmatpush.bf16.msra.mxu1 %v3488_v18 }
 0x16e   : > { %5766 = vst [vmem:[#allocation64_spill] sm:$0xff] %v4953_v47  ;;  %v4963_v16 = vperm.slane %v1288_v55, %v4326_v57  ;;  %v1306_v11 = vperm.slane %v1300_v42, %v4326_v57  ;;  %v1323_v40 = vrot.slane %v1310_v45, 4  ;;  %3551 = vmatpush.bf16.msra.mxu2 %v3488_v18  ;;  %v5767_v14 = vrot.slane %v4886_v5, 4  ;;  %v3477_v18 = vld [vmem:[%s4191_s26 + $0x8] sm:$0xff] }
 0x16f   : > { %v1625_v52 = vrot.slane %v1582_v51, 4  ;;  %v1637_v2 = vrot.slane %v1586_v54, 4  ;;  %v1590_v23 = vsel %vm991_vm2, %v987_v36, %v1589_v0  ;;  %v5768_v30 = vrot.slane %v4895_v44, 4 }
 0x170   : > { %v1326_v8 = vsel %vm991_vm2, %v1310_v45, %v5767_v14  ;;  %v1311_v48 = vrot.slane %v4963_v16, 4  ;;  %v1319_v39 = vrot.slane %v1306_v11, 4  ;;  %v1324_v12 = vsel %vm991_vm2, %v1323_v40, %v4886_v5 }
 0x171   : > { %v1322_v42 = vsel %vm991_vm2, %v1306_v11, %v5768_v30  ;;  %v1683_v55 = vpack.c.bf16 %v1324_v12, %v1324_v12  ;;  %v1686_v62 = vpack.c.bf16 %v1326_v8, %v1326_v8  ;;  %v1594_v45 = vperm.slane %v1588_v26, %v4303_v25  ;;  %2991 = vmatpush.bf16.msra.mxu1 %v3487_v20  ;;  %v3486_v11 = vld [vmem:[#allocation7 + $0x10] sm:$0xff] }
 0x172   : > { %v1680_v53 = vpack.c.bf16 %v1322_v42, %v1322_v42  ;;  %v1312_v14 = vsel %vm991_vm2, %v1311_v48, %v4892_v9  ;;  %v1320_v0 = vsel %vm991_vm2, %v1319_v39, %v4895_v44  ;;  %v1598_v36 = vperm.slane %v1590_v23, %v4303_v25  ;;  %3552 = vmatpush.bf16.msra.mxu2 %v3487_v20 }
 0x173   : > { %v1665_v5 = vpack.c.bf16 %v1312_v14, %v1312_v14  ;;  %v1677_v40 = vpack.c.bf16 %v1320_v0, %v1320_v0  ;;  %v4987_v8 = vunpack.c.l.bf16 %v1683_v55  ;;  %v4989_v26 = vunpack.c.l.bf16 %v1686_v62  ;;  %3427 = vmatmul.msk.bf16.gmra.mxu0 %vm2817_vm3, %v3477_v18 }
 0x174   : > { %v4985_v42 = vunpack.c.l.bf16 %v1680_v53  ;;  %v1623_v12 = vrot.slane %v1594_v45, 4  ;;  %v1626_v48 = vsel %vm991_vm2, %v1594_v45, %v1625_v52  ;;  %v1635_v47 = vrot.slane %v1598_v36, 4  ;;  %v3485_v53 = vld [vmem:[#allocation7 + $0x8] sm:$0xff] }
 0x175   : > { %5769 = vst [vmem:[#allocation65_spill] sm:$0xff] %v4987_v8  ;;  %v4993_v25 = vunpack.c.l.bf16 %v1677_v40  ;;  %v5001_v20 = vmul.f32 %v4345_v13, %v4987_v8  ;;  %v5004_v23 = vperm.slane %v1626_v48, %v4326_v57  ;;  %v1966_v62 = vmul.f32 %v4345_v13, %v4989_v26  ;;  %2992 = vmatpush.bf16.msra.mxu1 %v3486_v11 }
 0x176   : > { %5770 = vst [vmem:[#allocation66_spill] sm:$0xff] %v4989_v26  ;;  %v4997_v44 = vmul.f32 %v4345_v13, %v4985_v42  ;;  %v5010_v52 = vmul.f32 %v4358_v22, %v4989_v26  ;;  %v1624_v39 = vsel %vm991_vm2, %v1623_v12, %v1582_v51  ;;  %v1636_v18 = vsel %vm991_vm2, %v1635_v47, %v1586_v54 }
 0x177   : > { %5772 = vst [vmem:[#allocation68_spill] sm:$0xff] %v5001_v20  ;;  %v1957_v55 = vmul.f32 %v4345_v13, %v4993_v25  ;;  %v2120_v45 = vmul.f32 %v4358_v22, %v4993_v25  ;;  %v5019_v14 = vperm.slane %v1624_v39, %v4326_v57  ;;  %v1638_v0 = vsel %vm991_vm2, %v1598_v36, %v1637_v2 }
 0x178   : > { %5771 = vst [vmem:[#allocation67_spill] sm:$0xff] %v4997_v44  ;;  %3553 = vmatpush.bf16.msra.mxu2 %v3486_v11  ;;  %v1990_v40 = vpack.c.bf16 %v1966_v62, %v1966_v62  ;;  %v5023_v48 = vperm.slane %v1636_v18, %v4326_v57  ;;  %v5026_v51 = vperm.slane %v1638_v0, %v4326_v57  ;;  %v5777_v26 = vrot.slane %v4921_v63, 4  ;;  %v3484_v62 = vld [vmem:[#allocation7] sm:$0xff] }
 0x179   : > { %5773 = vst [vmem:[#allocation69_spill] sm:$0xff] %v5004_v23  ;;  %v1981_v54 = vpack.c.bf16 %v1957_v55, %v1957_v55  ;;  %v2144_v12 = vpack.c.bf16 %v2120_v45, %v2120_v45  ;;  %v1647_v30 = vrot.slane %v5019_v14, 4  ;;  %2993 = vmatpush.bf16.msra.mxu1 %v3485_v53  ;;  %v1843_v11 = vadd.f32 %v4497_v61, %v4495_v60 }
 0x17a   : > { %5774 = vst [vmem:[#allocation70_spill] sm:$0xff] %v5010_v52  ;;  %v5034_v39 = vsel %vm991_vm2, %v5004_v23, %v5777_v26  ;;  %v5036_v2 = vunpack.c.l.bf16 %v1990_v40  ;;  %v1655_v36 = vrot.slane %v5023_v48, 4  ;;  %v1812_v26 = vpack.c.bf16 %v4948_v50, %v4948_v50 }
 0x17b   : > { %5775 = vst [vmem:[#allocation71_spill] sm:$0xff] %v5023_v48  ;;  %v5042_v18 = vunpack.c.l.bf16 %v1981_v54  ;;  %v2168_v55 = vunpack.c.l.bf16 %v2144_v12  ;;  %v1648_v45 = vsel %vm991_vm2, %v1647_v30, %v4934_v43  ;;  %v1869_v54 = vmul.f32 %v4429_v27, %v4599_v41  ;;  %v3478_v12 = vld [vmem:[%s4191_s26 + $0x10] sm:$0xff] }
 0x17c   : > { %5776 = vst [vmem:[#allocation72_spill] sm:$0xff] %v5026_v51  ;;  %3554 = vmatpush.bf16.msra.mxu2 %v3485_v53  ;;  %v1656_v0 = vsel %vm991_vm2, %v1655_v36, %v4930_v19  ;;  %v1689_v40 = vpack.c.bf16 %v1648_v45, %v1648_v45  ;;  %v1828_v47 = vunpack.c.l.bf16 %v1812_v26  ;;  %v1870_v30 = vmul.f32 %v4429_v27, %v4837_v33 }
 0x17d   : > { %5778 = vst [vmem:[#allocation73_spill] sm:$0xff] %v5034_v39  ;;  %v1701_v57 = vpack.c.bf16 %v1656_v0, %v1656_v0  ;;  %2994 = vmatpush.bf16.msra.mxu1 %v3484_v62  ;;  %v1885_v50 = vpack.c.bf16 %v1869_v54, %v1869_v54  ;;  %v1934_v36 = vunpack.c.l.bf16 %v1665_v5  ;;  %v5781_v0 = vrot.slane %v4515_v46, 4 }
 0x17e   : > { %5779 = vst [vmem:[#allocation74_spill] sm:$0xff] %v5036_v2  ;;  %v5057_v53 = vunpack.c.l.bf16 %v1689_v40  ;;  %v1844_v60 = vadd.f32 %v1828_v47, %v4804_v3  ;;  %v1886_v61 = vpack.c.bf16 %v1870_v30, %v1870_v30  ;;  %v5780_v2 = vrot.slane %v4806_v59, 4 }
 0x17f   : > { %v5059_v45 = vunpack.c.l.bf16 %v1701_v57  ;;  %v1901_v52 = vunpack.c.l.bf16 %v1885_v50  ;;  %v1945_v40 = vmul.f32 %v4345_v13, %v1934_v36  ;;  %v2119_v5 = vmul.f32 %v4358_v22, %v4768_v21 }
 0x180   : > { %3555 = vmatpush.bf16.msra.mxu2 %v3484_v62  ;;  %v2042_v26 = vsel %vm2039_vm4, %v5781_v0, %v5780_v2  ;;  %v2217_v54 = vrot.slane %v2168_v55, 4  ;;  %v1902_v62 = vunpack.c.l.bf16 %v1886_v61  ;;  %v2292_v3 = vmul.f32 %v4406_v58, %v4599_v41 }
 0x181   : > { %v2306_v57 = vmul.f32 %v4406_v58, %v5059_v45  ;;  %v2293_v46 = vmul.f32 %v4406_v58, %v4837_v33  ;;  %v1917_v47 = vadd.f32 %v1901_v52, %v1843_v11  ;;  %v1969_v2 = vpack.c.bf16 %v1945_v40, %v1945_v40 }
 0x182   : > { %v2143_v30 = vpack.c.bf16 %v2119_v5, %v2119_v5  ;;  %v2294_v50 = vmul.f32 %v4406_v58, %v5057_v53  ;;  %v1918_v39 = vadd.f32 %v1902_v62, %v1844_v60  ;;  %v2316_v20 = vpack.c.bf16 %v2292_v3, %v2292_v3 }
 0x183   : > { %v2330_v0 = vpack.c.bf16 %v2306_v57, %v2306_v57  ;;  %v2317_v55 = vpack.c.bf16 %v2293_v46, %v2293_v46  ;;  %3428 = vmatmul.msk.bf16.gmra.mxu0 %vm2817_vm3, %v3478_v12  ;;  %v1993_v51 = vunpack.c.l.bf16 %v1969_v2  ;;  %v2096_v61 = vadd.f32 %v2042_v26, %v1917_v47  ;;  %v1712_v12 = vld [vmem:[%s5714_s24 + $0x4] sm:$0x1] }
 0x184   : > { %v2167_v8 = vunpack.c.l.bf16 %v2143_v30  ;;  %v2318_v23 = vpack.c.bf16 %v2294_v50, %v2294_v50  ;;  %v2340_v44 = vunpack.c.l.bf16 %v2316_v20  ;;  %v2460_v52 = vperm.slane %v4311_v34, 1 }
 0x185   : > { %v5080_v63 = vunpack.c.l.bf16 %v2330_v0  ;;  %v2341_v48 = vunpack.c.l.bf16 %v2317_v55  ;;  %v2043_v11 = vrot.slane %v1993_v51, 4  ;;  %v2526_v57 = vperm.slane %v4313_v35, 2 }
 0x186   : > { %v2215_v40 = vrot.slane %v2167_v8, 4  ;;  %v2342_v5 = vunpack.c.l.bf16 %v2318_v23  ;;  %v2388_v26 = vrot.slane %v2340_v44, 4  ;;  %v5088_v3 = vunpack.c.l.bf16 %v2460_v52 }
 0x187   : > { %v2411_v60 = vrot.slane %v5080_v63, 4  ;;  %v2389_v62 = vrot.slane %v2341_v48, 4  ;;  %v5782_v20 = vrot.slane %v4806_v59, 4  ;;  %v5783_v34 = vrot.slane %v4535_v24, 4 }
 0x188   : > { %v2218_v35 = vsel %vm2039_vm4, %v2215_v40, %v2217_v54  ;;  %v2391_v23 = vrot.slane %v2342_v5, 4  ;;  %v2462_v44 = vmul.f32 %v5088_v3, %v4775_v32  ;;  %v2463_v59 = vmul.f32 %v5088_v3, %v1934_v36 }
 0x189   : > { %v2044_v46 = vsel %vm2039_vm4, %v5782_v20, %v2043_v11  ;;  %v2216_v8 = vsel %vm2039_vm4, %v5783_v34, %v2215_v40  ;;  %v2390_v2 = vsel %vm2039_vm4, %v2388_v26, %v2389_v62  ;;  %v5102_v30 = vunpack.c.l.bf16 %v2526_v57 }
 0x18a   : > { %v2097_v51 = vadd.f32 %v2044_v46, %v1918_v39  ;;  %v2270_v47 = vadd.f32 %v2216_v8, %v2096_v61  ;;  %v2392_v48 = vsel %vm2039_vm4, %v2389_v62, %v2391_v23  ;;  %v2593_v50 = vpack.i.b16 %v1712_v12, %v1712_v12 }
 0x18b   : > { %v2478_v55 = vpack.c.bf16 %v2462_v44, %v2462_v44  ;;  %v1743_v54 = vmul.f32 %v4338_v6, %v4768_v21  ;;  %v2479_v39 = vpack.c.bf16 %v2463_v59, %v2463_v59  ;;  %v2528_v61 = vmul.f32 %v5102_v30, %v4768_v21 }
 0x18c   : > { %v2271_v24 = vadd.f32 %v2218_v35, %v2097_v51  ;;  %v2444_v0 = vadd.f32 %v2390_v2, %v2270_v47  ;;  %v2529_v32 = vmul.f32 %v5102_v30, %v4993_v25  ;;  %v2595_v52 = vperm.slane %v2593_v50, 0  ;;  %v3479_v35 = vld [vmem:[%s4191_s26 + $0x18] sm:$0xff] }
 0x18d   : > { %v2494_v36 = vunpack.c.l.bf16 %v2478_v55  ;;  %v1759_v40 = vpack.c.bf16 %v1743_v54, %v1743_v54  ;;  %v1804_v5 = vmul.f32 %v4340_v7, %v4837_v33  ;;  %v2495_v57 = vunpack.c.l.bf16 %v2479_v39  ;;  %v3481_v39 = vld [vmem:[%s4191_s26 + $0x28] sm:$0xff] }
 0x18e   : > { %v2445_v11 = vadd.f32 %v2392_v48, %v2271_v24  ;;  %v2544_v12 = vpack.c.bf16 %v2528_v61, %v2528_v61  ;;  %v2545_v26 = vpack.c.bf16 %v2529_v32, %v2529_v32  ;;  %v5112_v62 = vunpack.c.l.bf16 %v2595_v52  ;;  %3431 = vmatmul.msk.bf16.vlgmr.msrb.gmra.mxu3 %vm2817_vm3, %v3481_v39 }
 0x18f   : > { %v2510_v20 = vadd.f32 %v2494_v36, %v2444_v0  ;;  %v1775_v46 = vunpack.c.l.bf16 %v1759_v40  ;;  %v1820_v34 = vpack.c.bf16 %v1804_v5, %v1804_v5  ;;  %v1956_v8 = vmul.f32 %v4345_v13, %v4768_v21 }
 0x190   : > { %v2511_v23 = vadd.f32 %v2495_v57, %v2445_v11  ;;  %v2560_v51 = vunpack.c.l.bf16 %v2544_v12  ;;  %v2561_v47 = vunpack.c.l.bf16 %v2545_v26  ;;  %v2597_v2 = vmul.f32 %v5112_v62, %v4837_v33 }
 0x191   : > { %v2598_v44 = vmul.f32 %v5112_v62, %v5057_v53  ;;  %v1836_v48 = vunpack.c.l.bf16 %v1820_v34  ;;  %v1980_v59 = vpack.c.bf16 %v1956_v8, %v1956_v8  ;;  %v2130_v50 = vmul.f32 %v4358_v22, %v4599_v41 }
 0x192   : > { %v2576_v24 = vadd.f32 %v2560_v51, %v2510_v20  ;;  %v2577_v0 = vadd.f32 %v2561_v47, %v2511_v23  ;;  %v2613_v55 = vpack.c.bf16 %v2597_v2, %v2597_v2  ;;  %v2131_v54 = vmul.f32 %v4358_v22, %v4837_v33 }
 0x193   : > { %v2614_v61 = vpack.c.bf16 %v2598_v44, %v2598_v44  ;;  %v1852_v32 = vadd.f32 %v1836_v48, %v1775_v46  ;;  %v2004_v52 = vunpack.c.l.bf16 %v1980_v59  ;;  %v2132_v11 = vmul.f32 %v4358_v22, %v5057_v53  ;;  %3429 = vmatmul.msk.bf16.gmra.mxu0 %vm2817_vm3, %v3479_v35  ;;  %v5139_v35 = vld [vmem:[%s5786_s25] ss:$0 sm:$0xff] }
 0x194   : > { %v2629_v36 = vunpack.c.l.bf16 %v2613_v55  ;;  %v2154_v40 = vpack.c.bf16 %v2130_v50, %v2130_v50  ;;  %v2155_v5 = vpack.c.bf16 %v2131_v54, %v2131_v54  ;;  %v5784_v41 = vrot.slane %v4875_v17, 4 }
 0x195   : > { %v5785_v57 = vrot.slane %v4615_v4, 4  ;;  %v2630_v26 = vunpack.c.l.bf16 %v2614_v61  ;;  %v1926_v20 = vadd.f32 %v4873_v29, %v1852_v32  ;;  %v2061_v46 = vrot.slane %v2004_v52, 4 }
 0x196   : > { %v2156_v34 = vpack.c.bf16 %v2132_v11, %v2132_v11  ;;  %v2645_v8 = vadd.f32 %v2629_v36, %v2576_v24  ;;  %v2178_v23 = vunpack.c.l.bf16 %v2154_v40  ;;  %v2179_v51 = vunpack.c.l.bf16 %v2155_v5 }
 0x197   : > { %v2410_v12 = vsel %vm2039_vm4, %v5785_v57, %v5784_v41  ;;  %v5787_v4 = vmov %v5784_v41  ;;  %v2646_v2 = vadd.f32 %v2630_v26, %v2577_v0  ;;  %v5788_v44 = vrot.slane %v4522_v49, 4 }
 0x198   : > { %v2412_v47 = vsel %vm2039_vm4, %v5787_v4, %v2411_v60  ;;  %v5789_v48 = vrot.slane %v5042_v18, 4  ;;  %v2180_v50 = vunpack.c.l.bf16 %v2156_v34  ;;  %v2665_v24 = vadd.f32 %v5139_v35, %v2645_v8 }
 0x199   : > { %v2062_v29 = vsel %vm2039_vm4, %v5788_v44, %v2061_v46  ;;  %v2234_v63 = vrot.slane %v2178_v23, 4  ;;  %v2666_v17 = vadd.f32 %v5139_v35, %v2646_v2  ;;  %v2235_v39 = vrot.slane %v2179_v51, 4 }
 0x19a   : > { %v2064_v59 = vsel %vm2039_vm4, %v2061_v46, %v5789_v48  ;;  %v2104_v55 = vadd.f32 %v2062_v29, %v4639_v28  ;;  %v2237_v60 = vrot.slane %v2180_v50, 4  ;;  %v2470_v49 = vmul.f32 %v5088_v3, %v4768_v21  ;;  %v3480_v48 = vld [vmem:[%s4191_s26 + $0x20] sm:$0xff] }
 0x19b   : > { %v2105_v54 = vadd.f32 %v2064_v59, %v1926_v20  ;;  %v2681_v0 = vmax.f32 %v2665_v24, 0.0  ;;  %v2471_v18 = vmul.f32 %v5088_v3, %v4993_v25  ;;  %v2536_v61 = vmul.f32 %v5102_v30, %v4837_v33 }
 0x19c   : > { %v2537_v32 = vmul.f32 %v5102_v30, %v5057_v53  ;;  %v2682_v28 = vmax.f32 %v2666_v17, 0.0  ;;  %v2236_v52 = vsel %vm2039_vm4, %v2234_v63, %v2235_v39  ;;  %v2238_v11 = vsel %vm2039_vm4, %v2235_v39, %v2237_v60 }
 0x19d   : > { %v2486_v36 = vpack.c.bf16 %v2470_v49, %v2470_v49  ;;  %v2697_v40 = vpack.c.bf16 %v2681_v0, %v2681_v0  ;;  %v2278_v5 = vadd.f32 %v2236_v52, %v2104_v55  ;;  %v2279_v41 = vadd.f32 %v2238_v11, %v2105_v54 }
 0x19e   : > { %v2487_v21 = vpack.c.bf16 %v2471_v18, %v2471_v18  ;;  %v2698_v57 = vpack.c.bf16 %v2682_v28, %v2682_v28  ;;  %v2552_v25 = vpack.c.bf16 %v2536_v61, %v2536_v61  ;;  %v2553_v20 = vpack.c.bf16 %v2537_v32, %v2537_v32  ;;  %v5794_v32 = vld [vmem:[#allocation55_spill] sm:$0xff] }
 0x19f   : > { %v2502_v26 = vunpack.c.l.bf16 %v2486_v36  ;;  %v2907_v46 = vunpack.c.l.b16 %v2697_v40  ;;  %v2452_v33 = vadd.f32 %v2410_v12, %v2278_v5  ;;  %v2453_v34 = vadd.f32 %v2412_v47, %v2279_v41 }
 0x1a0   : > { %v2503_v8 = vunpack.c.l.bf16 %v2487_v21  ;;  %v2908_v53 = vunpack.c.l.b16 %v2698_v57  ;;  %v2568_v23 = vunpack.c.l.bf16 %v2552_v25  ;;  %v2569_v51 = vunpack.c.l.bf16 %v2553_v20 }
 0x1a1   : > { %v2605_v4 = vmul.f32 %v5112_v62, %v4844_v10  ;;  %v2518_v2 = vadd.f32 %v2502_v26, %v2452_v33  ;;  %v2606_v29 = vmul.f32 %v5112_v62, %v5059_v45  ;;  %v5790_v59 = vrot.slane %v4672_v1, 4 }
 0x1a2   : > { %v2519_v44 = vadd.f32 %v2503_v8, %v2453_v34  ;;  %v2923_v12 = vpack.c.b16 %v2908_v53, %v2907_v46  ;;  %v5791_v24 = vrot.slane %v4892_v9, 4  ;;  %v5792_v10 = vrot.slane %v4934_v43, 4 }
 0x1a3   : > { %v1202_v50 = vsel %vm991_vm2, %v4730_v37, %v5790_v59  ;;  %v2621_v47 = vpack.c.bf16 %v2605_v4, %v2605_v4  ;;  %v2584_v63 = vadd.f32 %v2568_v23, %v2518_v2  ;;  %v2622_v17 = vpack.c.bf16 %v2606_v29, %v2606_v29  ;;  %3430 = vmatmul.msk.bf16.gmra.mxu0 %vm2817_vm3, %v3480_v48  ;;  %v5795_v4 = vld [vmem:[#allocation30_spill] sm:$0xff] }
 0x1a4   : > { %v1314_v55 = vsel %vm991_vm2, %v4963_v16, %v5791_v24  ;;  %v1650_v54 = vsel %vm991_vm2, %v5019_v14, %v5792_v10  ;;  %v2585_v45 = vadd.f32 %v2569_v51, %v2519_v44  ;;  %v1667_v39 = vpack.c.bf16 %v1202_v50, %v1202_v50  ;;  %2995 = vmatmul.bf16.vlgmr.msra.gmra.mxu1 %v2923_v12 }
 0x1a5   : > { %v2637_v1 = vunpack.c.l.bf16 %v2621_v47  ;;  %v1668_v60 = vpack.c.bf16 %v1314_v55, %v1314_v55  ;;  %v1692_v37 = vpack.c.bf16 %v1650_v54, %v1650_v54  ;;  %v5793_v49 = vpack.c.bf16 %v4455_v31, %v4455_v31 }
 0x1a6   : > { %v2638_v0 = vunpack.c.l.bf16 %v2622_v17  ;;  %v5186_v16 = vunpack.c.l.bf16 %v1667_v39  ;;  %v1798_v43 = vmul.f32 %v4340_v7, %v4753_v15  ;;  %v1813_v14 = vpack.c.bf16 %v4479_v38, %v4479_v38 }
 0x1a7   : > { %v1768_v9 = vunpack.c.l.bf16 %v5793_v49  ;;  %v2653_v18 = vadd.f32 %v2637_v1, %v2584_v63  ;;  %v1871_v61 = vmul.f32 %v4429_v27, %v4592_v56  ;;  %v1872_v28 = vmul.f32 %v4429_v27, %v5794_v32  ;;  %v5797_v63 = vld [vmem:[#allocation23_spill] sm:$0xff] }
 0x1a8   : > { %v1935_v31 = vunpack.c.l.bf16 %v1668_v60  ;;  %v2654_v52 = vadd.f32 %v2638_v0, %v2585_v45  ;;  %v1737_v11 = vmul.f32 %v4338_v6, %v5186_v16  ;;  %v1814_v36 = vpack.c.bf16 %v1798_v43, %v1798_v43 }
 0x1a9   : > { %v1829_v40 = vunpack.c.l.bf16 %v1813_v14  ;;  %v2673_v5 = vadd.f32 %v5139_v35, %v2653_v18  ;;  %v1887_v41 = vpack.c.bf16 %v1871_v61, %v1871_v61  ;;  %v1888_v21 = vpack.c.bf16 %v1872_v28, %v1872_v28 }
 0x1aa   : > { %v1947_v38 = vmul.f32 %v4345_v13, %v5186_v16  ;;  %v2674_v57 = vadd.f32 %v5139_v35, %v2654_v52  ;;  %v1753_v26 = vpack.c.bf16 %v1737_v11, %v1737_v11  ;;  %v1830_v25 = vunpack.c.l.bf16 %v1814_v36 }
 0x1ab   : > { %v1845_v20 = vadd.f32 %v1829_v40, %v1768_v9  ;;  %v2689_v46 = vmax.f32 %v2673_v5, 0.0  ;;  %v1903_v33 = vunpack.c.l.bf16 %v1887_v41  ;;  %v1904_v34 = vunpack.c.l.bf16 %v1888_v21 }
 0x1ac   : > { %v1948_v8 = vmul.f32 %v4345_v13, %v1935_v31  ;;  %v2690_v53 = vmax.f32 %v2674_v57, 0.0  ;;  %v1769_v23 = vunpack.c.l.bf16 %v1753_v26  ;;  %v1971_v51 = vpack.c.bf16 %v1947_v38, %v1947_v38 }
 0x1ad   : > { %v5796_v2 = vpack.c.bf16 %v5795_v4, %v5795_v4  ;;  %v2705_v29 = vpack.c.bf16 %v2689_v46, %v2689_v46  ;;  %v1919_v48 = vadd.f32 %v1903_v33, %v1845_v20  ;;  %v5206_v50 = vunpack.c.l.bf16 %v1692_v37 }
 0x1ae   : > { %v1972_v59 = vpack.c.bf16 %v1948_v8, %v1948_v8  ;;  %v2706_v12 = vpack.c.bf16 %v2690_v53, %v2690_v53  ;;  %v1846_v47 = vadd.f32 %v1830_v25, %v1769_v23  ;;  %v1995_v24 = vunpack.c.l.bf16 %v1971_v51 }
 0x1af   : > { %v1994_v44 = vunpack.c.l.bf16 %v5796_v2  ;;  %v2915_v10 = vunpack.c.l.b16 %v2705_v29  ;;  %v2121_v45 = vmul.f32 %v4358_v22, %v5797_v63  ;;  %v2122_v17 = vmul.f32 %v4358_v22, %v4753_v15 }
 0x1b0   : > { %v1996_v54 = vunpack.c.l.bf16 %v1972_v59  ;;  %v2916_v39 = vunpack.c.l.b16 %v2706_v12  ;;  %v1920_v1 = vadd.f32 %v1904_v34, %v1846_v47  ;;  %v2046_v60 = vrot.slane %v1995_v24, 4 }
 0x1b1   : > { %v2045_v55 = vrot.slane %v1994_v44, 4  ;;  %v2123_v49 = vmul.f32 %v4358_v22, %v4985_v42  ;;  %v2145_v9 = vpack.c.bf16 %v2121_v45, %v2121_v45  ;;  %v2146_v0 = vpack.c.bf16 %v2122_v17, %v2122_v17 }
 0x1b2   : > { %v2048_v37 = vrot.slane %v1996_v54, 4  ;;  %v2295_v43 = vmul.f32 %v4406_v58, %v4592_v56  ;;  %v2927_v14 = vpack.c.b16 %v2916_v39, %v2915_v10  ;;  %v2296_v28 = vmul.f32 %v4406_v58, %v5794_v32  ;;  %v5799_v39 = vld [vmem:[#allocation71_spill] sm:$0xff] }
 0x1b3   : > { %v2047_v18 = vsel %vm2039_vm4, %v2045_v55, %v2046_v60  ;;  %v2147_v61 = vpack.c.bf16 %v2123_v49, %v2123_v49  ;;  %v2169_v36 = vunpack.c.l.bf16 %v2145_v9  ;;  %v2170_v40 = vunpack.c.l.bf16 %v2146_v0 }
 0x1b4   : > { %v2049_v52 = vsel %vm2039_vm4, %v2046_v60, %v2048_v37  ;;  %v2098_v11 = vadd.f32 %v2047_v18, %v1919_v48  ;;  %3015 = vmatmul.bf16.vlgmr.msra.gmra.mxu2 %v2927_v14  ;;  %v2297_v21 = vmul.f32 %v4406_v58, %v5206_v50  ;;  %v2319_v38 = vpack.c.bf16 %v2295_v43, %v2295_v43  ;;  %v5800_v18 = vld [vmem:[#allocation53_spill] sm:$0xff] }
 0x1b5   : > { %v2099_v5 = vadd.f32 %v2049_v52, %v1920_v1  ;;  %v2171_v41 = vunpack.c.l.bf16 %v2147_v61  ;;  %v2219_v57 = vrot.slane %v2169_v36, 4  ;;  %v2220_v26 = vrot.slane %v2170_v40, 4 }
 0x1b6   : > { %v2320_v25 = vpack.c.bf16 %v2296_v28, %v2296_v28  ;;  %v2464_v20 = vmul.f32 %v5088_v3, %v5186_v16  ;;  %v2321_v33 = vpack.c.bf16 %v2297_v21, %v2297_v21  ;;  %v2343_v34 = vunpack.c.l.bf16 %v2319_v38 }
 0x1b7   : > { %v2222_v46 = vrot.slane %v2171_v41, 4  ;;  %v2465_v8 = vmul.f32 %v5088_v3, %v1935_v31  ;;  %v2221_v53 = vsel %vm2039_vm4, %v2219_v57, %v2220_v26  ;;  %v2530_v4 = vmul.f32 %v5102_v30, %v4753_v15  ;;  %v5801_v41 = vld [vmem:[#allocation26_spill] sm:$0xff] }
 0x1b8   : > { %v2344_v23 = vunpack.c.l.bf16 %v2320_v25  ;;  %v2480_v51 = vpack.c.bf16 %v2464_v20, %v2464_v20  ;;  %v2272_v44 = vadd.f32 %v2221_v53, %v2098_v11  ;;  %v2345_v29 = vunpack.c.l.bf16 %v2321_v33 }
 0x1b9   : > { %v2223_v2 = vsel %vm2039_vm4, %v2220_v26, %v2222_v46  ;;  %v2393_v48 = vrot.slane %v2343_v34, 4  ;;  %v2481_v16 = vpack.c.bf16 %v2465_v8, %v2465_v8  ;;  %v2531_v31 = vmul.f32 %v5102_v30, %v4985_v42 }
 0x1ba   : > { %v2273_v59 = vadd.f32 %v2223_v2, %v2099_v5  ;;  %v2394_v12 = vrot.slane %v2344_v23, 4  ;;  %v2496_v47 = vunpack.c.l.bf16 %v2480_v51  ;;  %v2396_v24 = vrot.slane %v2345_v29, 4 }
 0x1bb   : > { %v2546_v55 = vpack.c.bf16 %v2530_v4, %v2530_v4  ;;  %v2599_v10 = vmul.f32 %v5112_v62, %v5794_v32  ;;  %v2497_v63 = vunpack.c.l.bf16 %v2481_v16  ;;  %v2600_v45 = vmul.f32 %v5112_v62, %v5206_v50 }
 0x1bc   : > { %v2395_v54 = vsel %vm2039_vm4, %v2393_v48, %v2394_v12  ;;  %v5798_v17 = vrot.slane %v4930_v19, 4  ;;  %v2397_v60 = vsel %vm2039_vm4, %v2394_v12, %v2396_v24  ;;  %v2547_v37 = vpack.c.bf16 %v2531_v31, %v2531_v31 }
 0x1bd   : > { %v2446_v49 = vadd.f32 %v2395_v54, %v2272_v44  ;;  %v2562_v9 = vunpack.c.l.bf16 %v2546_v55  ;;  %v2447_v0 = vadd.f32 %v2397_v60, %v2273_v59  ;;  %v2615_v43 = vpack.c.bf16 %v2599_v10, %v2599_v10  ;;  %v5802_v44 = vld [vmem:[#allocation32_spill] sm:$0xff] }
 0x1be   : > { %v5240_v1 = vsel %vm991_vm2, %v5799_v39, %v5798_v17  ;;  %v2616_v14 = vpack.c.bf16 %v2600_v45, %v2600_v45  ;;  %v1703_v61 = vpack.c.bf16 %v5800_v18, %v5800_v18  ;;  %v2563_v52 = vunpack.c.l.bf16 %v2547_v37 }
 0x1bf   : > { %v2512_v28 = vadd.f32 %v2496_v47, %v2446_v49  ;;  %v1704_v19 = vpack.c.bf16 %v5240_v1, %v5240_v1  ;;  %v1745_v11 = vmul.f32 %v4338_v6, %v4753_v15  ;;  %v2513_v36 = vadd.f32 %v2497_v63, %v2447_v0  ;;  %v5803_v47 = vld [vmem:[#allocation67_spill] sm:$0xff]  ;;  %v5804_v0 = vld [vmem:[#allocation40_spill] sm:$0xff] }
 0x1c0   : > { %v2631_v40 = vunpack.c.l.bf16 %v2615_v43  ;;  %v2632_v5 = vunpack.c.l.bf16 %v2616_v14  ;;  %v1760_v21 = vpack.c.bf16 %v5801_v41, %v5801_v41  ;;  %v1805_v26 = vmul.f32 %v4340_v7, %v4592_v56 }
 0x1c1   : > { %v2578_v38 = vadd.f32 %v2562_v9, %v2512_v28  ;;  %v1761_v57 = vpack.c.bf16 %v1745_v11, %v1745_v11  ;;  %v1806_v25 = vmul.f32 %v4340_v7, %v5794_v32  ;;  %v2579_v20 = vadd.f32 %v2563_v52, %v2513_v36  ;;  %v3482_v36 = vld [vmem:[%s4191_s26 + $0x30] sm:$0xff] }
 0x1c2   : > { %v1776_v46 = vunpack.c.l.bf16 %v1760_v21  ;;  %v5255_v33 = vunpack.c.l.bf16 %v1703_v61  ;;  %v1959_v34 = vmul.f32 %v4345_v13, %v4753_v15  ;;  %v1821_v23 = vpack.c.bf16 %v1805_v26, %v1805_v26  ;;  %3432 = vmatmul.msk.bf16.gmra.mxu3 %vm2817_vm3, %v3482_v36  ;;  %v5810_v36 = vld [vmem:[#allocation64_spill] sm:$0xff] }
 0x1c3   : > { %v2647_v8 = vadd.f32 %v2631_v40, %v2578_v38  ;;  %v1777_v53 = vunpack.c.l.bf16 %v1761_v57  ;;  %v1822_v51 = vpack.c.bf16 %v1806_v25, %v1806_v25  ;;  %v2648_v4 = vadd.f32 %v2632_v5, %v2579_v20 }
 0x1c4   : > { %v1880_v2 = vmul.f32 %v4429_v27, %v5255_v33  ;;  %v1982_v29 = vpack.c.bf16 %v5802_v44, %v5802_v44  ;;  %v1983_v48 = vpack.c.bf16 %v1959_v34, %v1959_v34  ;;  %v1837_v12 = vunpack.c.l.bf16 %v1821_v23  ;;  %v5805_v34 = vld [vmem:[#allocation42_spill] sm:$0xff] }
 0x1c5   : > { %v2667_v59 = vadd.f32 %v5139_v35, %v2647_v8  ;;  %v1838_v16 = vunpack.c.l.bf16 %v1822_v51  ;;  %v1984_v24 = vpack.c.bf16 %v5803_v47, %v5803_v47  ;;  %v2668_v31 = vadd.f32 %v5139_v35, %v2648_v4 }
 0x1c6   : > { %v1896_v55 = vpack.c.bf16 %v1880_v2, %v1880_v2  ;;  %v2006_v10 = vunpack.c.l.bf16 %v1982_v29  ;;  %v2007_v54 = vunpack.c.l.bf16 %v1983_v48  ;;  %v1853_v45 = vadd.f32 %v1837_v12, %v1776_v46 }
 0x1c7   : > { %v2683_v63 = vmax.f32 %v2667_v59, 0.0  ;;  %v1854_v17 = vadd.f32 %v1838_v16, %v1777_v53  ;;  %v2008_v39 = vunpack.c.l.bf16 %v1984_v24  ;;  %v2684_v1 = vmax.f32 %v2668_v31, 0.0 }
 0x1c8   : > { %v1912_v60 = vunpack.c.l.bf16 %v1896_v55  ;;  %v2065_v49 = vrot.slane %v2006_v10, 4  ;;  %v2066_v37 = vrot.slane %v2007_v54, 4  ;;  %v1927_v43 = vadd.f32 %v5804_v0, %v1853_v45 }
 0x1c9   : > { %v2699_v9 = vpack.c.bf16 %v2683_v63, %v2683_v63  ;;  %v2068_v14 = vrot.slane %v2008_v39, 4  ;;  %v2133_v18 = vmul.f32 %v4358_v22, %v4592_v56  ;;  %v2700_v61 = vpack.c.bf16 %v2684_v1, %v2684_v1 }
 0x1ca   : > { %v1928_v28 = vadd.f32 %v1912_v60, %v1854_v17  ;;  %v2067_v52 = vsel %vm2039_vm4, %v2065_v49, %v2066_v37  ;;  %v2134_v11 = vmul.f32 %v4358_v22, %v5794_v32  ;;  %v2135_v21 = vmul.f32 %v4358_v22, %v5206_v50 }
 0x1cb   : > { %v2909_v40 = vunpack.c.l.b16 %v2699_v9  ;;  %v2069_v5 = vsel %vm2039_vm4, %v2066_v37, %v2068_v14  ;;  %v2106_v41 = vadd.f32 %v2067_v52, %v1927_v43  ;;  %v2910_v38 = vunpack.c.l.b16 %v2700_v61  ;;  %v5807_v61 = vld [vmem:[#allocation47_spill] sm:$0xff] }
 0x1cc   : > { %v2107_v57 = vadd.f32 %v2069_v5, %v1928_v28  ;;  %v2157_v26 = vpack.c.bf16 %v2133_v18, %v2133_v18  ;;  %v2158_v25 = vpack.c.bf16 %v2134_v11, %v2134_v11  ;;  %v2159_v56 = vpack.c.bf16 %v2135_v21, %v2135_v21  ;;  %v5806_v18 = vld [vmem:[#allocation46_spill] sm:$0xff]  ;;  %v5809_v11 = vld [vmem:[#allocation61_spill] sm:$0xff] }
 0x1cd   : > { %v2288_v20 = vunpack.c.l.bf16 %v1704_v19  ;;  %v2308_v46 = vmul.f32 %v4406_v58, %v5255_v33  ;;  %v2413_v8 = vrot.slane %v5805_v34, 4  ;;  %v2924_v53 = vpack.c.b16 %v2910_v38, %v2909_v40 }
 0x1ce   : > { %v2181_v23 = vunpack.c.l.bf16 %v2157_v26  ;;  %v2182_v51 = vunpack.c.l.bf16 %v2158_v25  ;;  %v2472_v4 = vmul.f32 %v5088_v3, %v4753_v15  ;;  %v2183_v2 = vunpack.c.l.bf16 %v2159_v56 }
 0x1cf   : > { %v2309_v44 = vmul.f32 %v4406_v58, %v2288_v20  ;;  %v2332_v29 = vpack.c.bf16 %v2308_v46, %v2308_v46  ;;  %v2473_v48 = vmul.f32 %v5088_v3, %v4985_v42  ;;  %3000 = vmatmul.bf16.gmra.mxu1 %v2924_v53  ;;  %v2538_v16 = vmul.f32 %v5102_v30, %v5794_v32 }
 0x1d0   : > { %v2239_v19 = vrot.slane %v2181_v23, 4  ;;  %v2240_v59 = vrot.slane %v2182_v51, 4  ;;  %v2488_v12 = vpack.c.bf16 %v2472_v4, %v2472_v4  ;;  %v2242_v47 = vrot.slane %v2183_v2, 4  ;;  %v5815_v51 = vld [vmem:[#allocation25_spill] sm:$0xff] }
 0x1d1   : > { %v2333_v24 = vpack.c.bf16 %v2309_v44, %v2309_v44  ;;  %v2356_v31 = vunpack.c.l.bf16 %v2332_v29  ;;  %v2489_v55 = vpack.c.bf16 %v2473_v48, %v2473_v48  ;;  %v2539_v54 = vmul.f32 %v5102_v30, %v5206_v50 }
 0x1d2   : > { %v2241_v15 = vsel %vm2039_vm4, %v2239_v19, %v2240_v59  ;;  %v2504_v10 = vunpack.c.l.bf16 %v2488_v12  ;;  %v2554_v63 = vpack.c.bf16 %v2538_v16, %v2538_v16  ;;  %v2243_v42 = vsel %vm2039_vm4, %v2240_v59, %v2242_v47  ;;  %v5817_v19 = vld [vmem:[#allocation50_spill] sm:$0xff]  ;;  %v5818_v12 = vld [vmem:[#allocation29_spill] sm:$0xff]  ;;  %v5819_v47 = vld [vmem:[#allocation39_spill] sm:$0xff] }
 0x1d3   : > { %v2280_v45 = vadd.f32 %v2241_v15, %v2106_v41  ;;  %v2357_v17 = vunpack.c.l.bf16 %v2333_v24  ;;  %v2414_v39 = vrot.slane %v2356_v31, 4  ;;  %v2281_v1 = vadd.f32 %v2243_v42, %v2107_v57  ;;  %v5812_v57 = vld [vmem:[#allocation62_spill] sm:$0xff]  ;;  %v5820_v31 = vld [vmem:[#allocation56_spill] sm:$0xff] }
 0x1d4   : > { %v2505_v60 = vunpack.c.l.bf16 %v2489_v55  ;;  %v2555_v49 = vpack.c.bf16 %v2539_v54, %v2539_v54  ;;  %v2570_v32 = vunpack.c.l.bf16 %v2554_v63  ;;  %v2607_v0 = vmul.f32 %v5112_v62, %v5255_v33  ;;  %v5813_v33 = vld [vmem:[#allocation69_spill] sm:$0xff] }
 0x1d5   : > { %v2415_v37 = vsel %vm2039_vm4, %v2413_v8, %v2414_v39  ;;  %v2416_v9 = vrot.slane %v2357_v17, 4  ;;  %v2608_v43 = vmul.f32 %v5112_v62, %v2288_v20  ;;  %v5808_v28 = vrot.slane %v5807_v61, 4 }
 0x1d6   : > { %v2454_v14 = vadd.f32 %v2415_v37, %v2280_v45  ;;  %v2571_v50 = vunpack.c.l.bf16 %v2555_v49  ;;  %v5811_v40 = vrot.slane %v5810_v36, 4  ;;  %v2623_v21 = vpack.c.bf16 %v2607_v0, %v2607_v0 }
 0x1d7   : > { %v1204_v52 = vsel %vm991_vm2, %v5808_v28, %v5806_v18  ;;  %v2417_v41 = vsel %vm2039_vm4, %v2414_v39, %v2416_v9  ;;  %v2624_v38 = vpack.c.bf16 %v2608_v43, %v2608_v43  ;;  %v5814_v26 = vrot.slane %v5813_v33, 4 }
 0x1d8   : > { %v1316_v5 = vsel %vm991_vm2, %v5811_v40, %v5809_v11  ;;  %v2455_v56 = vadd.f32 %v2417_v41, %v2281_v1  ;;  %v2520_v20 = vadd.f32 %v2504_v10, %v2454_v14  ;;  %v1670_v46 = vpack.c.bf16 %v1204_v52, %v1204_v52 }
 0x1d9   : > { %v1652_v25 = vsel %vm991_vm2, %v5814_v26, %v5812_v57  ;;  %v1671_v34 = vpack.c.bf16 %v1316_v5, %v1316_v5  ;;  %v2639_v8 = vunpack.c.l.bf16 %v2623_v21  ;;  %v2640_v53 = vunpack.c.l.bf16 %v2624_v38  ;;  %v5821_v5 = vld [vmem:[#allocation31_spill] sm:$0xff] }
 0x1da   : > { %v1695_v23 = vpack.c.bf16 %v1652_v25, %v1652_v25  ;;  %v5816_v4 = vpack.c.bf16 %v5815_v51, %v5815_v51  ;;  %v2521_v44 = vadd.f32 %v2505_v60, %v2455_v56  ;;  %v2586_v29 = vadd.f32 %v2570_v32, %v2520_v20 }
 0x1db   : > { %v5312_v48 = vunpack.c.l.bf16 %v1670_v46  ;;  %v1800_v59 = vmul.f32 %v4340_v7, %v5817_v19  ;;  %v1815_v16 = vpack.c.bf16 %v5818_v12, %v5818_v12  ;;  %v1873_v24 = vmul.f32 %v4429_v27, %v5819_v47  ;;  %v5823_v46 = vld [vmem:[#allocation24_spill] sm:$0xff] }
 0x1dc   : > { %v1770_v2 = vunpack.c.l.bf16 %v5816_v4  ;;  %v1874_v55 = vmul.f32 %v4429_v27, %v5820_v31  ;;  %v1936_v15 = vunpack.c.l.bf16 %v1671_v34  ;;  %v2587_v10 = vadd.f32 %v2571_v50, %v2521_v44 }
 0x1dd   : > { %v2655_v54 = vadd.f32 %v2639_v8, %v2586_v29  ;;  %v1739_v63 = vmul.f32 %v4338_v6, %v5312_v48  ;;  %v1816_v42 = vpack.c.bf16 %v1800_v59, %v1800_v59  ;;  %v1831_v45 = vunpack.c.l.bf16 %v1815_v16  ;;  %v5824_v29 = vld [vmem:[#allocation65_spill] sm:$0xff] }
 0x1de   : > { %v1889_v17 = vpack.c.bf16 %v1873_v24, %v1873_v24  ;;  %v1890_v39 = vpack.c.bf16 %v1874_v55, %v1874_v55  ;;  %v1950_v1 = vmul.f32 %v4345_v13, %v5312_v48  ;;  %v2656_v60 = vadd.f32 %v2640_v53, %v2587_v10 }
 0x1df   : > { %v2675_v49 = vadd.f32 %v5139_v35, %v2655_v54  ;;  %v1755_v32 = vpack.c.bf16 %v1739_v63, %v1739_v63  ;;  %v1832_v37 = vunpack.c.l.bf16 %v1816_v42  ;;  %v1847_v9 = vadd.f32 %v1831_v45, %v1770_v2 }
 0x1e0   : > { %v1905_v0 = vunpack.c.l.bf16 %v1889_v17  ;;  %v1906_v43 = vunpack.c.l.bf16 %v1890_v39  ;;  %v1951_v14 = vmul.f32 %v4345_v13, %v1936_v15  ;;  %v2676_v50 = vadd.f32 %v5139_v35, %v2656_v60 }
 0x1e1   : > { %v2691_v18 = vmax.f32 %v2675_v49, 0.0  ;;  %v1771_v61 = vunpack.c.l.bf16 %v1755_v32  ;;  %v1974_v28 = vpack.c.bf16 %v1950_v1, %v1950_v1  ;;  %v5822_v41 = vpack.c.bf16 %v5821_v5, %v5821_v5 }
 0x1e2   : > { %v1921_v52 = vadd.f32 %v1905_v0, %v1847_v9  ;;  %v1975_v40 = vpack.c.bf16 %v1951_v14, %v1951_v14  ;;  %v5332_v38 = vunpack.c.l.bf16 %v1695_v23  ;;  %v2692_v57 = vmax.f32 %v2676_v50, 0.0 }
 0x1e3   : > { %v1997_v21 = vunpack.c.l.bf16 %v5822_v41  ;;  %v2707_v33 = vpack.c.bf16 %v2691_v18, %v2691_v18  ;;  %v1848_v26 = vadd.f32 %v1832_v37, %v1771_v61  ;;  %v1998_v25 = vunpack.c.l.bf16 %v1974_v28 }
 0x1e4   : > { %v1999_v56 = vunpack.c.l.bf16 %v1975_v40  ;;  %v2124_v34 = vmul.f32 %v4358_v22, %v5823_v46  ;;  %v2125_v8 = vmul.f32 %v4358_v22, %v5817_v19  ;;  %v2708_v53 = vpack.c.bf16 %v2692_v57, %v2692_v57 }
 0x1e5   : > { %v2050_v20 = vrot.slane %v1997_v21, 4  ;;  %v2917_v51 = vunpack.c.l.b16 %v2707_v33  ;;  %v1922_v4 = vadd.f32 %v1906_v43, %v1848_v26  ;;  %v2051_v2 = vrot.slane %v1998_v25, 4 }
 0x1e6   : > { %v2053_v44 = vrot.slane %v1999_v56, 4  ;;  %v2126_v23 = vmul.f32 %v4358_v22, %v5824_v29  ;;  %v2148_v59 = vpack.c.bf16 %v2124_v34, %v2124_v34  ;;  %v2149_v12 = vpack.c.bf16 %v2125_v8, %v2125_v8 }
 0x1e7   : > { %v2918_v16 = vunpack.c.l.b16 %v2708_v53  ;;  %v2052_v24 = vsel %vm2039_vm4, %v2050_v20, %v2051_v2  ;;  %v2298_v55 = vmul.f32 %v4406_v58, %v5819_v47  ;;  %v2299_v10 = vmul.f32 %v4406_v58, %v5820_v31 }
 0x1e8   : > { %v2054_v54 = vsel %vm2039_vm4, %v2051_v2, %v2053_v44  ;;  %v2100_v63 = vadd.f32 %v2052_v24, %v1921_v52  ;;  %v2150_v42 = vpack.c.bf16 %v2126_v23, %v2126_v23  ;;  %v2172_v45 = vunpack.c.l.bf16 %v2148_v59  ;;  %v5825_v44 = vld [vmem:[#allocation63_spill] sm:$0xff]  ;;  %v5826_v23 = vld [vmem:[#allocation72_spill] sm:$0xff] }
 0x1e9   : > { %v2928_v17 = vpack.c.b16 %v2918_v16, %v2917_v51  ;;  %v2101_v39 = vadd.f32 %v2054_v54, %v1922_v4  ;;  %v2173_v1 = vunpack.c.l.bf16 %v2149_v12  ;;  %v2300_v60 = vmul.f32 %v4406_v58, %v5332_v38 }
 0x1ea   : > { %v2174_v49 = vunpack.c.l.bf16 %v2150_v42  ;;  %v2224_v32 = vrot.slane %v2172_v45, 4  ;;  %v2322_v37 = vpack.c.bf16 %v2298_v55, %v2298_v55  ;;  %v2323_v9 = vpack.c.bf16 %v2299_v10, %v2299_v10  ;;  %v5828_v42 = vld [vmem:[#allocation54_spill] sm:$0xff] }
 0x1eb   : > { %3020 = vmatmul.bf16.gmra.mxu2 %v2928_v17  ;;  %v2225_v0 = vrot.slane %v2173_v1, 4  ;;  %v2324_v43 = vpack.c.bf16 %v2300_v60, %v2300_v60  ;;  %v2466_v14 = vmul.f32 %v5088_v3, %v5312_v48  ;;  %v2467_v50 = vmul.f32 %v5088_v3, %v1936_v15 }
 0x1ec   : > { %v2227_v18 = vrot.slane %v2174_v49, 4  ;;  %v2346_v61 = vunpack.c.l.bf16 %v2322_v37  ;;  %v2347_v28 = vunpack.c.l.bf16 %v2323_v9  ;;  %v2532_v52 = vmul.f32 %v5102_v30, %v5817_v19  ;;  %v5829_v9 = vld [vmem:[#allocation27_spill] sm:$0xff] }
 0x1ed   : > { %v2226_v40 = vsel %vm2039_vm4, %v2224_v32, %v2225_v0  ;;  %v2348_v5 = vunpack.c.l.bf16 %v2324_v43  ;;  %v2482_v41 = vpack.c.bf16 %v2466_v14, %v2466_v14  ;;  %v2483_v21 = vpack.c.bf16 %v2467_v50, %v2467_v50 }
 0x1ee   : > { %v2228_v57 = vsel %vm2039_vm4, %v2225_v0, %v2227_v18  ;;  %v2274_v33 = vadd.f32 %v2226_v40, %v2100_v63  ;;  %v2398_v26 = vrot.slane %v2346_v61, 4  ;;  %v2399_v25 = vrot.slane %v2347_v28, 4 }
 0x1ef   : > { %v2275_v56 = vadd.f32 %v2228_v57, %v2101_v39  ;;  %v2401_v48 = vrot.slane %v2348_v5, 4  ;;  %v2498_v20 = vunpack.c.l.bf16 %v2482_v41  ;;  %v2499_v15 = vunpack.c.l.bf16 %v2483_v21 }
 0x1f0   : > { %v2400_v46 = vsel %vm2039_vm4, %v2398_v26, %v2399_v25  ;;  %v2533_v34 = vmul.f32 %v5102_v30, %v5824_v29  ;;  %v2548_v8 = vpack.c.bf16 %v2532_v52, %v2532_v52  ;;  %v2601_v53 = vmul.f32 %v5112_v62, %v5820_v31 }
 0x1f1   : > { %v2402_v51 = vsel %vm2039_vm4, %v2399_v25, %v2401_v48  ;;  %v2448_v4 = vadd.f32 %v2400_v46, %v2274_v33  ;;  %v2602_v2 = vmul.f32 %v5112_v62, %v5332_v38  ;;  %v5827_v59 = vrot.slane %v5826_v23, 4 }
 0x1f2   : > { %v2449_v16 = vadd.f32 %v2402_v51, %v2275_v56  ;;  %v2549_v24 = vpack.c.bf16 %v2533_v34, %v2533_v34  ;;  %v2564_v55 = vunpack.c.l.bf16 %v2548_v8  ;;  %v2617_v10 = vpack.c.bf16 %v2601_v53, %v2601_v53  ;;  %v5830_v56 = vld [vmem:[#allocation33_spill] sm:$0xff]  ;;  %v5831_v8 = vld [vmem:[#allocation68_spill] sm:$0xff] }
 0x1f3   : > { %v5367_v12 = vsel %vm991_vm2, %v5827_v59, %v5825_v44  ;;  %v2514_v54 = vadd.f32 %v2498_v20, %v2448_v4  ;;  %v2618_v63 = vpack.c.bf16 %v2602_v2, %v2602_v2  ;;  %v1706_v45 = vpack.c.bf16 %v5828_v42, %v5828_v42 }
 0x1f4   : > { %v1707_v17 = vpack.c.bf16 %v5367_v12, %v5367_v12  ;;  %v2515_v39 = vadd.f32 %v2499_v15, %v2449_v16  ;;  %v2565_v1 = vunpack.c.l.bf16 %v2549_v24  ;;  %v2633_v60 = vunpack.c.l.bf16 %v2617_v10 }
 0x1f5   : > { %v1747_v49 = vmul.f32 %v4338_v6, %v5817_v19  ;;  %v2580_v32 = vadd.f32 %v2564_v55, %v2514_v54  ;;  %v2634_v37 = vunpack.c.l.bf16 %v2618_v63  ;;  %v1762_v0 = vpack.c.bf16 %v5829_v9, %v5829_v9  ;;  %v5832_v54 = vld [vmem:[#allocation41_spill] sm:$0xff] }
 0x1f6   : > { %v1807_v43 = vmul.f32 %v4340_v7, %v5819_v47  ;;  %v2581_v14 = vadd.f32 %v2565_v1, %v2515_v39  ;;  %v1808_v18 = vmul.f32 %v4340_v7, %v5820_v31  ;;  %v5381_v61 = vunpack.c.l.bf16 %v1706_v45 }
 0x1f7   : > { %v1763_v50 = vpack.c.bf16 %v1747_v49, %v1747_v49  ;;  %v2649_v28 = vadd.f32 %v2633_v60, %v2580_v32  ;;  %v1778_v52 = vunpack.c.l.bf16 %v1762_v0  ;;  %v1962_v5 = vmul.f32 %v4345_v13, %v5817_v19  ;;  %v3483_v32 = vld [vmem:[%s4191_s26 + $0x38] sm:$0xff] }
 0x1f8   : > { %v1823_v40 = vpack.c.bf16 %v1807_v43, %v1807_v43  ;;  %v2650_v41 = vadd.f32 %v2634_v37, %v2581_v14  ;;  %v1824_v57 = vpack.c.bf16 %v1808_v18, %v1808_v18  ;;  %v1882_v33 = vmul.f32 %v4429_v27, %v5381_v61  ;;  %3433 = vmatmul.msk.bf16.gmra.mxu3 %vm2817_vm3, %v3483_v32 }
 0x1f9   : > { %v1779_v21 = vunpack.c.l.bf16 %v1763_v50  ;;  %v2669_v26 = vadd.f32 %v5139_v35, %v2649_v28  ;;  %v1985_v48 = vpack.c.bf16 %v5830_v56, %v5830_v56  ;;  %v1986_v20 = vpack.c.bf16 %v1962_v5, %v1962_v5 }
 0x1fa   : > { %v1839_v25 = vunpack.c.l.bf16 %v1823_v40  ;;  %v2670_v15 = vadd.f32 %v5139_v35, %v2650_v41  ;;  %v1840_v46 = vunpack.c.l.bf16 %v1824_v57  ;;  %v1898_v34 = vpack.c.bf16 %v1882_v33, %v1882_v33  ;;  %v5833_v33 = vld [vmem:[#allocation44_spill] sm:$0xff] }
 0x1fb   : > { %v1987_v53 = vpack.c.bf16 %v5831_v8, %v5831_v8  ;;  %v2685_v51 = vmax.f32 %v2669_v26, 0.0  ;;  %v2009_v2 = vunpack.c.l.bf16 %v1985_v48  ;;  %v2010_v59 = vunpack.c.l.bf16 %v1986_v20 }
 0x1fc   : > { %v1855_v4 = vadd.f32 %v1839_v25, %v1778_v52  ;;  %v2686_v12 = vmax.f32 %v2670_v15, 0.0  ;;  %v1856_v16 = vadd.f32 %v1840_v46, %v1779_v21  ;;  %v1914_v24 = vunpack.c.l.bf16 %v1898_v34 }
 0x1fd   : > { %v2011_v55 = vunpack.c.l.bf16 %v1987_v53  ;;  %v2701_v10 = vpack.c.bf16 %v2685_v51, %v2685_v51  ;;  %v2070_v42 = vrot.slane %v2009_v2, 4  ;;  %v2071_v45 = vrot.slane %v2010_v59, 4 }
 0x1fe   : > { %v1929_v63 = vadd.f32 %v5832_v54, %v1855_v4  ;;  %v2702_v39 = vpack.c.bf16 %v2686_v12, %v2686_v12  ;;  %v1930_v1 = vadd.f32 %v1914_v24, %v1856_v16  ;;  %v2136_v49 = vmul.f32 %v4358_v22, %v5819_v47 }
 0x1ff   : > { %v2073_v60 = vrot.slane %v2011_v55, 4  ;;  %v2911_v37 = vunpack.c.l.b16 %v2701_v10  ;;  %v2072_v9 = vsel %vm2039_vm4, %v2070_v42, %v2071_v45  ;;  %v2137_v0 = vmul.f32 %v4358_v22, %v5820_v31 }
 0x200   : > { %v2138_v43 = vmul.f32 %v4358_v22, %v5332_v38  ;;  %v2912_v14 = vunpack.c.l.b16 %v2702_v39  ;;  %v2108_v18 = vadd.f32 %v2072_v9, %v1929_v63  ;;  %v2160_v28 = vpack.c.bf16 %v2136_v49, %v2136_v49 }
 0x201   : > { %v2074_v50 = vsel %vm2039_vm4, %v2071_v45, %v2073_v60  ;;  %v2161_v40 = vpack.c.bf16 %v2137_v0, %v2137_v0  ;;  %v2289_v5 = vunpack.c.l.bf16 %v1707_v17  ;;  %v2311_v57 = vmul.f32 %v4406_v58, %v5381_v61 }
 0x202   : > { %v2109_v52 = vadd.f32 %v2074_v50, %v1930_v1  ;;  %v2162_v47 = vpack.c.bf16 %v2138_v43, %v2138_v43  ;;  %v2925_v41 = vpack.c.b16 %v2912_v14, %v2911_v37  ;;  %v2184_v21 = vunpack.c.l.bf16 %v2160_v28  ;;  %v5835_v37 = vld [vmem:[#allocation51_spill] sm:$0xff] }
 0x203   : > { %v2418_v26 = vrot.slane %v5833_v33, 4  ;;  %v2185_v25 = vunpack.c.l.bf16 %v2161_v40  ;;  %v2312_v48 = vmul.f32 %v4406_v58, %v2289_v5  ;;  %v2474_v20 = vmul.f32 %v5088_v3, %v5817_v19  ;;  %v5837_v40 = vld [vmem:[#allocation48_spill] sm:$0xff] }
 0x204   : > { %v2186_v56 = vunpack.c.l.bf16 %v2162_v47  ;;  %3005 = vmatmul.bf16.gmra.mxu1 %v2925_v41  ;;  %v2244_v15 = vrot.slane %v2184_v21, 4  ;;  %v2335_v46 = vpack.c.bf16 %v2311_v57, %v2311_v57  ;;  %v2475_v17 = vmul.f32 %v5088_v3, %v5824_v29  ;;  %v5838_v41 = vld [vmem:[#allocation28_spill] sm:$0xff]  ;;  %v5839_v21 = vld [vmem:[#allocation34_spill] sm:$0xff] }
 0x205   : > { %v2540_v34 = vmul.f32 %v5102_v30, %v5820_v31  ;;  %v2245_v8 = vrot.slane %v2185_v25, 4  ;;  %v2336_v51 = vpack.c.bf16 %v2312_v48, %v2312_v48  ;;  %v2490_v4 = vpack.c.bf16 %v2474_v20, %v2474_v20  ;;  %v5840_v57 = vld [vmem:[#allocation38_spill] sm:$0xff]  ;;  %v5841_v48 = vld [vmem:[#allocation57_spill] sm:$0xff] }
 0x206   : > { %v2247_v53 = vrot.slane %v2186_v56, 4  ;;  %v2359_v2 = vunpack.c.l.bf16 %v2335_v46  ;;  %v2491_v59 = vpack.c.bf16 %v2475_v17, %v2475_v17  ;;  %v2541_v12 = vmul.f32 %v5102_v30, %v5332_v38 }
 0x207   : > { %v2556_v16 = vpack.c.bf16 %v2540_v34, %v2540_v34  ;;  %v2246_v19 = vsel %vm2039_vm4, %v2244_v15, %v2245_v8  ;;  %v2360_v55 = vunpack.c.l.bf16 %v2336_v51  ;;  %v2506_v10 = vunpack.c.l.bf16 %v2490_v4  ;;  %v5842_v34 = vld [vmem:[#allocation52_spill] sm:$0xff] }
 0x208   : > { %v2248_v24 = vsel %vm2039_vm4, %v2245_v8, %v2247_v53  ;;  %v2282_v29 = vadd.f32 %v2246_v19, %v2108_v18  ;;  %v2419_v63 = vrot.slane %v2359_v2, 4  ;;  %v2507_v31 = vunpack.c.l.bf16 %v2491_v59  ;;  %v5844_v59 = vld [vmem:[#allocation73_spill] sm:$0xff] }
 0x209   : > { %v2283_v54 = vadd.f32 %v2248_v24, %v2109_v52  ;;  %v2421_v42 = vrot.slane %v2360_v55, 4  ;;  %v2557_v45 = vpack.c.bf16 %v2541_v12, %v2541_v12  ;;  %v2572_v39 = vunpack.c.l.bf16 %v2556_v16 }
 0x20a   : > { %v2609_v1 = vmul.f32 %v5112_v62, %v5381_v61  ;;  %v2420_v60 = vsel %vm2039_vm4, %v2418_v26, %v2419_v63  ;;  %v2610_v38 = vmul.f32 %v5112_v62, %v2289_v5  ;;  %v5834_v49 = vrot.slane %v5809_v11, 4 }
 0x20b   : > { %v5836_v9 = vpack.c.bf16 %v5835_v37, %v5835_v37  ;;  %v2422_v43 = vsel %vm2039_vm4, %v2419_v63, %v2421_v42  ;;  %v2456_v14 = vadd.f32 %v2420_v60, %v2282_v29  ;;  %v2573_v50 = vunpack.c.l.bf16 %v2557_v45 }
 0x20c   : > { %v1318_v32 = vsel %vm991_vm2, %v5810_v36, %v5834_v49  ;;  %v2625_v18 = vpack.c.bf16 %v2609_v1, %v2609_v1  ;;  %v2457_v28 = vadd.f32 %v2422_v43, %v2283_v54  ;;  %v2626_v61 = vpack.c.bf16 %v2610_v38, %v2610_v38 }
 0x20d   : > { %v1773_v0 = vunpack.c.l.bf16 %v5836_v9  ;;  %v1674_v52 = vpack.c.bf16 %v1318_v32, %v1318_v32  ;;  %v1802_v47 = vmul.f32 %v4340_v7, %v5837_v40  ;;  %v2522_v5 = vadd.f32 %v2506_v10, %v2456_v14  ;;  %v5848_v32 = vld [vmem:[#allocation35_spill] sm:$0xff] }
 0x20e   : > { %v2641_v11 = vunpack.c.l.bf16 %v2625_v18  ;;  %v1849_v36 = vadd.f32 %v5839_v21, %v5838_v41  ;;  %v1875_v33 = vmul.f32 %v4429_v27, %v5840_v57  ;;  %v2523_v26 = vadd.f32 %v2507_v31, %v2457_v28 }
 0x20f   : > { %v2642_v25 = vunpack.c.l.bf16 %v2626_v61  ;;  %v1818_v56 = vpack.c.bf16 %v1802_v47, %v1802_v47  ;;  %v1876_v20 = vmul.f32 %v4429_v27, %v5841_v48  ;;  %v2588_v15 = vadd.f32 %v2572_v39, %v2522_v5  ;;  %v5846_v39 = vld [vmem:[#allocation36_spill] sm:$0xff] }
 0x210   : > { %v1891_v46 = vpack.c.bf16 %v1875_v33, %v1875_v33  ;;  %v1937_v17 = vunpack.c.l.bf16 %v1674_v52  ;;  %v5843_v8 = vpack.c.bf16 %v5842_v34, %v5842_v34  ;;  %v2589_v51 = vadd.f32 %v2573_v50, %v2523_v26  ;;  %v5849_v50 = vld [vmem:[#allocation70_spill] sm:$0xff] }
 0x211   : > { %v1834_v4 = vunpack.c.l.bf16 %v1818_v56  ;;  %v1892_v2 = vpack.c.bf16 %v1876_v20, %v1876_v20  ;;  %v5845_v12 = vpack.c.bf16 %v5844_v59, %v5844_v59  ;;  %v2657_v19 = vadd.f32 %v2641_v11, %v2588_v15 }
 0x212   : > { %v2001_v53 = vunpack.c.l.bf16 %v5843_v8  ;;  %v1907_v24 = vunpack.c.l.bf16 %v1891_v46  ;;  %v1954_v55 = vmul.f32 %v4345_v13, %v1937_v17  ;;  %v2658_v10 = vadd.f32 %v2642_v25, %v2589_v51 }
 0x213   : > { %v5444_v16 = vunpack.c.l.bf16 %v5845_v12  ;;  %v1850_v29 = vadd.f32 %v1834_v4, %v1773_v0  ;;  %v1908_v54 = vunpack.c.l.bf16 %v1892_v2  ;;  %v2128_v63 = vmul.f32 %v4358_v22, %v5837_v40 }
 0x214   : > { %v2056_v27 = vrot.slane %v2001_v53, 4  ;;  %v2677_v31 = vadd.f32 %v5139_v35, %v2657_v19  ;;  %v1923_v42 = vadd.f32 %v1907_v24, %v1849_v36  ;;  %v1978_v45 = vpack.c.bf16 %v1954_v55, %v1954_v55  ;;  %v5850_v55 = vld [vmem:[#allocation49_spill] sm:$0xff] }
 0x215   : > { %v5847_v1 = vrot.slane %v5846_v39, 4  ;;  %v2678_v38 = vadd.f32 %v5139_v35, %v2658_v10  ;;  %v1924_v49 = vadd.f32 %v1908_v54, %v1850_v29  ;;  %v2151_v37 = vpack.c.bf16 %v5848_v32, %v5848_v32 }
 0x216   : > { %v2152_v9 = vpack.c.bf16 %v2128_v63, %v2128_v63  ;;  %v2693_v0 = vmax.f32 %v2677_v31, 0.0  ;;  %v2002_v43 = vunpack.c.l.bf16 %v1978_v45  ;;  %v2153_v18 = vpack.c.bf16 %v5849_v50, %v5849_v50  ;;  %v5851_v45 = vld [vmem:[#allocation66_spill] sm:$0xff] }
 0x217   : > { %v2057_v60 = vsel %vm2039_vm4, %v5847_v1, %v2056_v27  ;;  %v2694_v28 = vmax.f32 %v2678_v38, 0.0  ;;  %v2175_v61 = vunpack.c.l.bf16 %v2151_v37  ;;  %v2301_v47 = vmul.f32 %v4406_v58, %v5840_v57 }
 0x218   : > { %v2102_v14 = vadd.f32 %v2057_v60, %v1923_v42  ;;  %v2176_v52 = vunpack.c.l.bf16 %v2152_v9  ;;  %v2709_v5 = vpack.c.bf16 %v2693_v0, %v2693_v0  ;;  %v2058_v11 = vrot.slane %v2002_v43, 4 }
 0x219   : > { %v2177_v35 = vunpack.c.l.bf16 %v2153_v18  ;;  %v2302_v41 = vmul.f32 %v4406_v58, %v5841_v48  ;;  %v2710_v21 = vpack.c.bf16 %v2694_v28, %v2694_v28  ;;  %v2229_v36 = vrot.slane %v2175_v61, 4 }
 0x21a   : > { %v2230_v33 = vrot.slane %v2176_v52, 4  ;;  %v2303_v26 = vmul.f32 %v4406_v58, %v5444_v16  ;;  %v2919_v25 = vunpack.c.l.b16 %v2709_v5  ;;  %v2059_v56 = vsel %vm2039_vm4, %v2056_v27, %v2058_v11 }
 0x21b   : > { %v2232_v20 = vrot.slane %v2177_v35, 4  ;;  %v2325_v15 = vpack.c.bf16 %v2301_v47, %v2301_v47  ;;  %v2920_v46 = vunpack.c.l.b16 %v2710_v21  ;;  %v2103_v34 = vadd.f32 %v2059_v56, %v1924_v49 }
 0x21c   : > { %v2231_v8 = vsel %vm2039_vm4, %v2229_v36, %v2230_v33  ;;  %v2326_v53 = vpack.c.bf16 %v2302_v41, %v2302_v41  ;;  %v2327_v2 = vpack.c.bf16 %v2303_v26, %v2303_v26  ;;  %v2468_v10 = vmul.f32 %v5088_v3, %v5850_v55  ;;  %v5503_v55 = vld [vmem:[%s5786_s25] ss:$0 sm:$0xff] }
 0x21d   : > { %v2233_v51 = vsel %vm2039_vm4, %v2230_v33, %v2232_v20  ;;  %v2276_v4 = vadd.f32 %v2231_v8, %v2102_v14  ;;  %v2349_v59 = vunpack.c.l.bf16 %v2325_v15  ;;  %v2929_v12 = vpack.c.b16 %v2920_v46, %v2919_v25  ;;  %v5853_v46 = vld [vmem:[#allocation37_spill] sm:$0xff] }
 0x21e   : > { %v2277_v19 = vadd.f32 %v2233_v51, %v2103_v34  ;;  %v2350_v24 = vunpack.c.l.bf16 %v2326_v53  ;;  %v2351_v29 = vunpack.c.l.bf16 %v2327_v2  ;;  %v2469_v54 = vmul.f32 %v5088_v3, %v1937_v17 }
 0x21f   : > { %v2403_v27 = vrot.slane %v2349_v59, 4  ;;  %v2534_v63 = vmul.f32 %v5102_v30, %v5837_v40  ;;  %3025 = vmatmul.bf16.gmra.mxu2 %v2929_v12  ;;  %v2484_v42 = vpack.c.bf16 %v2468_v10, %v2468_v10  ;;  %v2535_v39 = vmul.f32 %v5102_v30, %v5851_v45  ;;  %v5496_v59 = vpop.f32.mrf.mxu0 }
 0x220   : > { %v2404_v31 = vrot.slane %v2350_v24, 4  ;;  %v2603_v1 = vmul.f32 %v5112_v62, %v5841_v48  ;;  %v2406_v60 = vrot.slane %v2351_v29, 4  ;;  %v2485_v38 = vpack.c.bf16 %v2469_v54, %v2469_v54 }
 0x221   : > { %v2550_v49 = vpack.c.bf16 %v2534_v63, %v2534_v63  ;;  %v2604_v32 = vmul.f32 %v5112_v62, %v5444_v16  ;;  %v2500_v37 = vunpack.c.l.bf16 %v2484_v42  ;;  %v2551_v9 = vpack.c.bf16 %v2535_v39, %v2535_v39 }
 0x222   : > { %v2405_v17 = vsel %vm2039_vm4, %v2403_v27, %v2404_v31  ;;  %v2619_v0 = vpack.c.bf16 %v2603_v1, %v2603_v1  ;;  %v2407_v43 = vsel %vm2039_vm4, %v2404_v31, %v2406_v60  ;;  %v2501_v50 = vunpack.c.l.bf16 %v2485_v38  ;;  %v5855_v1 = vld [vmem:[#allocation60_spill] sm:$0xff] }
 0x223   : > { %v2450_v14 = vadd.f32 %v2405_v17, %v2276_v4  ;;  %v2566_v18 = vunpack.c.l.bf16 %v2550_v49  ;;  %v2451_v28 = vadd.f32 %v2407_v43, %v2277_v19  ;;  %v2567_v61 = vunpack.c.l.bf16 %v2551_v9 }
 0x224   : > { %v2620_v52 = vpack.c.bf16 %v2604_v32, %v2604_v32  ;;  %v2635_v47 = vunpack.c.l.bf16 %v2619_v0  ;;  %v5852_v11 = vrot.slane %v5825_v44, 4  ;;  %v1749_v41 = vmul.f32 %v4338_v6, %v5837_v40  ;;  %v5856_v0 = vld [vmem:[#allocation43_spill] sm:$0xff] }
 0x225   : > { %v2516_v5 = vadd.f32 %v2500_v37, %v2450_v14  ;;  %v1810_v21 = vmul.f32 %v4340_v7, %v5841_v48  ;;  %v2517_v36 = vadd.f32 %v2501_v50, %v2451_v28  ;;  %v1965_v25 = vmul.f32 %v4345_v13, %v5837_v40 }
 0x226   : > { %v1662_v35 = vsel %vm991_vm2, %v5826_v23, %v5852_v11  ;;  %v2636_v33 = vunpack.c.l.bf16 %v2620_v52  ;;  %v1765_v20 = vpack.c.bf16 %v1749_v41, %v1749_v41  ;;  %v2075_v44 = vrot.slane %v5853_v46, 4  ;;  %v5854_v23 = vld [vmem:[#allocation74_spill] sm:$0xff] }
 0x227   : > { %v1710_v26 = vpack.c.bf16 %v1662_v35, %v1662_v35  ;;  %v2582_v56 = vadd.f32 %v2566_v18, %v2516_v5  ;;  %v1826_v15 = vpack.c.bf16 %v1810_v21, %v1810_v21  ;;  %v2583_v34 = vadd.f32 %v2567_v61, %v2517_v36  ;;  %v5857_v5 = vld [vmem:[#allocation59_spill] sm:$0xff]  ;;  %v2853_v21 = vpop.f32.mrf.mxu0 }
 0x228   : > { %v1989_v8 = vpack.c.bf16 %v1965_v25, %v1965_v25  ;;  %v2078_v53 = vrot.slane %v5854_v23, 4  ;;  %v2139_v6 = vmul.f32 %v4358_v22, %v5840_v57  ;;  %v1781_v7 = vunpack.c.l.bf16 %v1765_v20  ;;  %v5859_v23 = vld [vmem:[#allocation45_spill] sm:$0xff] }
 0x229   : > { %v2651_v51 = vadd.f32 %v2635_v47, %v2582_v56  ;;  %v1842_v4 = vunpack.c.l.bf16 %v1826_v15  ;;  %v2140_v2 = vmul.f32 %v4358_v22, %v5841_v48  ;;  %v2652_v13 = vadd.f32 %v2636_v33, %v2583_v34 }
 0x22a   : > { %v2013_v12 = vunpack.c.l.bf16 %v1989_v8  ;;  %v2141_v19 = vmul.f32 %v4358_v22, %v5444_v16  ;;  %v2163_v24 = vpack.c.bf16 %v2139_v6, %v2139_v6  ;;  %v2290_v27 = vunpack.c.l.bf16 %v1710_v26 }
 0x22b   : > { %v2671_v57 = vadd.f32 %v5503_v55, %v2651_v51  ;;  %v1858_v10 = vadd.f32 %v1842_v4, %v1781_v7  ;;  %v2164_v29 = vpack.c.bf16 %v2140_v2, %v2140_v2  ;;  %v2672_v54 = vadd.f32 %v5503_v55, %v2652_v13  ;;  %v5861_v51 = vld [vmem:[#allocation58_spill] sm:$0xff] }
 0x22c   : > { %v2076_v63 = vrot.slane %v2013_v12, 4  ;;  %v2165_v31 = vpack.c.bf16 %v2141_v19, %v2141_v19  ;;  %v2187_v42 = vunpack.c.l.bf16 %v2163_v24  ;;  %v2315_v38 = vmul.f32 %v4406_v58, %v2290_v27 }
 0x22d   : > { %v2687_v39 = vmax.f32 %v2671_v57, 0.0  ;;  %v1932_v60 = vadd.f32 %v5855_v1, %v1858_v10  ;;  %v2188_v22 = vunpack.c.l.bf16 %v2164_v29  ;;  %v2688_v49 = vmax.f32 %v2672_v54, 0.0 }
 0x22e   : > { %v2077_v32 = vsel %vm2039_vm4, %v2075_v44, %v2076_v63  ;;  %v2079_v17 = vsel %vm2039_vm4, %v2076_v63, %v2078_v53  ;;  %v2189_v37 = vunpack.c.l.bf16 %v2165_v31  ;;  %v2249_v50 = vrot.slane %v2187_v42, 4 }
 0x22f   : > { %v2703_v9 = vpack.c.bf16 %v2687_v39, %v2687_v39  ;;  %v2110_v43 = vadd.f32 %v2077_v32, %v5856_v0  ;;  %v2111_v14 = vadd.f32 %v2079_v17, %v1932_v60  ;;  %v2704_v18 = vpack.c.bf16 %v2688_v49, %v2688_v49 }
 0x230   : > { %v2250_v28 = vrot.slane %v2188_v22, 4  ;;  %v2252_v61 = vrot.slane %v2189_v37, 4  ;;  %v2339_v52 = vpack.c.bf16 %v2315_v38, %v2315_v38  ;;  %v5858_v11 = vpack.c.bf16 %v5857_v5, %v5857_v5 }
 0x231   : > { %v2913_v47 = vunpack.c.l.b16 %v2703_v9  ;;  %v2476_v35 = vmul.f32 %v5088_v3, %v5837_v40  ;;  %v2477_v41 = vmul.f32 %v5088_v3, %v5851_v45  ;;  %v2914_v36 = vunpack.c.l.b16 %v2704_v18 }
 0x232   : > { %v2362_v58 = vunpack.c.l.bf16 %v5858_v11  ;;  %v2251_v33 = vsel %vm2039_vm4, %v2249_v50, %v2250_v28  ;;  %v2253_v26 = vsel %vm2039_vm4, %v2250_v28, %v2252_v61  ;;  %v2363_v25 = vunpack.c.l.bf16 %v2339_v52  ;;  %v5538_v50 = vld [vmem:[%s5862_s18] ss:$0 sm:$0xff]  ;;  %s3836_s18 = scalar_lea.hbm %s5864_s21, 256 }
 0x233   : > { %v2284_v56 = vadd.f32 %v2251_v33, %v2110_v43  ;;  %v2285_v20 = vadd.f32 %v2253_v26, %v2111_v14  ;;  %v2492_v46 = vpack.c.bf16 %v2476_v35, %v2476_v35  ;;  %v2926_v44 = vpack.c.b16 %v2914_v36, %v2913_v47  ;;  %p3838_p9 = scmp.lt.s32.totalorder %s3836_s18, %s3832_s0 }
 0x234   : > { %v2424_v15 = vrot.slane %v2362_v58, 4  ;;  %v2426_v34 = vrot.slane %v2363_v25, 4  ;;  %v2493_v8 = vpack.c.bf16 %v2477_v41, %v2477_v41  ;;  %v2542_v40 = vmul.f32 %v5102_v30, %v5841_v48 }
 0x235   : > { %v5860_v53 = vrot.slane %v5859_v23, 4  ;;  %v2508_v45 = vunpack.c.l.bf16 %v2492_v46  ;;  %v2543_v6 = vmul.f32 %v5102_v30, %v5444_v16  ;;  %v2611_v7 = vmul.f32 %v5112_v62, %v5861_v51  ;;  %3010 = vmatmul.bf16.gmra.mxu1 %v2926_v44  ;;  %v2856_v30 = vpop.f32.mrf.mxu0  ;;  %v2876_v23 = vpop.f32.mrf.mxu3  ;;  %p3839_p10 = por %p3838_p9, %p3837_p7 }
 0x236   : > { %v2427_v4 = vsel %vm2039_vm4, %v2424_v15, %v2426_v34  ;;  %v2509_v13 = vunpack.c.l.bf16 %v2493_v8  ;;  %v2558_v12 = vpack.c.bf16 %v2542_v40, %v2542_v40  ;;  %v2612_v48 = vmul.f32 %v5112_v62, %v2290_v27  ;;  %v2996_v27 = vpop.f32.mrf.mxu1 }
 0x237   : > { %v2425_v3 = vsel %vm2039_vm4, %v5860_v53, %v2424_v15  ;;  %v2459_v19 = vadd.f32 %v2427_v4, %v2285_v20  ;;  %v2559_v24 = vpack.c.bf16 %v2543_v6, %v2543_v6  ;;  %v2627_v57 = vpack.c.bf16 %v2611_v7, %v2611_v7  ;;  %p3840_p11 = pnand %p3839_p10, %p3835_p8 }
 0x238   : > { %v2458_v2 = vadd.f32 %v2425_v3, %v2284_v56  ;;  %v2574_v29 = vunpack.c.l.bf16 %v2558_v12  ;;  %v2628_v31 = vpack.c.bf16 %v2612_v48, %v2612_v48  ;;  %v2997_v14 = vadd.f32 %v2996_v27, %v5496_v59  ;;  %v3016_v56 = vpop.f32.mrf.mxu2 }
 0x239   : > { %v2525_v54 = vadd.f32 %v2509_v13, %v2459_v19  ;;  %v2575_v63 = vunpack.c.l.bf16 %v2559_v24  ;;  %v2643_v42 = vunpack.c.l.bf16 %v2627_v57 }
 0x23a   : > { %v2524_v10 = vadd.f32 %v2508_v45, %v2458_v2  ;;  %v2644_v1 = vunpack.c.l.bf16 %v2628_v31  ;;  %v3040_v61 = vadd.f32 %v5538_v50, %v2997_v14 }
 0x23b   : > { %v2591_v39 = vadd.f32 %v2575_v63, %v2525_v54 }
 0x23c   : > { %v2590_v16 = vadd.f32 %v2574_v29, %v2524_v10  ;;  %v3056_v5 = vmax.f32 %v3040_v61, 0.0 }
 0x23d   : > { %v2660_v22 = vadd.f32 %v2644_v1, %v2591_v39  ;;  %v2858_v62 = vpop.f32.mrf.mxu0  ;;  %v2878_v12 = vpop.f32.mrf.mxu3 }
 0x23e   : > { %v2659_v60 = vadd.f32 %v2643_v42, %v2590_v16 }
 0x23f   : > { %v2680_v49 = vadd.f32 %v5503_v55, %v2660_v22 }
 0x240   : > { %v2679_v38 = vadd.f32 %v5503_v55, %v2659_v60  ;;  %v2998_v55 = vpop.f32.mrf.mxu1  ;;  %v3018_v34 = vpop.f32.mrf.mxu2 }
 0x241   : > { %v2696_v17 = vmax.f32 %v2680_v49, 0.0  ;;  %v2999_v52 = vadd.f32 %v2998_v55, %v2853_v21 }
 0x242   : > { %v2695_v32 = vmax.f32 %v2679_v38, 0.0 }
 0x243   : > { %v2712_v9 = vpack.c.bf16 %v2696_v17, %v2696_v17  ;;  %v3041_v47 = vadd.f32 %v5538_v50, %v2999_v52 }
 0x244   : > { %v2711_v37 = vpack.c.bf16 %v2695_v32, %v2695_v32 }
 0x245   : > { %v2922_v43 = vunpack.c.l.b16 %v2712_v9  ;;  %v2861_v28 = vpop.f32.mrf.mxu0  ;;  %v3057_v11 = vmax.f32 %v3041_v47, 0.0  ;;  %v2881_v38 = vpop.f32.mrf.mxu3 }
 0x246   : > { %v2921_v0 = vunpack.c.l.b16 %v2711_v37 }
 0x247   : > { %v3500_v58 = vpack.c.bf16 %v3057_v11, %v3056_v5 }
 0x248   : > { %v2930_v18 = vpack.c.b16 %v2922_v43, %v2921_v0 }
 0x249   : > { %3501 = vst [vmem:[%s5543_s6] sm:$0xff] %v3500_v58  }
 0x24a   : > { %3030 = vmatmul.bf16.gmra.mxu2 %v2930_v18 }
 0x24c   : > { %v3001_v59 = vpop.f32.mrf.mxu1 }
 0x24d   : > { %v2863_v35 = vpop.f32.mrf.mxu0  ;;  %v3002_v41 = vadd.f32 %v3001_v59, %v2856_v30  ;;  %v2883_v17 = vpop.f32.mrf.mxu3 }
 0x24f   : > { %v3042_v26 = vadd.f32 %v5538_v50, %v3002_v41 }
 0x251   : > { %v3058_v20 = vmax.f32 %v3042_v26, 0.0 }
 0x254   : > { %v3003_v33 = vpop.f32.mrf.mxu1 }
 0x255   : > { %v2866_v36 = vpop.f32.mrf.mxu0  ;;  %v3004_v25 = vadd.f32 %v3003_v33, %v2858_v62 }
 0x257   : > { %v3043_v21 = vadd.f32 %v5538_v50, %v3004_v25 }
 0x259   : > { %v3059_v15 = vmax.f32 %v3043_v21, 0.0 }
 0x25b   : > { %v3505_v44 = vpack.c.bf16 %v3059_v15, %v3058_v20 }
 0x25d   : > { %v2868_v46 = vpop.f32.mrf.mxu0  ;;  %3537 = vst [vmem:[%s5543_s6 + $0x8] sm:$0xff] %v3505_v44  }
 0x265   : > { %v2871_v8 = vpop.f32.mrf.mxu0 }
 0x266   : > { %v3017_v40 = vadd.f32 %v3016_v56, %v2871_v8 }
 0x268   : > { %v3048_v45 = vadd.f32 %v5538_v50, %v3017_v40 }
 0x26a   : > { %v3064_v4 = vmax.f32 %v3048_v45, 0.0 }
 0x26d   : > { %v2873_v3 = vpop.f32.mrf.mxu0 }
 0x26e   : > { %v3021_v53 = vpop.f32.mrf.mxu2  ;;  %v3019_v6 = vadd.f32 %v3018_v34, %v2873_v3 }
 0x26f   : > { %v3022_v7 = vadd.f32 %v3021_v53, %v2876_v23 }
 0x270   : > { %v3049_v51 = vadd.f32 %v5538_v50, %v3019_v6 }
 0x271   : > { %v3050_v24 = vadd.f32 %v5538_v50, %v3022_v7 }
 0x272   : > { %v3065_v2 = vmax.f32 %v3049_v51, 0.0 }
 0x273   : > { %v3066_v10 = vmax.f32 %v3050_v24, 0.0 }
 0x274   : > { %v3520_v13 = vpack.c.bf16 %v3065_v2, %v3064_v4 }
 0x276   : > { %v3023_v19 = vpop.f32.mrf.mxu2  ;;  %3540 = vst [vmem:[%s5543_s6 + $0x20] sm:$0xff] %v3520_v13  }
 0x277   : > { %v3024_v48 = vadd.f32 %v3023_v19, %v2878_v12 }
 0x279   : > { %v3051_v57 = vadd.f32 %v5538_v50, %v3024_v48 }
 0x27b   : > { %v3067_v29 = vmax.f32 %v3051_v57, 0.0 }
 0x27d   : > { %v3525_v54 = vpack.c.bf16 %v3067_v29, %v3066_v10 }
 0x27f   : > { %3541 = vst [vmem:[%s5543_s6 + $0x28] sm:$0xff] %v3525_v54  }
 0x281   : > { %v3006_v63 = vpop.f32.mrf.mxu1 }
 0x282   : > { %v3007_v31 = vadd.f32 %v3006_v63, %v2861_v28 }
 0x284   : > { %v3044_v16 = vadd.f32 %v5538_v50, %v3007_v31 }
 0x286   : > { %v3060_v1 = vmax.f32 %v3044_v16, 0.0 }
 0x289   : > { %v3008_v30 = vpop.f32.mrf.mxu1 }
 0x28a   : > { %v3009_v42 = vadd.f32 %v3008_v30, %v2863_v35  ;;  %v2886_v35 = vpop.f32.mrf.mxu3 }
 0x28c   : > { %v3045_v39 = vadd.f32 %v5538_v50, %v3009_v42 }
 0x28e   : > { %v3061_v60 = vmax.f32 %v3045_v39, 0.0 }
 0x290   : > { %v3510_v22 = vpack.c.bf16 %v3061_v60, %v3060_v1 }
 0x292   : > { %3538 = vst [vmem:[%s5543_s6 + $0x10] sm:$0xff] %v3510_v22  }
 0x2a2   : > { %v3026_v49 = vpop.f32.mrf.mxu2 }
 0x2a3   : > { %v3027_v32 = vadd.f32 %v3026_v49, %v2881_v38 }
 0x2a5   : > { %v3052_v27 = vadd.f32 %v5538_v50, %v3027_v32 }
 0x2a7   : > { %v3068_v0 = vmax.f32 %v3052_v27, 0.0 }
 0x2aa   : > { %v3028_v62 = vpop.f32.mrf.mxu2 }
 0x2ab   : > { %v3029_v37 = vadd.f32 %v3028_v62, %v2883_v17 }
 0x2ad   : > { %v3053_v9 = vadd.f32 %v5538_v50, %v3029_v37 }
 0x2af   : > { %v3069_v43 = vmax.f32 %v3053_v9, 0.0 }
 0x2b1   : > { %v3530_v14 = vpack.c.bf16 %v3069_v43, %v3068_v0 }
 0x2b2   : > { %v3011_v18 = vpop.f32.mrf.mxu1 }
 0x2b3   : > { %3542 = vst [vmem:[%s5543_s6 + $0x30] sm:$0xff] %v3530_v14   ;;  %v3012_v28 = vadd.f32 %v3011_v18, %v2866_v36  ;;  %v2888_v36 = vpop.f32.mrf.mxu3 }
 0x2b5   : > { %v3046_v61 = vadd.f32 %v5538_v50, %v3012_v28 }
 0x2b7   : > { %v3062_v5 = vmax.f32 %v3046_v61, 0.0 }
 0x2ba   : > { %v3013_v55 = vpop.f32.mrf.mxu1 }
 0x2bb   : > { %v3014_v52 = vadd.f32 %v3013_v55, %v2868_v46 }
 0x2bd   : > { %v3047_v47 = vadd.f32 %v5538_v50, %v3014_v52 }
 0x2bf   : > { %v3063_v11 = vmax.f32 %v3047_v47, 0.0 }
 0x2c1   : > { %v3515_v58 = vpack.c.bf16 %v3063_v11, %v3062_v5 }
 0x2c3   : > { %3539 = vst [vmem:[%s5543_s6 + $0x18] sm:$0xff] %v3515_v58  }
 0x2cd   : > { %v3031_v59 = vpop.f32.mrf.mxu2 }
 0x2ce   : > { %v3032_v41 = vadd.f32 %v3031_v59, %v2886_v35 }
 0x2d0   : > { %v3054_v26 = vadd.f32 %v5538_v50, %v3032_v41 }
 0x2d2   : > { %v3070_v21 = vmax.f32 %v3054_v26, 0.0 }
 0x2d5   : > { %v3033_v33 = vpop.f32.mrf.mxu2 }
 0x2d6   : > { %v3034_v25 = vadd.f32 %v3033_v33, %v2888_v36 }
 0x2d8   : > { %v3055_v56 = vadd.f32 %v5538_v50, %v3034_v25 }
 0x2da   : > { %v3071_v20 = vmax.f32 %v3055_v56, 0.0 }
 0x2dc   : > { %v3535_v15 = vpack.c.bf16 %v3071_v20, %v3070_v21 }
 0x2de   : > { %3543 = vst [vmem:[%s5543_s6 + $0x38] sm:$0xff] %v3535_v15  }
 0x2df   : > { %3843 = shalt.err (!%p3840_p11)
}
 0x2e0   : > { %s3958_s7 = smov 64   ;;  %s3959_s6 = smov 4  }
 0x2e1   : > { %3571 = dma.vmem_to_hbm [thread:$0]  (%p4160_p5), %s3121_s19, 1024, %s3123_s11, %s3105_s8, %s3958_s7, %s3958_s7, %s3959_s6  }
 0x2e2 PF: > { %s5865_s27 = sld [smem:[#allocation16_spill]]  ;;  %p3596_p12 = scmp.ge.s32.totalorder %s3950_s15, 2 }
 0x2e4   : > { %p3588_p1 = pnand %p3596_p12, %p4075_p6 }
 0x2e6   : > { %p3589_p3 = pneg %p3588_p1 }
 0x2e8   : > { %s3137_s16 = sand.u32 1, %s5865_s27  }
 0x2e9   : > { %s3138_s17 = scalar_lea.sflag [#allocation4], %s3137_s16 }
 0x2ea   : > { %3905 = dma.done.wait (%p3589_p3), %s3138_s17, 1024  }
 0x2eb   : > { %3907 = vsyncadd (%p3589_p3), %s3138_s17, 4294966272  ;;  %s28_s15 = sadd.s32 1, %s3950_s15   ;;  %s5867_s4 = sld [smem:[#allocation17_spill]] }
 0x2ec   : > { %p25_p13 = scmp.ge.s32.totalorder %s28_s15, 6   ;;  %s5868_s10 = sld [smem:[#allocation22_spill]] }
 0x2ed   : > { %s5869_s3 = sld [smem:[#allocation20_spill]]  ;;  %s5871_s27 = smov %s3914_s28 }
 0x2ee   : > { %s5870_s19 = sld [smem:[#allocation21_spill]]  ;;  %s5872_s28 = smov %s3918_s29 }
 0x2ef   : > { %s5873_s29 = smov %s4154_s12  ;;  %s5874_s30 = smov %s3926_s9 }
 0x2f0   : > { %s5876_s11 = smov %s3942_s13  ;;  %s5877_s12 = smov %s3946_s14 }
 0x2f1   : > { %s5875_s9 = smov %s5867_s4  ;;  %27 = sbr.rel (!%p25_p13) target bundleno = 20 (0x14), region = 132 }
 0x2f3   : > { %s5878_s13 = smov %s5869_s3 }
 0x2f4   : > { %s5879_s14 = smov %s5870_s19 }
 0x2f6   :  { %3144 = vsyncpa [#allocation3], 1 }
 0x2f7   :  { %3146 = vsyncpa [#allocation3 + $0x1], 1 }
 0x2f8   :  { %3147 = vsyncpa [#allocation6], 1 }
 0x2f9   :  { %3149 = vsyncpa [#allocation6 + $0x1], 1 }
 0x2fa   :  { %3150 = vsyncpa [#allocation9], 1 }
 0x2fb   :  { %3151 = vsyncpa [#allocation4], 1 }
 0x2fc   :  { %3153 = vsyncpa [#allocation4 + $0x1], 1 }

</bundles_post_ra>
